<compile_context>
chip_gen: v7x
topology: tpu7x:2x2x1
jax: 0.10.0
libtpu: 0.0.40
codegen_flags: <defaults>
</compile_context>

<pallas_src>
import functools
import math

import jax
import jax.numpy as jnp
from jax.experimental import pallas as pl
from jax.experimental.pallas import tpu as pltpu


# ---------------------------------------------------------------------------
# helpers
# ---------------------------------------------------------------------------
def _full_spec(shape):
    nd = len(shape)
    return pl.BlockSpec(shape, lambda i, _nd=nd: (0,) * _nd)


def _block_diag2(w):
    """[[W, 0], [0, W]] so one matmul projects both packed streams."""
    d_in, d_out = w.shape
    z = jnp.zeros((d_in, d_out), w.dtype)
    top = jnp.concatenate([w, z], axis=1)
    bot = jnp.concatenate([z, w], axis=1)
    return jnp.concatenate([top, bot], axis=0)


def _tile2(v):
    """[v | v] along lanes (for biases / BN params of the packed streams)."""
    return jnp.concatenate([v, v], axis=1)


# ---------------------------------------------------------------------------
# The single fused DGI forward kernel
# ---------------------------------------------------------------------------
def dgi_fused_kernel(n_layers, n_nodes, hidden, n_edges, compute_dtype, *refs):
    # ---- unpack refs (inputs ..., then outputs) ----
    idx = 0
    a_refs = refs[idx:idx + n_layers]; idx += n_layers          # n_layers x (N,N)
    h0_ref = refs[idx]; idx += 1                                 # (N, 2*Din)
    sage = []
    for _ in range(n_layers):                                    # (2D,2H),(2D,2H),(1,2H)
        sage.append(refs[idx:idx + 3]); idx += 3
    bns = []
    for _ in range(n_layers - 1):                                # (1,2H),(1,2H)
        bns.append(refs[idx:idx + 2]); idx += 2
    dw_ref = refs[idx]; idx += 1                                 # (H,H)
    w1_ref, b1_ref, w2_ref, b2_ref, w3_ref, b3_ref = refs[idx:idx + 6]; idx += 6
    eidx_ref = refs[idx]; idx += 1                               # (4E, 1) int32 ids
    pred_ref = refs[idx]; idx += 1                               # (2E, 1) out
    loss_ref = refs[idx]; idx += 1                               # (1, 1)  out

    def mm(a, b):
        return jnp.dot(a.astype(compute_dtype), b.astype(compute_dtype),
                       preferred_element_type=jnp.float32)

    # ---- fused two-stream encoder: lanes [:D]=positive, [D:]=corrupted ----
    h = h0_ref[...]
    for l in range(n_layers):
        ws_ref, wn_ref, b_ref = sage[l]
        agg = mm(a_refs[l][...], h)                   # shared A@[h_pos|h_neg]
        out = mm(h, ws_ref[...]) + mm(agg, wn_ref[...]) + b_ref[...]
        if l != n_layers - 1:
            gamma_ref, beta_ref = bns[l]
            # BatchNorm1d (training-mode batch stats; per-stream because the
            # two streams occupy disjoint feature columns) + ReLU.
            mu = jnp.mean(out, axis=0, keepdims=True)
            var = jnp.mean((out - mu) ** 2, axis=0, keepdims=True)
            out = (out - mu) * jax.lax.rsqrt(var + 1e-5) * gamma_ref[...] \
                  + beta_ref[...]
            out = jnp.maximum(out, 0.0)
            # dropout == identity (see TODO at top)
        h = out

    positive = h[:, :hidden]                          # (N, H)
    negative = h[:, hidden:]                          # (N, H)

    # ---- summary + bilinear discriminator + BCEWithLogits losses ----
    summary = jax.nn.sigmoid(jnp.mean(positive, axis=0, keepdims=True))   # (1,H)
    # (W @ summary^T) as a lane reduction -> (H,1); logits = feats @ (W @ s^T)
    ws_col = jnp.sum(dw_ref[...] * summary, axis=1, keepdims=True)        # (H,1)
    logit_pos = mm(positive, ws_col)                                      # (N,1)
    logit_neg = mm(negative, ws_col)                                      # (N,1)

    def softplus(x):                      # stable: max(x,0)+log1p(exp(-|x|))
        return jnp.maximum(x, 0.0) + jnp.log1p(jnp.exp(-jnp.abs(x)))

    l1 = jnp.mean(softplus(-logit_pos), axis=(0, 1), keepdims=True)  # BCE(target=1)
    l2 = jnp.mean(softplus(logit_neg), axis=(0, 1), keepdims=True)   # BCE(target=0)
    loss_ref[...] = l1 + l2

    # ---- edge predictor MLP on h_src * h_dst (pos and neg edges merged) ----
    # One-hot gather mask built IN-KERNEL from the (4E,1) int32 id vector:
    # no (4E,N) f32 HBM transfer, gather happens as one MXU matmul.
    n_rows = 4 * n_edges
    lanes = jax.lax.broadcasted_iota(jnp.int32, (n_rows, n_nodes), 1)
    onehot = (lanes == eidx_ref[...]).astype(compute_dtype)               # (4E,N)
    gathered = jnp.dot(onehot, positive.astype(compute_dtype),
                       preferred_element_type=jnp.float32)                # (4E,H)
    h_src = gathered[:2 * n_edges]
    h_dst = gathered[2 * n_edges:]
    x_pred = h_src * h_dst                             # (2E, H)
    z1 = jnp.maximum(mm(x_pred, w1_ref[...]) + b1_ref[...], 0.0)
    z2 = jnp.maximum(mm(z1, w2_ref[...]) + b2_ref[...], 0.0)
    pred_ref[...] = mm(z2, w3_ref[...]) + b3_ref[...]  # (2E, 1)


# ---------------------------------------------------------------------------
# wrapper: packs weights, ships edge ids, calls the fused kernel once
# ---------------------------------------------------------------------------
def dgi_forward(params, blocks, x, perm, pos_src, pos_dst, neg_src, neg_dst,
                compute_dtype=jnp.float32):
    n_layers = len(params["sage"])
    n = x.shape[0]
    hidden = params["disc_w"].shape[0]
    e = pos_src.shape[0]

    # two-stream input: lanes [:Din]=x (positive), [Din:]=x[perm] (corruption)
    h0 = jnp.concatenate([x, x[perm]], axis=1)

    args, specs = [], []

    def add(arr):
        args.append(arr)
        specs.append(_full_spec(arr.shape))

    for a in blocks:
        add(a)
    add(h0)
    for p in params["sage"]:
        add(_block_diag2(p["w_self"]))
        add(_block_diag2(p["w_neigh"]))
        add(_tile2(p["bias"]))
    for bn in params["bn"]:                           # n_layers - 1 entries
        add(_tile2(bn["gamma"]))
        add(_tile2(bn["beta"]))
    add(params["disc_w"])
    pr = params["pred"]
    for k in ("w1", "b1", "w2", "b2", "w3", "b3"):
        add(pr[k])
    # edge endpoint ids: [pos_src; neg_src; pos_dst; neg_dst]  -> (4E, 1) int32
    idxs = jnp.concatenate([pos_src, neg_src, pos_dst, neg_dst]).astype(jnp.int32)
    add(idxs.reshape(4 * e, 1))

    kernel = functools.partial(dgi_fused_kernel, n_layers, n, hidden, e,
                               compute_dtype)
    pred, loss = pl.pallas_call(
        kernel,
        out_shape=(jax.ShapeDtypeStruct((2 * e, 1), jnp.float32),
                   jax.ShapeDtypeStruct((1, 1), jnp.float32)),
        grid=(1,),
        in_specs=specs,
        out_specs=[_full_spec((2 * e, 1)), _full_spec((1, 1))],
        compiler_params=pltpu.CompilerParams(
            dimension_semantics=("arbitrary",),
            vmem_limit_bytes=64 * 1024 * 1024),
    )(*args)

    h_pos = pred[:e]
    h_neg = pred[e:]
    return h_pos, h_neg, loss[0, 0]


# ---------------------------------------------------------------------------
# parameter init (matches PyTorch defaults for Linear / BatchNorm / uniform)
# ---------------------------------------------------------------------------
def init_params(key, input_dim, hidden_dim, n_layers):
    params = {"sage": [], "bn": [], "pred": {}, "disc_w": None}
    dims = [input_dim] + [hidden_dim] * n_layers
    for l in range(n_layers):
        key, k1, k2, k3 = jax.random.split(key, 4)
        bound = 1.0 / math.sqrt(dims[l])
        params["sage"].append({
            "w_self": jax.random.uniform(k1, (dims[l], hidden_dim), jnp.float32,
                                         -bound, bound),
            "w_neigh": jax.random.uniform(k2, (dims[l], hidden_dim), jnp.float32,
                                          -bound, bound),
            "bias": jax.random.uniform(k3, (1, hidden_dim), jnp.float32,
                                       -bound, bound),
        })
    for _ in range(n_layers - 1):
        params["bn"].append({
            "gamma": jnp.ones((1, hidden_dim), jnp.float32),
            "beta": jnp.zeros((1, hidden_dim), jnp.float32),
        })
    key, kd = jax.random.split(key)
    db = 1.0 / math.sqrt(hidden_dim)
    params["disc_w"] = jax.random.uniform(kd, (hidden_dim, hidden_dim),
                                          jnp.float32, -db, db)
    key, p1, p2, p3, p4, p5, p6 = jax.random.split(key, 7)
    hb = 1.0 / math.sqrt(hidden_dim)
    params["pred"] = {
        "w1": jax.random.uniform(p1, (hidden_dim, hidden_dim), jnp.float32, -hb, hb),
        "b1": jax.random.uniform(p2, (1, hidden_dim), jnp.float32, -hb, hb),
        "w2": jax.random.uniform(p3, (hidden_dim, hidden_dim), jnp.float32, -hb, hb),
        "b2": jax.random.uniform(p4, (1, hidden_dim), jnp.float32, -hb, hb),
        "w3": jax.random.uniform(p5, (hidden_dim, 1), jnp.float32, -hb, hb),
        "b3": jax.random.uniform(p6, (1, 1), jnp.float32, -hb, hb),
    }
    return params


# ---------------------------------------------------------------------------
# main
# ---------------------------------------------------------------------------
if __name__ == "__main__":
    N = 64            # nodes
    INPUT_DIM = 16
    HIDDEN = 32
    N_LAYERS = 3
    E = 8             # edges in pair_graph / neg_pair_graph

    root = jax.random.PRNGKey(0)
    k_param, k_feat, k_adj, k_perm, k_edge = jax.random.split(root, 5)

    params = init_params(k_param, INPUT_DIM, HIDDEN, N_LAYERS)

    # node features
    x = jax.random.normal(k_feat, (N, INPUT_DIM), jnp.float32)

    # blocks: dense row-normalized mean-aggregation matrices (N_dst, N_src)
    blocks = []
    for _ in range(N_LAYERS):
        k_adj, kk = jax.random.split(k_adj)
        adj = (jax.random.uniform(kk, (N, N)) < 0.1).astype(jnp.float32)
        deg = jnp.maximum(adj.sum(axis=1, keepdims=True), 1.0)
        blocks.append(adj / deg)

    # corruption permutation (deterministic stand-in for torch.randperm)
    perm = jax.random.permutation(k_perm, N)

    # pair_graph / neg_pair_graph edges
    k_e1, k_e2, k_e3, k_e4 = jax.random.split(k_edge, 4)
    pos_src = jax.random.randint(k_e1, (E,), 0, N)
    pos_dst = jax.random.randint(k_e2, (E,), 0, N)
    neg_src = jax.random.randint(k_e3, (E,), 0, N)
    neg_dst = jax.random.randint(k_e4, (E,), 0, N)

    # compute_dtype=jnp.bfloat16 is recommended on v6e/v7x at large N; the
    # default keeps exact f32 parity with the PyTorch reference.
    h_pos, h_neg, loss = dgi_forward(params, blocks, x, perm,
                                     pos_src, pos_dst, neg_src, neg_dst,
                                     compute_dtype=jnp.float32)
    jax.block_until_ready((h_pos, h_neg, loss))

    assert h_pos.shape == (E, 1) and h_neg.shape == (E, 1) and loss.shape == ()
    assert bool(jnp.isfinite(loss)) and bool(jnp.all(jnp.isfinite(h_pos))) \
        and bool(jnp.all(jnp.isfinite(h_neg)))
    print("KERNEL_OK")
</pallas_src>

<mosaic_0001>
module attributes {stable_mosaic.version = 11 : i64} {
  func.func @dgi_fused_kernel(%arg0: i32, %arg1: memref<64x64xf32, #tpu.memory_space<vmem>>, %arg2: memref<64x64xf32, #tpu.memory_space<vmem>>, %arg3: memref<64x64xf32, #tpu.memory_space<vmem>>, %arg4: memref<64x32xf32, #tpu.memory_space<vmem>>, %arg5: memref<32x64xf32, #tpu.memory_space<vmem>>, %arg6: memref<32x64xf32, #tpu.memory_space<vmem>>, %arg7: memref<1x64xf32, #tpu.memory_space<vmem>>, %arg8: memref<64x64xf32, #tpu.memory_space<vmem>>, %arg9: memref<64x64xf32, #tpu.memory_space<vmem>>, %arg10: memref<1x64xf32, #tpu.memory_space<vmem>>, %arg11: memref<64x64xf32, #tpu.memory_space<vmem>>, %arg12: memref<64x64xf32, #tpu.memory_space<vmem>>, %arg13: memref<1x64xf32, #tpu.memory_space<vmem>>, %arg14: memref<1x64xf32, #tpu.memory_space<vmem>>, %arg15: memref<1x64xf32, #tpu.memory_space<vmem>>, %arg16: memref<1x64xf32, #tpu.memory_space<vmem>>, %arg17: memref<1x64xf32, #tpu.memory_space<vmem>>, %arg18: memref<32x32xf32, #tpu.memory_space<vmem>>, %arg19: memref<32x32xf32, #tpu.memory_space<vmem>>, %arg20: memref<1x32xf32, #tpu.memory_space<vmem>>, %arg21: memref<32x32xf32, #tpu.memory_space<vmem>>, %arg22: memref<1x32xf32, #tpu.memory_space<vmem>>, %arg23: memref<32x1xf32, #tpu.memory_space<vmem>>, %arg24: memref<1x1xf32, #tpu.memory_space<vmem>>, %arg25: memref<32x1xi32, #tpu.memory_space<vmem>>, %arg26: memref<16x1xf32, #tpu.memory_space<vmem>>, %arg27: memref<1x1xf32, #tpu.memory_space<vmem>>) attributes {dimension_semantics = [#tpu.dimension_semantics<arbitrary>], iteration_bounds = array<i64: 1>, scalar_prefetch = 0 : i64, scratch_operands = 0 : i64, tpu.core_type = #tpu.core_type<tc>, window_params = [{pipeline_mode = #tpu.pipeline_mode<synchronous>, transform_indices = @transform_0, window_bounds = array<i64: 64, 64>}, {pipeline_mode = #tpu.pipeline_mode<synchronous>, transform_indices = @transform_1, window_bounds = array<i64: 64, 64>}, {pipeline_mode = #tpu.pipeline_mode<synchronous>, transform_indices = @transform_2, window_bounds = array<i64: 64, 64>}, {pipeline_mode = #tpu.pipeline_mode<synchronous>, transform_indices = @transform_3, window_bounds = array<i64: 64, 32>}, {pipeline_mode = #tpu.pipeline_mode<synchronous>, transform_indices = @transform_4, window_bounds = array<i64: 32, 64>}, {pipeline_mode = #tpu.pipeline_mode<synchronous>, transform_indices = @transform_5, window_bounds = array<i64: 32, 64>}, {pipeline_mode = #tpu.pipeline_mode<synchronous>, transform_indices = @transform_6, window_bounds = array<i64: 1, 64>}, {pipeline_mode = #tpu.pipeline_mode<synchronous>, transform_indices = @transform_7, window_bounds = array<i64: 64, 64>}, {pipeline_mode = #tpu.pipeline_mode<synchronous>, transform_indices = @transform_8, window_bounds = array<i64: 64, 64>}, {pipeline_mode = #tpu.pipeline_mode<synchronous>, transform_indices = @transform_9, window_bounds = array<i64: 1, 64>}, {pipeline_mode = #tpu.pipeline_mode<synchronous>, transform_indices = @transform_10, window_bounds = array<i64: 64, 64>}, {pipeline_mode = #tpu.pipeline_mode<synchronous>, transform_indices = @transform_11, window_bounds = array<i64: 64, 64>}, {pipeline_mode = #tpu.pipeline_mode<synchronous>, transform_indices = @transform_12, window_bounds = array<i64: 1, 64>}, {pipeline_mode = #tpu.pipeline_mode<synchronous>, transform_indices = @transform_13, window_bounds = array<i64: 1, 64>}, {pipeline_mode = #tpu.pipeline_mode<synchronous>, transform_indices = @transform_14, window_bounds = array<i64: 1, 64>}, {pipeline_mode = #tpu.pipeline_mode<synchronous>, transform_indices = @transform_15, window_bounds = array<i64: 1, 64>}, {pipeline_mode = #tpu.pipeline_mode<synchronous>, transform_indices = @transform_16, window_bounds = array<i64: 1, 64>}, {pipeline_mode = #tpu.pipeline_mode<synchronous>, transform_indices = @transform_17, window_bounds = array<i64: 32, 32>}, {pipeline_mode = #tpu.pipeline_mode<synchronous>, transform_indices = @transform_18, window_bounds = array<i64: 32, 32>}, {pipeline_mode = #tpu.pipeline_mode<synchronous>, transform_indices = @transform_19, window_bounds = array<i64: 1, 32>}, {pipeline_mode = #tpu.pipeline_mode<synchronous>, transform_indices = @transform_20, window_bounds = array<i64: 32, 32>}, {pipeline_mode = #tpu.pipeline_mode<synchronous>, transform_indices = @transform_21, window_bounds = array<i64: 1, 32>}, {pipeline_mode = #tpu.pipeline_mode<synchronous>, transform_indices = @transform_22, window_bounds = array<i64: 32, 1>}, {pipeline_mode = #tpu.pipeline_mode<synchronous>, transform_indices = @transform_23, window_bounds = array<i64: 1, 1>}, {pipeline_mode = #tpu.pipeline_mode<synchronous>, transform_indices = @transform_24, window_bounds = array<i64: 32, 1>}, {pipeline_mode = #tpu.pipeline_mode<synchronous>, transform_indices = @transform_25, window_bounds = array<i64: 16, 1>}, {pipeline_mode = #tpu.pipeline_mode<synchronous>, transform_indices = @transform_26, window_bounds = array<i64: 1, 1>}]} {
    %c0 = arith.constant 0 : index
    %c0_0 = arith.constant 0 : index
    %0 = vector.load %arg4[%c0, %c0_0] : memref<64x32xf32, #tpu.memory_space<vmem>>, vector<64x32xf32>
    %c0_1 = arith.constant 0 : index
    %c0_2 = arith.constant 0 : index
    %1 = vector.load %arg1[%c0_1, %c0_2] : memref<64x64xf32, #tpu.memory_space<vmem>>, vector<64x64xf32>
    %cst = arith.constant dense<0.000000e+00> : vector<64x32xf32>
    %2 = tpu.matmul %1, %0, %cst {dimension_numbers = #tpu.dot_dimension_numbers<[1], [0], [0], [1], [0, 0, 1, 1], [], []>} : vector<64x64xf32>, vector<64x32xf32>, vector<64x32xf32> -> vector<64x32xf32>
    %c0_3 = arith.constant 0 : index
    %c0_4 = arith.constant 0 : index
    %3 = vector.load %arg5[%c0_3, %c0_4] : memref<32x64xf32, #tpu.memory_space<vmem>>, vector<32x64xf32>
    %cst_5 = arith.constant dense<0.000000e+00> : vector<64x64xf32>
    %4 = tpu.matmul %0, %3, %cst_5 {dimension_numbers = #tpu.dot_dimension_numbers<[1], [0], [0], [1], [0, 0, 1, 1], [], []>} : vector<64x32xf32>, vector<32x64xf32>, vector<64x64xf32> -> vector<64x64xf32>
    %c0_6 = arith.constant 0 : index
    %c0_7 = arith.constant 0 : index
    %5 = vector.load %arg6[%c0_6, %c0_7] : memref<32x64xf32, #tpu.memory_space<vmem>>, vector<32x64xf32>
    %cst_8 = arith.constant dense<0.000000e+00> : vector<64x64xf32>
    %6 = tpu.matmul %2, %5, %cst_8 {dimension_numbers = #tpu.dot_dimension_numbers<[1], [0], [0], [1], [0, 0, 1, 1], [], []>} : vector<64x32xf32>, vector<32x64xf32>, vector<64x64xf32> -> vector<64x64xf32>
    %7 = arith.addf %4, %6 : vector<64x64xf32>
    %c0_9 = arith.constant 0 : index
    %c0_10 = arith.constant 0 : index
    %8 = vector.load %arg7[%c0_9, %c0_10] : memref<1x64xf32, #tpu.memory_space<vmem>>, vector<1x64xf32>
    %9 = vector.broadcast %8 : vector<1x64xf32> to vector<64x64xf32>
    %10 = arith.addf %7, %9 : vector<64x64xf32>
    %cst_11 = arith.constant dense<0.000000e+00> : vector<64xf32>
    %11 = vector.multi_reduction <add>, %10, %cst_11 [0] : vector<64x64xf32> to vector<64xf32>
    %12 = vector.shape_cast %11 : vector<64xf32> to vector<1x64xf32>
    %cst_12 = arith.constant 6.400000e+01 : f32
    %13 = vector.broadcast %cst_12 : f32 to vector<1x64xf32>
    %14 = arith.divf %12, %13 : vector<1x64xf32>
    %15 = vector.broadcast %14 : vector<1x64xf32> to vector<64x64xf32>
    %16 = arith.subf %10, %15 : vector<64x64xf32>
    %17 = arith.mulf %16, %16 : vector<64x64xf32>
    %cst_13 = arith.constant dense<0.000000e+00> : vector<64xf32>
    %18 = vector.multi_reduction <add>, %17, %cst_13 [0] : vector<64x64xf32> to vector<64xf32>
    %19 = vector.shape_cast %18 : vector<64xf32> to vector<1x64xf32>
    %cst_14 = arith.constant 6.400000e+01 : f32
    %20 = vector.broadcast %cst_14 : f32 to vector<1x64xf32>
    %21 = arith.divf %19, %20 : vector<1x64xf32>
    %22 = vector.broadcast %14 : vector<1x64xf32> to vector<64x64xf32>
    %23 = arith.subf %10, %22 : vector<64x64xf32>
    %cst_15 = arith.constant 9.99999974E-6 : f32
    %24 = vector.broadcast %cst_15 : f32 to vector<1x64xf32>
    %25 = arith.addf %21, %24 : vector<1x64xf32>
    %26 = math.rsqrt %25 : vector<1x64xf32>
    %27 = vector.broadcast %26 : vector<1x64xf32> to vector<64x64xf32>
    %28 = arith.mulf %23, %27 : vector<64x64xf32>
    %c0_16 = arith.constant 0 : index
    %c0_17 = arith.constant 0 : index
    %29 = vector.load %arg14[%c0_16, %c0_17] : memref<1x64xf32, #tpu.memory_space<vmem>>, vector<1x64xf32>
    %30 = vector.broadcast %29 : vector<1x64xf32> to vector<64x64xf32>
    %31 = arith.mulf %28, %30 : vector<64x64xf32>
    %c0_18 = arith.constant 0 : index
    %c0_19 = arith.constant 0 : index
    %32 = vector.load %arg15[%c0_18, %c0_19] : memref<1x64xf32, #tpu.memory_space<vmem>>, vector<1x64xf32>
    %33 = vector.broadcast %32 : vector<1x64xf32> to vector<64x64xf32>
    %34 = arith.addf %31, %33 : vector<64x64xf32>
    %cst_20 = arith.constant 0.000000e+00 : f32
    %35 = vector.broadcast %cst_20 : f32 to vector<64x64xf32>
    %36 = arith.maximumf %34, %35 : vector<64x64xf32>
    %c0_21 = arith.constant 0 : index
    %c0_22 = arith.constant 0 : index
    %37 = vector.load %arg2[%c0_21, %c0_22] : memref<64x64xf32, #tpu.memory_space<vmem>>, vector<64x64xf32>
    %cst_23 = arith.constant dense<0.000000e+00> : vector<64x64xf32>
    %38 = tpu.matmul %37, %36, %cst_23 {dimension_numbers = #tpu.dot_dimension_numbers<[1], [0], [0], [1], [0, 0, 1, 1], [], []>} : vector<64x64xf32>, vector<64x64xf32>, vector<64x64xf32> -> vector<64x64xf32>
    %c0_24 = arith.constant 0 : index
    %c0_25 = arith.constant 0 : index
    %39 = vector.load %arg8[%c0_24, %c0_25] : memref<64x64xf32, #tpu.memory_space<vmem>>, vector<64x64xf32>
    %cst_26 = arith.constant dense<0.000000e+00> : vector<64x64xf32>
    %40 = tpu.matmul %36, %39, %cst_26 {dimension_numbers = #tpu.dot_dimension_numbers<[1], [0], [0], [1], [0, 0, 1, 1], [], []>} : vector<64x64xf32>, vector<64x64xf32>, vector<64x64xf32> -> vector<64x64xf32>
    %c0_27 = arith.constant 0 : index
    %c0_28 = arith.constant 0 : index
    %41 = vector.load %arg9[%c0_27, %c0_28] : memref<64x64xf32, #tpu.memory_space<vmem>>, vector<64x64xf32>
    %cst_29 = arith.constant dense<0.000000e+00> : vector<64x64xf32>
    %42 = tpu.matmul %38, %41, %cst_29 {dimension_numbers = #tpu.dot_dimension_numbers<[1], [0], [0], [1], [0, 0, 1, 1], [], []>} : vector<64x64xf32>, vector<64x64xf32>, vector<64x64xf32> -> vector<64x64xf32>
    %43 = arith.addf %40, %42 : vector<64x64xf32>
    %c0_30 = arith.constant 0 : index
    %c0_31 = arith.constant 0 : index
    %44 = vector.load %arg10[%c0_30, %c0_31] : memref<1x64xf32, #tpu.memory_space<vmem>>, vector<1x64xf32>
    %45 = vector.broadcast %44 : vector<1x64xf32> to vector<64x64xf32>
    %46 = arith.addf %43, %45 : vector<64x64xf32>
    %cst_32 = arith.constant dense<0.000000e+00> : vector<64xf32>
    %47 = vector.multi_reduction <add>, %46, %cst_32 [0] : vector<64x64xf32> to vector<64xf32>
    %48 = vector.shape_cast %47 : vector<64xf32> to vector<1x64xf32>
    %cst_33 = arith.constant 6.400000e+01 : f32
    %49 = vector.broadcast %cst_33 : f32 to vector<1x64xf32>
    %50 = arith.divf %48, %49 : vector<1x64xf32>
    %51 = vector.broadcast %50 : vector<1x64xf32> to vector<64x64xf32>
    %52 = arith.subf %46, %51 : vector<64x64xf32>
    %53 = arith.mulf %52, %52 : vector<64x64xf32>
    %cst_34 = arith.constant dense<0.000000e+00> : vector<64xf32>
    %54 = vector.multi_reduction <add>, %53, %cst_34 [0] : vector<64x64xf32> to vector<64xf32>
    %55 = vector.shape_cast %54 : vector<64xf32> to vector<1x64xf32>
    %cst_35 = arith.constant 6.400000e+01 : f32
    %56 = vector.broadcast %cst_35 : f32 to vector<1x64xf32>
    %57 = arith.divf %55, %56 : vector<1x64xf32>
    %58 = vector.broadcast %50 : vector<1x64xf32> to vector<64x64xf32>
    %59 = arith.subf %46, %58 : vector<64x64xf32>
    %cst_36 = arith.constant 9.99999974E-6 : f32
    %60 = vector.broadcast %cst_36 : f32 to vector<1x64xf32>
    %61 = arith.addf %57, %60 : vector<1x64xf32>
    %62 = math.rsqrt %61 : vector<1x64xf32>
    %63 = vector.broadcast %62 : vector<1x64xf32> to vector<64x64xf32>
    %64 = arith.mulf %59, %63 : vector<64x64xf32>
    %c0_37 = arith.constant 0 : index
    %c0_38 = arith.constant 0 : index
    %65 = vector.load %arg16[%c0_37, %c0_38] : memref<1x64xf32, #tpu.memory_space<vmem>>, vector<1x64xf32>
    %66 = vector.broadcast %65 : vector<1x64xf32> to vector<64x64xf32>
    %67 = arith.mulf %64, %66 : vector<64x64xf32>
    %c0_39 = arith.constant 0 : index
    %c0_40 = arith.constant 0 : index
    %68 = vector.load %arg17[%c0_39, %c0_40] : memref<1x64xf32, #tpu.memory_space<vmem>>, vector<1x64xf32>
    %69 = vector.broadcast %68 : vector<1x64xf32> to vector<64x64xf32>
    %70 = arith.addf %67, %69 : vector<64x64xf32>
    %cst_41 = arith.constant 0.000000e+00 : f32
    %71 = vector.broadcast %cst_41 : f32 to vector<64x64xf32>
    %72 = arith.maximumf %70, %71 : vector<64x64xf32>
    %c0_42 = arith.constant 0 : index
    %c0_43 = arith.constant 0 : index
    %73 = vector.load %arg3[%c0_42, %c0_43] : memref<64x64xf32, #tpu.memory_space<vmem>>, vector<64x64xf32>
    %cst_44 = arith.constant dense<0.000000e+00> : vector<64x64xf32>
    %74 = tpu.matmul %73, %72, %cst_44 {dimension_numbers = #tpu.dot_dimension_numbers<[1], [0], [0], [1], [0, 0, 1, 1], [], []>} : vector<64x64xf32>, vector<64x64xf32>, vector<64x64xf32> -> vector<64x64xf32>
    %c0_45 = arith.constant 0 : index
    %c0_46 = arith.constant 0 : index
    %75 = vector.load %arg11[%c0_45, %c0_46] : memref<64x64xf32, #tpu.memory_space<vmem>>, vector<64x64xf32>
    %cst_47 = arith.constant dense<0.000000e+00> : vector<64x64xf32>
    %76 = tpu.matmul %72, %75, %cst_47 {dimension_numbers = #tpu.dot_dimension_numbers<[1], [0], [0], [1], [0, 0, 1, 1], [], []>} : vector<64x64xf32>, vector<64x64xf32>, vector<64x64xf32> -> vector<64x64xf32>
    %c0_48 = arith.constant 0 : index
    %c0_49 = arith.constant 0 : index
    %77 = vector.load %arg12[%c0_48, %c0_49] : memref<64x64xf32, #tpu.memory_space<vmem>>, vector<64x64xf32>
    %cst_50 = arith.constant dense<0.000000e+00> : vector<64x64xf32>
    %78 = tpu.matmul %74, %77, %cst_50 {dimension_numbers = #tpu.dot_dimension_numbers<[1], [0], [0], [1], [0, 0, 1, 1], [], []>} : vector<64x64xf32>, vector<64x64xf32>, vector<64x64xf32> -> vector<64x64xf32>
    %79 = arith.addf %76, %78 : vector<64x64xf32>
    %c0_51 = arith.constant 0 : index
    %c0_52 = arith.constant 0 : index
    %80 = vector.load %arg13[%c0_51, %c0_52] : memref<1x64xf32, #tpu.memory_space<vmem>>, vector<1x64xf32>
    %81 = vector.broadcast %80 : vector<1x64xf32> to vector<64x64xf32>
    %82 = arith.addf %79, %81 : vector<64x64xf32>
    %83 = vector.extract_strided_slice %82 {offsets = [0, 0], sizes = [64, 32], strides = [1, 1]} : vector<64x64xf32> to vector<64x32xf32>
    %84 = vector.extract_strided_slice %82 {offsets = [0, 32], sizes = [64, 32], strides = [1, 1]} : vector<64x64xf32> to vector<64x32xf32>
    %cst_53 = arith.constant dense<0.000000e+00> : vector<32xf32>
    %85 = vector.multi_reduction <add>, %83, %cst_53 [0] : vector<64x32xf32> to vector<32xf32>
    %86 = vector.shape_cast %85 : vector<32xf32> to vector<1x32xf32>
    %cst_54 = arith.constant 6.400000e+01 : f32
    %87 = vector.broadcast %cst_54 : f32 to vector<1x32xf32>
    %88 = arith.divf %86, %87 : vector<1x32xf32>
    %89 = arith.negf %88 : vector<1x32xf32>
    %90 = math.exp %89 : vector<1x32xf32>
    %cst_55 = arith.constant 1.000000e+00 : f32
    %91 = vector.broadcast %cst_55 : f32 to vector<1x32xf32>
    %92 = arith.addf %91, %90 : vector<1x32xf32>
    %93 = arith.divf %91, %92 : vector<1x32xf32>
    %c0_56 = arith.constant 0 : index
    %c0_57 = arith.constant 0 : index
    %94 = vector.load %arg18[%c0_56, %c0_57] : memref<32x32xf32, #tpu.memory_space<vmem>>, vector<32x32xf32>
    %95 = vector.broadcast %93 : vector<1x32xf32> to vector<32x32xf32>
    %96 = arith.mulf %94, %95 : vector<32x32xf32>
    %cst_58 = arith.constant dense<0.000000e+00> : vector<32xf32>
    %97 = vector.multi_reduction <add>, %96, %cst_58 [1] : vector<32x32xf32> to vector<32xf32>
    %98 = vector.shape_cast %97 : vector<32xf32> to vector<32x1xf32>
    %cst_59 = arith.constant dense<0.000000e+00> : vector<64x1xf32>
    %99 = tpu.matmul %83, %98, %cst_59 {dimension_numbers = #tpu.dot_dimension_numbers<[1], [0], [0], [1], [0, 0, 1, 1], [], []>} : vector<64x32xf32>, vector<32x1xf32>, vector<64x1xf32> -> vector<64x1xf32>
    %cst_60 = arith.constant dense<0.000000e+00> : vector<64x1xf32>
    %100 = tpu.matmul %84, %98, %cst_60 {dimension_numbers = #tpu.dot_dimension_numbers<[1], [0], [0], [1], [0, 0, 1, 1], [], []>} : vector<64x32xf32>, vector<32x1xf32>, vector<64x1xf32> -> vector<64x1xf32>
    %cst_61 = arith.constant 0.000000e+00 : f32
    %101 = vector.broadcast %cst_61 : f32 to vector<64x1xf32>
    %102 = arith.subf %101, %99 : vector<64x1xf32>
    %cst_62 = arith.constant 0.000000e+00 : f32
    %103 = vector.broadcast %cst_62 : f32 to vector<64x1xf32>
    %104 = arith.maximumf %102, %103 : vector<64x1xf32>
    %105 = math.absf %102 : vector<64x1xf32>
    %cst_63 = arith.constant 0.000000e+00 : f32
    %106 = vector.broadcast %cst_63 : f32 to vector<64x1xf32>
    %107 = arith.subf %106, %105 : vector<64x1xf32>
    %108 = math.exp %107 : vector<64x1xf32>
    %109 = math.log1p %108 : vector<64x1xf32>
    %110 = arith.addf %104, %109 : vector<64x1xf32>
    %111 = vector.shape_cast %110 : vector<64x1xf32> to vector<1x64x1xf32>
    %cst_64 = arith.constant dense<0.000000e+00> : vector<1xf32>
    %112 = vector.multi_reduction <add>, %111, %cst_64 [1, 2] : vector<1x64x1xf32> to vector<1xf32>
    %113 = vector.shape_cast %112 : vector<1xf32> to vector<1x1x1xf32>
    %114 = vector.extract %113[0, 0, 0] : f32 from vector<1x1x1xf32>
    %115 = vector.broadcast %114 : f32 to vector<1x1xf32>
    %cst_65 = arith.constant 6.400000e+01 : f32
    %116 = vector.broadcast %cst_65 : f32 to vector<1x1xf32>
    %117 = arith.divf %115, %116 : vector<1x1xf32>
    %cst_66 = arith.constant 0.000000e+00 : f32
    %118 = vector.broadcast %cst_66 : f32 to vector<64x1xf32>
    %119 = arith.maximumf %100, %118 : vector<64x1xf32>
    %120 = math.absf %100 : vector<64x1xf32>
    %cst_67 = arith.constant 0.000000e+00 : f32
    %121 = vector.broadcast %cst_67 : f32 to vector<64x1xf32>
    %122 = arith.subf %121, %120 : vector<64x1xf32>
    %123 = math.exp %122 : vector<64x1xf32>
    %124 = math.log1p %123 : vector<64x1xf32>
    %125 = arith.addf %119, %124 : vector<64x1xf32>
    %126 = vector.shape_cast %125 : vector<64x1xf32> to vector<1x64x1xf32>
    %cst_68 = arith.constant dense<0.000000e+00> : vector<1xf32>
    %127 = vector.multi_reduction <add>, %126, %cst_68 [1, 2] : vector<1x64x1xf32> to vector<1xf32>
    %128 = vector.shape_cast %127 : vector<1xf32> to vector<1x1x1xf32>
    %129 = vector.extract %128[0, 0, 0] : f32 from vector<1x1x1xf32>
    %130 = vector.broadcast %129 : f32 to vector<1x1xf32>
    %cst_69 = arith.constant 6.400000e+01 : f32
    %131 = vector.broadcast %cst_69 : f32 to vector<1x1xf32>
    %132 = arith.divf %130, %131 : vector<1x1xf32>
    %133 = arith.addf %117, %132 : vector<1x1xf32>
    %c0_70 = arith.constant 0 : index
    %c0_71 = arith.constant 0 : index
    %134 = vector.load %arg27[%c0_70, %c0_71] : memref<1x1xf32, #tpu.memory_space<vmem>>, vector<1x1xf32>
    tpu.vector_store %arg27[%c0_70, %c0_71], %133 {strides = array<i32>} : memref<1x1xf32, #tpu.memory_space<vmem>>, vector<1x1xf32>,
    %135 = tpu.iota {dimensions = array<i32: 1>} : vector<32x64xi32>
    %c0_72 = arith.constant 0 : index
    %c0_73 = arith.constant 0 : index
    %136 = vector.load %arg25[%c0_72, %c0_73] : memref<32x1xi32, #tpu.memory_space<vmem>>, vector<32x1xi32>
    %137 = vector.broadcast %136 : vector<32x1xi32> to vector<32x64xi32>
    %138 = arith.cmpi eq, %135, %137 : vector<32x64xi32>
    %139 = arith.extui %138 : vector<32x64xi1> to vector<32x64xi32>
    %140 = arith.sitofp %139 : vector<32x64xi32> to vector<32x64xf32>
    %cst_74 = arith.constant dense<0.000000e+00> : vector<32x32xf32>
    %141 = tpu.matmul %140, %83, %cst_74 {dimension_numbers = #tpu.dot_dimension_numbers<[1], [0], [0], [1], [0, 0, 1, 1], [], []>} : vector<32x64xf32>, vector<64x32xf32>, vector<32x32xf32> -> vector<32x32xf32>
    %142 = vector.extract_strided_slice %141 {offsets = [0, 0], sizes = [16, 32], strides = [1, 1]} : vector<32x32xf32> to vector<16x32xf32>
    %143 = vector.extract_strided_slice %141 {offsets = [16, 0], sizes = [16, 32], strides = [1, 1]} : vector<32x32xf32> to vector<16x32xf32>
    %144 = arith.mulf %142, %143 : vector<16x32xf32>
    %c0_75 = arith.constant 0 : index
    %c0_76 = arith.constant 0 : index
    %145 = vector.load %arg19[%c0_75, %c0_76] : memref<32x32xf32, #tpu.memory_space<vmem>>, vector<32x32xf32>
    %cst_77 = arith.constant dense<0.000000e+00> : vector<16x32xf32>
    %146 = tpu.matmul %144, %145, %cst_77 {dimension_numbers = #tpu.dot_dimension_numbers<[1], [0], [0], [1], [0, 0, 1, 1], [], []>} : vector<16x32xf32>, vector<32x32xf32>, vector<16x32xf32> -> vector<16x32xf32>
    %c0_78 = arith.constant 0 : index
    %c0_79 = arith.constant 0 : index
    %147 = vector.load %arg20[%c0_78, %c0_79] : memref<1x32xf32, #tpu.memory_space<vmem>>, vector<1x32xf32>
    %148 = vector.broadcast %147 : vector<1x32xf32> to vector<16x32xf32>
    %149 = arith.addf %146, %148 : vector<16x32xf32>
    %cst_80 = arith.constant 0.000000e+00 : f32
    %150 = vector.broadcast %cst_80 : f32 to vector<16x32xf32>
    %151 = arith.maximumf %149, %150 : vector<16x32xf32>
    %c0_81 = arith.constant 0 : index
    %c0_82 = arith.constant 0 : index
    %152 = vector.load %arg21[%c0_81, %c0_82] : memref<32x32xf32, #tpu.memory_space<vmem>>, vector<32x32xf32>
    %cst_83 = arith.constant dense<0.000000e+00> : vector<16x32xf32>
    %153 = tpu.matmul %151, %152, %cst_83 {dimension_numbers = #tpu.dot_dimension_numbers<[1], [0], [0], [1], [0, 0, 1, 1], [], []>} : vector<16x32xf32>, vector<32x32xf32>, vector<16x32xf32> -> vector<16x32xf32>
    %c0_84 = arith.constant 0 : index
    %c0_85 = arith.constant 0 : index
    %154 = vector.load %arg22[%c0_84, %c0_85] : memref<1x32xf32, #tpu.memory_space<vmem>>, vector<1x32xf32>
    %155 = vector.broadcast %154 : vector<1x32xf32> to vector<16x32xf32>
    %156 = arith.addf %153, %155 : vector<16x32xf32>
    %cst_86 = arith.constant 0.000000e+00 : f32
    %157 = vector.broadcast %cst_86 : f32 to vector<16x32xf32>
    %158 = arith.maximumf %156, %157 : vector<16x32xf32>
    %c0_87 = arith.constant 0 : index
    %c0_88 = arith.constant 0 : index
    %159 = vector.load %arg23[%c0_87, %c0_88] : memref<32x1xf32, #tpu.memory_space<vmem>>, vector<32x1xf32>
    %cst_89 = arith.constant dense<0.000000e+00> : vector<16x1xf32>
    %160 = tpu.matmul %158, %159, %cst_89 {dimension_numbers = #tpu.dot_dimension_numbers<[1], [0], [0], [1], [0, 0, 1, 1], [], []>} : vector<16x32xf32>, vector<32x1xf32>, vector<16x1xf32> -> vector<16x1xf32>
    %c0_90 = arith.constant 0 : index
    %c0_91 = arith.constant 0 : index
    %161 = vector.load %arg24[%c0_90, %c0_91] : memref<1x1xf32, #tpu.memory_space<vmem>>, vector<1x1xf32>
    %162 = vector.broadcast %161 : vector<1x1xf32> to vector<16x1xf32>
    %163 = arith.addf %160, %162 : vector<16x1xf32>
    %c0_92 = arith.constant 0 : index
    %c0_93 = arith.constant 0 : index
    %164 = vector.load %arg26[%c0_92, %c0_93] : memref<16x1xf32, #tpu.memory_space<vmem>>, vector<16x1xf32>
    tpu.vector_store %arg26[%c0_92, %c0_93], %163 {strides = array<i32>} : memref<16x1xf32, #tpu.memory_space<vmem>>, vector<16x1xf32>,
    return
  }
  func.func @transform_0(%arg0: i32) -> (i32, i32) {
    %c0_i32 = arith.constant 0 : i32
    %c0_i32_0 = arith.constant 0 : i32
    %c0_i32_1 = arith.constant 0 : i32
    return %c0_i32, %c0_i32_0 : i32, i32
  }
  func.func @transform_1(%arg0: i32) -> (i32, i32) {
    %c0_i32 = arith.constant 0 : i32
    %c0_i32_0 = arith.constant 0 : i32
    %c0_i32_1 = arith.constant 0 : i32
    return %c0_i32, %c0_i32_0 : i32, i32
  }
  func.func @transform_2(%arg0: i32) -> (i32, i32) {
    %c0_i32 = arith.constant 0 : i32
    %c0_i32_0 = arith.constant 0 : i32
    %c0_i32_1 = arith.constant 0 : i32
    return %c0_i32, %c0_i32_0 : i32, i32
  }
  func.func @transform_3(%arg0: i32) -> (i32, i32) {
    %c0_i32 = arith.constant 0 : i32
    %c0_i32_0 = arith.constant 0 : i32
    %c0_i32_1 = arith.constant 0 : i32
    return %c0_i32, %c0_i32_0 : i32, i32
  }
  func.func @transform_4(%arg0: i32) -> (i32, i32) {
    %c0_i32 = arith.constant 0 : i32
    %c0_i32_0 = arith.constant 0 : i32
    %c0_i32_1 = arith.constant 0 : i32
    return %c0_i32, %c0_i32_0 : i32, i32
  }
  func.func @transform_5(%arg0: i32) -> (i32, i32) {
    %c0_i32 = arith.constant 0 : i32
    %c0_i32_0 = arith.constant 0 : i32
    %c0_i32_1 = arith.constant 0 : i32
    return %c0_i32, %c0_i32_0 : i32, i32
  }
  func.func @transform_6(%arg0: i32) -> (i32, i32) {
    %c0_i32 = arith.constant 0 : i32
    %c0_i32_0 = arith.constant 0 : i32
    %c0_i32_1 = arith.constant 0 : i32
    return %c0_i32, %c0_i32_0 : i32, i32
  }
  func.func @transform_7(%arg0: i32) -> (i32, i32) {
    %c0_i32 = arith.constant 0 : i32
    %c0_i32_0 = arith.constant 0 : i32
    %c0_i32_1 = arith.constant 0 : i32
    return %c0_i32, %c0_i32_0 : i32, i32
  }
  func.func @transform_8(%arg0: i32) -> (i32, i32) {
    %c0_i32 = arith.constant 0 : i32
    %c0_i32_0 = arith.constant 0 : i32
    %c0_i32_1 = arith.constant 0 : i32
    return %c0_i32, %c0_i32_0 : i32, i32
  }
  func.func @transform_9(%arg0: i32) -> (i32, i32) {
    %c0_i32 = arith.constant 0 : i32
    %c0_i32_0 = arith.constant 0 : i32
    %c0_i32_1 = arith.constant 0 : i32
    return %c0_i32, %c0_i32_0 : i32, i32
  }
  func.func @transform_10(%arg0: i32) -> (i32, i32) {
    %c0_i32 = arith.constant 0 : i32
    %c0_i32_0 = arith.constant 0 : i32
    %c0_i32_1 = arith.constant 0 : i32
    return %c0_i32, %c0_i32_0 : i32, i32
  }
  func.func @transform_11(%arg0: i32) -> (i32, i32) {
    %c0_i32 = arith.constant 0 : i32
    %c0_i32_0 = arith.constant 0 : i32
    %c0_i32_1 = arith.constant 0 : i32
    return %c0_i32, %c0_i32_0 : i32, i32
  }
  func.func @transform_12(%arg0: i32) -> (i32, i32) {
    %c0_i32 = arith.constant 0 : i32
    %c0_i32_0 = arith.constant 0 : i32
    %c0_i32_1 = arith.constant 0 : i32
    return %c0_i32, %c0_i32_0 : i32, i32
  }
  func.func @transform_13(%arg0: i32) -> (i32, i32) {
    %c0_i32 = arith.constant 0 : i32
    %c0_i32_0 = arith.constant 0 : i32
    %c0_i32_1 = arith.constant 0 : i32
    return %c0_i32, %c0_i32_0 : i32, i32
  }
  func.func @transform_14(%arg0: i32) -> (i32, i32) {
    %c0_i32 = arith.constant 0 : i32
    %c0_i32_0 = arith.constant 0 : i32
    %c0_i32_1 = arith.constant 0 : i32
    return %c0_i32, %c0_i32_0 : i32, i32
  }
  func.func @transform_15(%arg0: i32) -> (i32, i32) {
    %c0_i32 = arith.constant 0 : i32
    %c0_i32_0 = arith.constant 0 : i32
    %c0_i32_1 = arith.constant 0 : i32
    return %c0_i32, %c0_i32_0 : i32, i32
  }
  func.func @transform_16(%arg0: i32) -> (i32, i32) {
    %c0_i32 = arith.constant 0 : i32
    %c0_i32_0 = arith.constant 0 : i32
    %c0_i32_1 = arith.constant 0 : i32
    return %c0_i32, %c0_i32_0 : i32, i32
  }
  func.func @transform_17(%arg0: i32) -> (i32, i32) {
    %c0_i32 = arith.constant 0 : i32
    %c0_i32_0 = arith.constant 0 : i32
    %c0_i32_1 = arith.constant 0 : i32
    return %c0_i32, %c0_i32_0 : i32, i32
  }
  func.func @transform_18(%arg0: i32) -> (i32, i32) {
    %c0_i32 = arith.constant 0 : i32
    %c0_i32_0 = arith.constant 0 : i32
    %c0_i32_1 = arith.constant 0 : i32
    return %c0_i32, %c0_i32_0 : i32, i32
  }
  func.func @transform_19(%arg0: i32) -> (i32, i32) {
    %c0_i32 = arith.constant 0 : i32
    %c0_i32_0 = arith.constant 0 : i32
    %c0_i32_1 = arith.constant 0 : i32
    return %c0_i32, %c0_i32_0 : i32, i32
  }
  func.func @transform_20(%arg0: i32) -> (i32, i32) {
    %c0_i32 = arith.constant 0 : i32
    %c0_i32_0 = arith.constant 0 : i32
    %c0_i32_1 = arith.constant 0 : i32
    return %c0_i32, %c0_i32_0 : i32, i32
  }
  func.func @transform_21(%arg0: i32) -> (i32, i32) {
    %c0_i32 = arith.constant 0 : i32
    %c0_i32_0 = arith.constant 0 : i32
    %c0_i32_1 = arith.constant 0 : i32
    return %c0_i32, %c0_i32_0 : i32, i32
  }
  func.func @transform_22(%arg0: i32) -> (i32, i32) {
    %c0_i32 = arith.constant 0 : i32
    %c0_i32_0 = arith.constant 0 : i32
    %c0_i32_1 = arith.constant 0 : i32
    return %c0_i32, %c0_i32_0 : i32, i32
  }
  func.func @transform_23(%arg0: i32) -> (i32, i32) {
    %c0_i32 = arith.constant 0 : i32
    %c0_i32_0 = arith.constant 0 : i32
    %c0_i32_1 = arith.constant 0 : i32
    return %c0_i32, %c0_i32_0 : i32, i32
  }
  func.func @transform_24(%arg0: i32) -> (i32, i32) {
    %c0_i32 = arith.constant 0 : i32
    %c0_i32_0 = arith.constant 0 : i32
    %c0_i32_1 = arith.constant 0 : i32
    return %c0_i32, %c0_i32_0 : i32, i32
  }
  func.func @transform_25(%arg0: i32) -> (i32, i32) {
    %c0_i32 = arith.constant 0 : i32
    %c0_i32_0 = arith.constant 0 : i32
    %c0_i32_1 = arith.constant 0 : i32
    return %c0_i32, %c0_i32_0 : i32, i32
  }
  func.func @transform_26(%arg0: i32) -> (i32, i32) {
    %c0_i32 = arith.constant 0 : i32
    %c0_i32_0 = arith.constant 0 : i32
    %c0_i32_1 = arith.constant 0 : i32
    return %c0_i32, %c0_i32_0 : i32, i32
  }
}

</mosaic_0001>

<bundles_post_ra>
// kernel: tpu_custom_call.1
= control target key start
LH: loop header
LB: loop body
LE: loop exit
PB: predicated region body
PF: predicated region fallthrough
CT: control target
= control target key end

     0   :  { %s5620_s0 = inlined_call_operand.hbm [shape: f32[64,64], index: 0, kind: input, shape index: {}]   ;;  %s5621_s1 = inlined_call_operand.hbm [shape: f32[64,64], index: 1, kind: input, shape index: {}]   ;;  %s5622_s2 = inlined_call_operand.hbm [shape: f32[64,64], index: 2, kind: input, shape index: {}]   ;;  %s5623_s3 = inlined_call_operand.hbm [shape: f32[64,32], index: 3, kind: input, shape index: {}]   ;;  %s5624_s4 = inlined_call_operand.hbm [shape: f32[32,64], index: 4, kind: input, shape index: {}]   ;;  %s5625_s5 = inlined_call_operand.hbm [shape: f32[32,64], index: 5, kind: input, shape index: {}]   ;;  %s5626_s6 = inlined_call_operand.hbm [shape: f32[1,64], index: 6, kind: input, shape index: {}]   ;;  %s5627_s7 = inlined_call_operand.hbm [shape: f32[64,64], index: 7, kind: input, shape index: {}]   ;;  %s5628_s8 = inlined_call_operand.hbm [shape: f32[64,64], index: 8, kind: input, shape index: {}]   ;;  %s5629_s9 = inlined_call_operand.hbm [shape: f32[1,64], index: 9, kind: input, shape index: {}]   ;;  %s5630_s10 = inlined_call_operand.hbm [shape: f32[64,64], index: 10, kind: input, shape index: {}]   ;;  %s5631_s11 = inlined_call_operand.hbm [shape: f32[64,64], index: 11, kind: input, shape index: {}]   ;;  %s5632_s12 = inlined_call_operand.hbm [shape: f32[1,64], index: 12, kind: input, shape index: {}]   ;;  %s5633_s13 = inlined_call_operand.hbm [shape: f32[1,64], index: 13, kind: input, shape index: {}]   ;;  %s5634_s14 = inlined_call_operand.hbm [shape: f32[1,64], index: 14, kind: input, shape index: {}]   ;;  %s5635_s15 = inlined_call_operand.hbm [shape: f32[1,64], index: 15, kind: input, shape index: {}]   ;;  %s5636_s16 = inlined_call_operand.hbm [shape: f32[1,64], index: 16, kind: input, shape index: {}]   ;;  %s5637_s17 = inlined_call_operand.hbm [shape: f32[32,32], index: 17, kind: input, shape index: {}]   ;;  %s5638_s18 = inlined_call_operand.hbm [shape: f32[32,32], index: 18, kind: input, shape index: {}]   ;;  %s5639_s19 = inlined_call_operand.hbm [shape: f32[1,32], index: 19, kind: input, shape index: {}]   ;;  %s5640_s20 = inlined_call_operand.hbm [shape: f32[32,32], index: 20, kind: input, shape index: {}]   ;;  %s5641_s21 = inlined_call_operand.hbm [shape: f32[1,32], index: 21, kind: input, shape index: {}]   ;;  %s5642_s22 = inlined_call_operand.hbm [shape: f32[32,1], index: 22, kind: input, shape index: {}]   ;;  %s5643_s23 = inlined_call_operand.<no memory space> [shape: f32[1,1], index: 23, kind: input, shape index: {}]   ;;  %s5644_s24 = inlined_call_operand.hbm [shape: s32[32,1], index: 24, kind: input, shape index: {}]   ;;  %s5645_s25 = inlined_call_operand.hbm [shape: f32[16,1], index: 25, kind: output, shape index: {0}]   ;;  %s5646_s26 = inlined_call_operand.hbm [shape: f32[1,1], index: 26, kind: output, shape index: {1}]  }
   0x1   :  { %5660 = sst [smem:[#allocation59_spill]] %s5620_s0  ;;  %v32_v0 = vstv %s5643_s23 }
   0x2   :  { %5661 = sst [smem:[#allocation60_spill]] %s5621_s1  ;;  %33 = vst [vmem:[#allocation2] sm:$0x1] %v32_v0 }
   0x3   :  { %5662 = sst [smem:[#allocation61_spill]] %s5622_s2 }
   0x4   :  { %5663 = sst [smem:[#allocation62_spill]] %s5623_s3 }
   0x5   :  { %5664 = sst [smem:[#allocation63_spill]] %s5624_s4 }
   0x6   :  { %5665 = sst [smem:[#allocation64_spill]] %s5625_s5 }
   0x7   :  { %5666 = sst [smem:[#allocation65_spill]] %s5626_s6 }
   0x8   :  { %5667 = sst [smem:[#allocation66_spill]] %s5627_s7 }
   0x9   :  { %5668 = sst [smem:[#allocation67_spill]] %s5628_s8 }
   0xa   :  { %5669 = sst [smem:[#allocation68_spill]] %s5629_s9 }
   0xb   :  { %5670 = sst [smem:[#allocation69_spill]] %s5630_s10 }
   0xc   :  { %5671 = sst [smem:[#allocation70_spill]] %s5645_s25 }
   0xd   :  { %5672 = sst [smem:[#allocation71_spill]] %s5646_s26 }
   0xe   :  { %34 = vsyncpa [#allocation4], 0 }
   0xf   :  { %35 = vsyncpa [#allocation7], 0 }
  0x10   :  { %36 = vsyncpa [#allocation10], 0 }
  0x11   :  { %37 = vsyncpa [#allocation13], 0 }
  0x12   :  { %38 = vsyncpa [#allocation16], 0 }
  0x13   :  { %39 = vsyncpa [#allocation19], 0 }
  0x14   :  { %40 = vsyncpa [#allocation22], 0 }
  0x15   :  { %41 = vsyncpa [#allocation25], 0 }
  0x16   :  { %42 = vsyncpa [#allocation28], 0 }
  0x17   :  { %43 = vsyncpa [#allocation31], 0 }
  0x18   :  { %44 = vsyncpa [#allocation34], 0 }
  0x19   :  { %45 = vsyncpa [#allocation37], 0 }
  0x1a   :  { %46 = vsyncpa [#allocation40], 0 }
  0x1b   :  { %47 = vsyncpa [#allocation5], 0 }
  0x1c   :  { %48 = vsyncpa [#allocation43], 0  ;;  %s4515_s7 = smov [#allocation6]   ;;  %s4516_s8 = smov [#allocation9]  }
  0x1d   :  { %s66_s28 = sshll.u32 %s4515_s7, 4  ;;  %s90_s23 = sshll.u32 %s4516_s8, 4  ;;  %s67_s28 = int_to_ptr.vmem [resolvable:$true] %s66_s28  ;;  %s4684_s23 = int_to_ptr.vmem [resolvable:$true] %s90_s23 }
  0x1e   :  { %s5673_s0 = sld [smem:[#allocation60_spill]] }
  0x24   :  { %s3913_s9 = scalar_lea.hbm %s5673_s0, 1024 }
  0x25   :  { %p3914_p0 = scmp.ne.s32.totalorder %s5673_s0, %s3913_s9  ;;  %p3917_p1 = scmp.lt.u32.totalorder %s3913_s9, %s5673_s0 }
  0x27   :  { %p3919_p2 = pnand %p3917_p1, %p3914_p0 }
  0x29   :  { %3922 = shalt.err (!%p3919_p2)
}
  0x2a   :  { %s3923_s6 = scalar_lea.vmem %s67_s28, 1024  ;;  %p3928_p4 = scmp.lt.s32.totalorder %s67_s28, %s67_s28 }
  0x2b   :  { %p3924_p3 = scmp.ne.s32.totalorder %s67_s28, %s3923_s6  ;;  %p3929_p5 = scmp.lt.s32.totalorder %s3923_s6, %s3923_s6 }
  0x2d   :  { %p3930_p6 = por %p3929_p5, %p3928_p4 }
  0x2f   :  { %p3931_p7 = pnand %p3930_p6, %p3924_p3 }
  0x31   :  { %3934 = shalt.err (!%p3931_p7)
}
  0x32   :  { %s4517_s1 = smov 128   ;;  %s4518_s27 = smov 8  }
  0x33   :  { %72 = dma.hbm_to_vmem [thread:$0]  %s5673_s0, 1024, %s67_s28, [#allocation7], %s4517_s1, %s4517_s1, %s4518_s27  }
  0x34   :  { %s5674_s29 = sld [smem:[#allocation62_spill]] }
  0x3a   :  { %s3935_s9 = scalar_lea.hbm %s5674_s29, 1024 }
  0x3b   :  { %p3936_p8 = scmp.ne.s32.totalorder %s5674_s29, %s3935_s9  ;;  %p3939_p9 = scmp.lt.u32.totalorder %s3935_s9, %s5674_s29 }
  0x3d   :  { %p3941_p10 = pnand %p3939_p9, %p3936_p8 }
  0x3f   :  { %3944 = shalt.err (!%p3941_p10)
}
  0x40   :  { %s3945_s6 = scalar_lea.vmem %s4684_s23, 1024  ;;  %p3950_p12 = scmp.lt.s32.totalorder %s4684_s23, %s4684_s23 }
  0x41   :  { %p3946_p11 = scmp.ne.s32.totalorder %s4684_s23, %s3945_s6  ;;  %p3951_p13 = scmp.lt.s32.totalorder %s3945_s6, %s3945_s6 }
  0x43   :  { %p3952_p0 = por %p3951_p13, %p3950_p12 }
  0x45   :  { %p3953_p1 = pnand %p3952_p0, %p3946_p11 }
  0x47   :  { %3956 = shalt.err (!%p3953_p1)
}
  0x48   :  { %96 = dma.hbm_to_vmem [thread:$0]  %s5674_s29, 1024, %s4684_s23, [#allocation10], %s4517_s1, %s4517_s1, %s4518_s27  }
  0x49   :  { %s4519_s3 = smov [#allocation12]   ;;  %s4520_s8 = smov [#allocation15]  }
  0x4a   :  { %s114_s7 = sshll.u32 %s4519_s3, 4  ;;  %s136_s4 = sshll.u32 %s4520_s8, 4  ;;  %s115_s7 = int_to_ptr.vmem [resolvable:$true] %s114_s7  ;;  %s4721_s4 = int_to_ptr.vmem [resolvable:$true] %s136_s4 }
  0x4b   :  { %s5675_s2 = sld [smem:[#allocation64_spill]] }
  0x51   :  { %s3957_s5 = scalar_lea.hbm %s5675_s2, 512 }
  0x52   :  { %p3958_p2 = scmp.ne.s32.totalorder %s5675_s2, %s3957_s5  ;;  %p3961_p3 = scmp.lt.u32.totalorder %s3957_s5, %s5675_s2 }
  0x54   :  { %p3963_p4 = pnand %p3961_p3, %p3958_p2 }
  0x56   :  { %3966 = shalt.err (!%p3963_p4)
}
  0x57   :  { %s3967_s23 = scalar_lea.vmem %s115_s7, 512  ;;  %p3972_p6 = scmp.lt.s32.totalorder %s115_s7, %s115_s7 }
  0x58   :  { %p3968_p5 = scmp.ne.s32.totalorder %s115_s7, %s3967_s23  ;;  %p3973_p7 = scmp.lt.s32.totalorder %s3967_s23, %s3967_s23 }
  0x5a   :  { %p3974_p8 = por %p3973_p7, %p3972_p6 }
  0x5c   :  { %p3975_p9 = pnand %p3974_p8, %p3968_p5 }
  0x5e   :  { %3978 = shalt.err (!%p3975_p9)
}
  0x5f   :  { %120 = dma.hbm_to_vmem [thread:$0]  %s5675_s2, 512, %s115_s7, [#allocation13], %s4517_s1, %s4517_s1, %s4518_s27  }
  0x60   :  { %s5676_s25 = sld [smem:[#allocation66_spill]] }
  0x66   :  { %s3979_s26 = scalar_lea.hbm %s5676_s25, 1024 }
  0x67   :  { %p3980_p10 = scmp.ne.s32.totalorder %s5676_s25, %s3979_s26  ;;  %p3983_p11 = scmp.lt.u32.totalorder %s3979_s26, %s5676_s25 }
  0x69   :  { %p3985_p12 = pnand %p3983_p11, %p3980_p10 }
  0x6b   :  { %3988 = shalt.err (!%p3985_p12)
}
  0x6c   :  { %s3989_s10 = scalar_lea.vmem %s4721_s4, 1024  ;;  %p3994_p0 = scmp.lt.s32.totalorder %s4721_s4, %s4721_s4 }
  0x6d   :  { %p3990_p13 = scmp.ne.s32.totalorder %s4721_s4, %s3989_s10  ;;  %p3995_p1 = scmp.lt.s32.totalorder %s3989_s10, %s3989_s10 }
  0x6f   :  { %p3996_p2 = por %p3995_p1, %p3994_p0 }
  0x71   :  { %p3997_p3 = pnand %p3996_p2, %p3990_p13 }
  0x73   :  { %4000 = shalt.err (!%p3997_p3)
}
  0x74   :  { %142 = dma.hbm_to_vmem [thread:$0]  %s5676_s25, 1024, %s4721_s4, [#allocation16], %s4517_s1, %s4517_s1, %s4518_s27  }
  0x75   :  { %s4521_s6 = smov [#allocation18]   ;;  %s4522_s29 = smov [#allocation21]  }
  0x76   :  { %s161_s23 = sshll.u32 %s4521_s6, 4  ;;  %s182_s28 = sshll.u32 %s4522_s29, 4  ;;  %s162_s23 = int_to_ptr.vmem [resolvable:$true] %s161_s23  ;;  %s4758_s28 = int_to_ptr.vmem [resolvable:$true] %s182_s28 }
  0x77   :  { %s5677_s26 = sld [smem:[#allocation68_spill]] }
  0x7d   :  { %s4001_s8 = scalar_lea.hbm %s5677_s26, 16 }
  0x7e   :  { %p4002_p4 = scmp.ne.s32.totalorder %s5677_s26, %s4001_s8  ;;  %p4005_p5 = scmp.lt.u32.totalorder %s4001_s8, %s5677_s26 }
  0x80   :  { %p4007_p6 = pnand %p4005_p5, %p4002_p4 }
  0x82   :  { %4010 = shalt.err (!%p4007_p6)
}
  0x83   :  { %s4011_s4 = scalar_lea.vmem %s162_s23, 16  ;;  %s4015_s25 = scalar_lea.vmem %s162_s23, 32 }
  0x84   :  { %p4012_p7 = scmp.ne.s32.totalorder %s162_s23, %s4011_s4  ;;  %p4016_p8 = scmp.lt.s32.totalorder %s162_s23, %s162_s23 }
  0x85   :  { %p4017_p9 = scmp.lt.s32.totalorder %s4015_s25, %s4011_s4 }
  0x87   :  { %p4018_p10 = por %p4017_p9, %p4016_p8 }
  0x89   :  { %p4019_p11 = pnand %p4018_p10, %p4012_p7 }
  0x8b   :  { %4022 = shalt.err (!%p4019_p11)
}
  0x8c   :  { %164 = dma.hbm_to_vmem [thread:$0]  %s5677_s26, 16, %s162_s23, [#allocation19]  }
  0x8d   :  { %s4023_s0 = scalar_lea.hbm %s5631_s11, 1024 }
  0x8e   :  { %p4024_p12 = scmp.ne.s32.totalorder %s5631_s11, %s4023_s0  ;;  %p4027_p13 = scmp.lt.u32.totalorder %s4023_s0, %s5631_s11 }
  0x90   :  { %p4029_p0 = pnand %p4027_p13, %p4024_p12 }
  0x92   :  { %4032 = shalt.err (!%p4029_p0)
}
  0x93   :  { %s4033_s5 = scalar_lea.vmem %s4758_s28, 1024  ;;  %p4038_p2 = scmp.lt.s32.totalorder %s4758_s28, %s4758_s28 }
  0x94   :  { %p4034_p1 = scmp.ne.s32.totalorder %s4758_s28, %s4033_s5  ;;  %p4039_p3 = scmp.lt.s32.totalorder %s4033_s5, %s4033_s5 }
  0x96   :  { %p4040_p4 = por %p4039_p3, %p4038_p2 }
  0x98   :  { %p4041_p5 = pnand %p4040_p4, %p4034_p1 }
  0x9a   :  { %4044 = shalt.err (!%p4041_p5)
}
  0x9b   :  { %188 = dma.hbm_to_vmem [thread:$0]  %s5631_s11, 1024, %s4758_s28, [#allocation22], %s4517_s1, %s4517_s1, %s4518_s27  }
  0x9c   :  { %s4523_s10 = smov [#allocation24]   ;;  %s4524_s25 = smov [#allocation27]  }
  0x9d   :  { %s205_s4 = sshll.u32 %s4523_s10, 4  ;;  %s225_s7 = sshll.u32 %s4524_s25, 4  ;;  %s206_s4 = int_to_ptr.vmem [resolvable:$true] %s205_s4  ;;  %s226_s7 = int_to_ptr.vmem [resolvable:$true] %s225_s7 }
  0x9e   :  { %s4045_s29 = scalar_lea.hbm %s5633_s13, 16 }
  0x9f   :  { %p4046_p6 = scmp.ne.s32.totalorder %s5633_s13, %s4045_s29  ;;  %p4049_p7 = scmp.lt.u32.totalorder %s4045_s29, %s5633_s13 }
  0xa1   :  { %p4051_p8 = pnand %p4049_p7, %p4046_p6 }
  0xa3   :  { %4054 = shalt.err (!%p4051_p8)
}
  0xa4   :  { %s4055_s11 = scalar_lea.vmem %s206_s4, 16  ;;  %s4059_s28 = scalar_lea.vmem %s206_s4, 32 }
  0xa5   :  { %p4056_p9 = scmp.ne.s32.totalorder %s206_s4, %s4055_s11  ;;  %p4060_p10 = scmp.lt.s32.totalorder %s206_s4, %s206_s4 }
  0xa6   :  { %p4061_p11 = scmp.lt.s32.totalorder %s4059_s28, %s4055_s11 }
  0xa8   :  { %p4062_p12 = por %p4061_p11, %p4060_p10 }
  0xaa   :  { %p4063_p13 = pnand %p4062_p12, %p4056_p9 }
  0xac   :  { %4066 = shalt.err (!%p4063_p13)
}
  0xad   :  { %208 = dma.hbm_to_vmem [thread:$0]  %s5633_s13, 16, %s206_s4, [#allocation25]  }
  0xae   :  { %s4067_s10 = scalar_lea.hbm %s5635_s15, 16 }
  0xaf   :  { %p4068_p0 = scmp.ne.s32.totalorder %s5635_s15, %s4067_s10  ;;  %p4071_p1 = scmp.lt.u32.totalorder %s4067_s10, %s5635_s15 }
  0xb1   :  { %p4073_p2 = pnand %p4071_p1, %p4068_p0 }
  0xb3   :  { %4076 = shalt.err (!%p4073_p2)
}
  0xb4   :  { %s4077_s0 = scalar_lea.vmem %s226_s7, 16  ;;  %s4081_s3 = scalar_lea.vmem %s226_s7, 32 }
  0xb5   :  { %p4078_p3 = scmp.ne.s32.totalorder %s226_s7, %s4077_s0  ;;  %p4082_p4 = scmp.lt.s32.totalorder %s226_s7, %s226_s7 }
  0xb6   :  { %p4083_p5 = scmp.lt.s32.totalorder %s4081_s3, %s4077_s0 }
  0xb8   :  { %p4084_p6 = por %p4083_p5, %p4082_p4 }
  0xba   :  { %p4085_p7 = pnand %p4084_p6, %p4078_p3 }
  0xbc   :  { %4088 = shalt.err (!%p4085_p7)
}
  0xbd   :  { %228 = dma.hbm_to_vmem [thread:$0]  %s5635_s15, 16, %s226_s7, [#allocation28]  }
  0xbe   :  { %s4525_s8 = smov [#allocation30]   ;;  %s4526_s11 = smov [#allocation33]  }
  0xbf   :  { %s244_s9 = sshll.u32 %s4525_s8, 4  ;;  %s269_s28 = sshll.u32 %s4526_s11, 4  ;;  %s245_s9 = int_to_ptr.vmem [resolvable:$true] %s244_s9  ;;  %s270_s28 = int_to_ptr.vmem [resolvable:$true] %s269_s28 }
  0xc0   :  { %s4089_s23 = scalar_lea.hbm %s5637_s17, 512 }
  0xc1   :  { %p4090_p8 = scmp.ne.s32.totalorder %s5637_s17, %s4089_s23  ;;  %p4093_p9 = scmp.lt.u32.totalorder %s4089_s23, %s5637_s17 }
  0xc3   :  { %p4095_p10 = pnand %p4093_p9, %p4090_p8 }
  0xc5   :  { %4098 = shalt.err (!%p4095_p10)
}
  0xc6   :  { %s4099_s15 = scalar_lea.vmem %s245_s9, 512  ;;  %p4104_p12 = scmp.lt.s32.totalorder %s245_s9, %s245_s9 }
  0xc7   :  { %p4100_p11 = scmp.ne.s32.totalorder %s245_s9, %s4099_s15  ;;  %p4105_p13 = scmp.lt.s32.totalorder %s4099_s15, %s4099_s15 }
  0xc9   :  { %p4106_p0 = por %p4105_p13, %p4104_p12 }
  0xcb   :  { %p4107_p1 = pnand %p4106_p0, %p4100_p11 }
  0xcd   :  { %4110 = shalt.err (!%p4107_p1)
}
  0xce   :  { %250 = dma.hbm_to_vmem [thread:$0]  %s5637_s17, 512, %s245_s9, [#allocation31], %s4517_s1, %s4517_s1, %s4518_s27  }
  0xcf   :  { %s4111_s3 = scalar_lea.hbm %s5639_s19, 16 }
  0xd0   :  { %p4112_p2 = scmp.ne.s32.totalorder %s5639_s19, %s4111_s3  ;;  %p4115_p3 = scmp.lt.u32.totalorder %s4111_s3, %s5639_s19 }
  0xd2   :  { %p4117_p4 = pnand %p4115_p3, %p4112_p2 }
  0xd4   :  { %4120 = shalt.err (!%p4117_p4)
}
  0xd5   :  { %s4121_s30 = scalar_lea.vmem %s270_s28, 16  ;;  %s4125_s5 = scalar_lea.vmem %s270_s28, 32 }
  0xd6   :  { %p4122_p5 = scmp.ne.s32.totalorder %s270_s28, %s4121_s30  ;;  %p4126_p6 = scmp.lt.s32.totalorder %s270_s28, %s270_s28 }
  0xd7   :  { %p4127_p7 = scmp.lt.s32.totalorder %s4125_s5, %s4121_s30 }
  0xd9   :  { %p4128_p8 = por %p4127_p7, %p4126_p6 }
  0xdb   :  { %p4129_p9 = pnand %p4128_p8, %p4122_p5 }
  0xdd   :  { %4132 = shalt.err (!%p4129_p9)
}
  0xde   :  { %272 = dma.hbm_to_vmem [thread:$0]  %s5639_s19, 16, %s270_s28, [#allocation34]  }
  0xdf   :  { %s4527_s23 = smov [#allocation36]   ;;  %s4528_s10 = smov [#allocation3]  }
  0xe0   :  { %s291_s26 = sshll.u32 %s4527_s23, 4  ;;  %s54_s25 = sshll.u32 %s4528_s10, 4  ;;  %s292_s26 = int_to_ptr.vmem [resolvable:$true] %s291_s26  ;;  %s4843_s25 = int_to_ptr.vmem [resolvable:$true] %s54_s25 }
  0xe1   :  { %s4133_s7 = scalar_lea.hbm %s5641_s21, 16 }
  0xe2   :  { %p4134_p10 = scmp.ne.s32.totalorder %s5641_s21, %s4133_s7  ;;  %p4137_p11 = scmp.lt.u32.totalorder %s4133_s7, %s5641_s21 }
  0xe4   :  { %p4139_p12 = pnand %p4137_p11, %p4134_p10 }
  0xe6   :  { %4142 = shalt.err (!%p4139_p12)
}
  0xe7   :  { %s4143_s19 = scalar_lea.vmem %s292_s26, 16  ;;  %s4147_s28 = scalar_lea.vmem %s292_s26, 32 }
  0xe8   :  { %p4144_p13 = scmp.ne.s32.totalorder %s292_s26, %s4143_s19  ;;  %p4148_p0 = scmp.lt.s32.totalorder %s292_s26, %s292_s26 }
  0xe9   :  { %p4149_p1 = scmp.lt.s32.totalorder %s4147_s28, %s4143_s19 }
  0xeb   :  { %p4150_p2 = por %p4149_p1, %p4148_p0 }
  0xed   :  { %p4151_p3 = pnand %p4150_p2, %p4144_p13 }
  0xef   :  { %4154 = shalt.err (!%p4151_p3)
}
  0xf0   :  { %294 = dma.hbm_to_vmem [thread:$0]  %s5641_s21, 16, %s292_s26, [#allocation37]  }
  0xf1   :  { %s5678_s30 = sld [smem:[#allocation59_spill]] }
  0xf7   :  { %s4155_s5 = scalar_lea.hbm %s5678_s30, 1024 }
  0xf8   :  { %p4156_p4 = scmp.ne.s32.totalorder %s5678_s30, %s4155_s5  ;;  %p4159_p5 = scmp.lt.u32.totalorder %s4155_s5, %s5678_s30 }
  0xfa   :  { %p4161_p6 = pnand %p4159_p5, %p4156_p4 }
  0xfc   :  { %4164 = shalt.err (!%p4161_p6)
}
  0xfd   :  { %s4165_s2 = scalar_lea.vmem %s4843_s25, 1024  ;;  %p4170_p8 = scmp.lt.s32.totalorder %s4843_s25, %s4843_s25 }
  0xfe   :  { %p4166_p7 = scmp.ne.s32.totalorder %s4843_s25, %s4165_s2  ;;  %p4171_p9 = scmp.lt.s32.totalorder %s4165_s2, %s4165_s2 }
 0x100   :  { %p4172_p10 = por %p4171_p9, %p4170_p8 }
 0x102   :  { %p4173_p11 = pnand %p4172_p10, %p4166_p7 }
 0x104   :  { %4176 = shalt.err (!%p4173_p11)
}
 0x105   :  { %60 = dma.hbm_to_vmem [thread:$0]  %s5678_s30, 1024, %s4843_s25, [#allocation4], %s4517_s1, %s4517_s1, %s4518_s27  }
 0x106   :  { %s4529_s15 = smov [#allocation8]   ;;  %s4530_s6 = smov [#allocation11]  }
 0x107   :  { %s78_s7 = sshll.u32 %s4529_s15, 4  ;;  %s102_s29 = sshll.u32 %s4530_s6, 4  ;;  %s79_s7 = int_to_ptr.vmem [resolvable:$true] %s78_s7  ;;  %s4877_s29 = int_to_ptr.vmem [resolvable:$true] %s102_s29 }
 0x108   :  { %s5679_s19 = sld [smem:[#allocation61_spill]] }
 0x10e   :  { %s4177_s28 = scalar_lea.hbm %s5679_s19, 1024 }
 0x10f   :  { %p4178_p12 = scmp.ne.s32.totalorder %s5679_s19, %s4177_s28  ;;  %p4181_p13 = scmp.lt.u32.totalorder %s4177_s28, %s5679_s19 }
 0x111   :  { %p4183_p0 = pnand %p4181_p13, %p4178_p12 }
 0x113   :  { %4186 = shalt.err (!%p4183_p0)
}
 0x114   :  { %s4187_s25 = scalar_lea.vmem %s79_s7, 1024  ;;  %p4192_p2 = scmp.lt.s32.totalorder %s79_s7, %s79_s7 }
 0x115   :  { %p4188_p1 = scmp.ne.s32.totalorder %s79_s7, %s4187_s25  ;;  %p4193_p3 = scmp.lt.s32.totalorder %s4187_s25, %s4187_s25 }
 0x117   :  { %p4194_p4 = por %p4193_p3, %p4192_p2 }
 0x119   :  { %p4195_p5 = pnand %p4194_p4, %p4188_p1 }
 0x11b   :  { %4198 = shalt.err (!%p4195_p5)
}
 0x11c   :  { %84 = dma.hbm_to_vmem [thread:$0]  %s5679_s19, 1024, %s79_s7, [#allocation7], %s4517_s1, %s4517_s1, %s4518_s27  }
 0x11d   :  { %s5680_s23 = sld [smem:[#allocation63_spill]] }
 0x123   :  { %s4199_s10 = scalar_lea.hbm %s5680_s23, 512 }
 0x124   :  { %p4200_p6 = scmp.ne.s32.totalorder %s5680_s23, %s4199_s10  ;;  %p4203_p7 = scmp.lt.u32.totalorder %s4199_s10, %s5680_s23 }
 0x126   :  { %p4205_p8 = pnand %p4203_p7, %p4200_p6 }
 0x128   :  { %4208 = shalt.err (!%p4205_p8)
}
 0x129   :  { %s4209_s6 = scalar_lea.vmem %s4877_s29, 512  ;;  %p4214_p10 = scmp.lt.s32.totalorder %s4877_s29, %s4877_s29 }
 0x12a   :  { %p4210_p9 = scmp.ne.s32.totalorder %s4877_s29, %s4209_s6  ;;  %p4215_p11 = scmp.lt.s32.totalorder %s4209_s6, %s4209_s6 }
 0x12c   :  { %p4216_p12 = por %p4215_p11, %p4214_p10 }
 0x12e   :  { %p4217_p13 = pnand %p4216_p12, %p4210_p9 }
 0x130   :  { %4220 = shalt.err (!%p4217_p13)
}
 0x131   :  { %108 = dma.hbm_to_vmem [thread:$0]  %s5680_s23, 512, %s4877_s29, [#allocation10], %s4517_s1, %s4517_s1, %s4518_s27  }
 0x132   :  { %s4531_s3 = smov [#allocation14]   ;;  %s4532_s28 = smov [#allocation17]  }
 0x133   :  { %s127_s19 = sshll.u32 %s4531_s3, 4  ;;  %s148_s13 = sshll.u32 %s4532_s28, 4  ;;  %s128_s19 = int_to_ptr.vmem [resolvable:$true] %s127_s19  ;;  %s4914_s13 = int_to_ptr.vmem [resolvable:$true] %s148_s13 }
 0x134   :  { %s5681_s11 = sld [smem:[#allocation65_spill]] }
 0x13a   :  { %s4221_s25 = scalar_lea.hbm %s5681_s11, 16 }
 0x13b   :  { %p4222_p0 = scmp.ne.s32.totalorder %s5681_s11, %s4221_s25  ;;  %p4225_p1 = scmp.lt.u32.totalorder %s4221_s25, %s5681_s11 }
 0x13d   :  { %p4227_p2 = pnand %p4225_p1, %p4222_p0 }
 0x13f   :  { %4230 = shalt.err (!%p4227_p2)
}
 0x140   :  { %s4231_s29 = scalar_lea.vmem %s128_s19, 16  ;;  %s4235_s23 = scalar_lea.vmem %s128_s19, 32 }
 0x141   :  { %p4232_p3 = scmp.ne.s32.totalorder %s128_s19, %s4231_s29  ;;  %p4236_p4 = scmp.lt.s32.totalorder %s128_s19, %s128_s19 }
 0x142   :  { %p4237_p5 = scmp.lt.s32.totalorder %s4235_s23, %s4231_s29 }
 0x144   :  { %p4238_p6 = por %p4237_p5, %p4236_p4 }
 0x146   :  { %p4239_p7 = pnand %p4238_p6, %p4232_p3 }
 0x148   :  { %4242 = shalt.err (!%p4239_p7)
}
 0x149   :  { %130 = dma.hbm_to_vmem [thread:$0]  %s5681_s11, 16, %s128_s19, [#allocation13]  }
 0x14a   :  { %s5682_s15 = sld [smem:[#allocation67_spill]] }
 0x150   :  { %s4243_s6 = scalar_lea.hbm %s5682_s15, 1024 }
 0x151   :  { %p4244_p8 = scmp.ne.s32.totalorder %s5682_s15, %s4243_s6  ;;  %p4247_p9 = scmp.lt.u32.totalorder %s4243_s6, %s5682_s15 }
 0x153   :  { %p4249_p10 = pnand %p4247_p9, %p4244_p8 }
 0x155   :  { %4252 = shalt.err (!%p4249_p10)
}
 0x156   :  { %s4253_s4 = scalar_lea.vmem %s4914_s13, 1024  ;;  %p4258_p12 = scmp.lt.s32.totalorder %s4914_s13, %s4914_s13 }
 0x157   :  { %p4254_p11 = scmp.ne.s32.totalorder %s4914_s13, %s4253_s4  ;;  %p4259_p13 = scmp.lt.s32.totalorder %s4253_s4, %s4253_s4 }
 0x159   :  { %p4260_p0 = por %p4259_p13, %p4258_p12 }
 0x15b   :  { %p4261_p1 = pnand %p4260_p0, %p4254_p11 }
 0x15d   :  { %4264 = shalt.err (!%p4261_p1)
}
 0x15e   :  { %154 = dma.hbm_to_vmem [thread:$0]  %s5682_s15, 1024, %s4914_s13, [#allocation16], %s4517_s1, %s4517_s1, %s4518_s27  }
 0x15f   :  { %s4533_s11 = smov [#allocation20]   ;;  %s4534_s30 = smov [#allocation23]  }
 0x160   :  { %s170_s25 = sshll.u32 %s4533_s11, 4  ;;  %s195_s5 = sshll.u32 %s4534_s30, 4  ;;  %s171_s25 = int_to_ptr.vmem [resolvable:$true] %s170_s25  ;;  %s196_s5 = int_to_ptr.vmem [resolvable:$true] %s195_s5 }
 0x161   :  { %s5683_s29 = sld [smem:[#allocation69_spill]] }
 0x167   :  { %s4265_s23 = scalar_lea.hbm %s5683_s29, 1024 }
 0x168   :  { %p4266_p2 = scmp.ne.s32.totalorder %s5683_s29, %s4265_s23  ;;  %p4269_p3 = scmp.lt.u32.totalorder %s4265_s23, %s5683_s29 }
 0x16a   :  { %p4271_p4 = pnand %p4269_p3, %p4266_p2 }
 0x16c   :  { %4274 = shalt.err (!%p4271_p4)
}
 0x16d   :  { %s4275_s13 = scalar_lea.vmem %s171_s25, 1024  ;;  %p4280_p6 = scmp.lt.s32.totalorder %s171_s25, %s171_s25 }
 0x16e   :  { %p4276_p5 = scmp.ne.s32.totalorder %s171_s25, %s4275_s13  ;;  %p4281_p7 = scmp.lt.s32.totalorder %s4275_s13, %s4275_s13 }
 0x170   :  { %p4282_p8 = por %p4281_p7, %p4280_p6 }
 0x172   :  { %p4283_p9 = pnand %p4282_p8, %p4276_p5 }
 0x174   :  { %4286 = shalt.err (!%p4283_p9)
}
 0x175   :  { %176 = dma.hbm_to_vmem [thread:$0]  %s5683_s29, 1024, %s171_s25, [#allocation19], %s4517_s1, %s4517_s1, %s4518_s27  }
 0x176   :  { %s4287_s3 = scalar_lea.hbm %s5632_s12, 16 }
 0x177   :  { %p4288_p10 = scmp.ne.s32.totalorder %s5632_s12, %s4287_s3  ;;  %p4291_p11 = scmp.lt.u32.totalorder %s4287_s3, %s5632_s12 }
 0x179   :  { %p4293_p12 = pnand %p4291_p11, %p4288_p10 }
 0x17b   :  { %4296 = shalt.err (!%p4293_p12)
}
 0x17c   :  { %s4297_s11 = scalar_lea.vmem %s196_s5, 16  ;;  %s4301_s30 = scalar_lea.vmem %s196_s5, 32 }
 0x17d   :  { %p4298_p13 = scmp.ne.s32.totalorder %s196_s5, %s4297_s11  ;;  %p4302_p0 = scmp.lt.s32.totalorder %s196_s5, %s196_s5 }
 0x17e   :  { %p4303_p1 = scmp.lt.s32.totalorder %s4301_s30, %s4297_s11 }
 0x180   :  { %p4304_p2 = por %p4303_p1, %p4302_p0 }
 0x182   :  { %p4305_p3 = pnand %p4304_p2, %p4298_p13 }
 0x184   :  { %4308 = shalt.err (!%p4305_p3)
}
 0x185   :  { %198 = dma.hbm_to_vmem [thread:$0]  %s5632_s12, 16, %s196_s5, [#allocation22]  }
 0x186   :  { %s4535_s9 = smov [#allocation26]   ;;  %s4536_s23 = smov [#allocation29]  }
 0x187   :  { %s215_s29 = sshll.u32 %s4535_s9, 4  ;;  %s235_s10 = sshll.u32 %s4536_s23, 4  ;;  %s216_s29 = int_to_ptr.vmem [resolvable:$true] %s215_s29  ;;  %s236_s10 = int_to_ptr.vmem [resolvable:$true] %s235_s10 }
 0x188   :  { %s4309_s26 = scalar_lea.hbm %s5634_s14, 16 }
 0x189   :  { %p4310_p4 = scmp.ne.s32.totalorder %s5634_s14, %s4309_s26  ;;  %p4313_p5 = scmp.lt.u32.totalorder %s4309_s26, %s5634_s14 }
 0x18b   :  { %p4315_p6 = pnand %p4313_p5, %p4310_p4 }
 0x18d   :  { %4318 = shalt.err (!%p4315_p6)
}
 0x18e   :  { %s4319_s12 = scalar_lea.vmem %s216_s29, 16  ;;  %s4323_s5 = scalar_lea.vmem %s216_s29, 32 }
 0x18f   :  { %p4320_p7 = scmp.ne.s32.totalorder %s216_s29, %s4319_s12  ;;  %p4324_p8 = scmp.lt.s32.totalorder %s216_s29, %s216_s29 }
 0x190   :  { %p4325_p9 = scmp.lt.s32.totalorder %s4323_s5, %s4319_s12 }
 0x192   :  { %p4326_p10 = por %p4325_p9, %p4324_p8 }
 0x194   :  { %p4327_p11 = pnand %p4326_p10, %p4320_p7 }
 0x196   :  { %4330 = shalt.err (!%p4327_p11)
}
 0x197   :  { %218 = dma.hbm_to_vmem [thread:$0]  %s5634_s14, 16, %s216_s29, [#allocation25]  }
 0x198   :  { %s4331_s19 = scalar_lea.hbm %s5636_s16, 16 }
 0x199   :  { %p4332_p12 = scmp.ne.s32.totalorder %s5636_s16, %s4331_s19  ;;  %p4335_p13 = scmp.lt.u32.totalorder %s4331_s19, %s5636_s16 }
 0x19b   :  { %p4337_p0 = pnand %p4335_p13, %p4332_p12 }
 0x19d   :  { %4340 = shalt.err (!%p4337_p0)
}
 0x19e   :  { %s4341_s17 = scalar_lea.vmem %s236_s10, 16  ;;  %s4345_s9 = scalar_lea.vmem %s236_s10, 32 }
 0x19f   :  { %p4342_p1 = scmp.ne.s32.totalorder %s236_s10, %s4341_s17  ;;  %p4346_p2 = scmp.lt.s32.totalorder %s236_s10, %s236_s10 }
 0x1a0   :  { %p4347_p3 = scmp.lt.s32.totalorder %s4345_s9, %s4341_s17 }
 0x1a2   :  { %p4348_p4 = por %p4347_p3, %p4346_p2 }
 0x1a4   :  { %p4349_p5 = pnand %p4348_p4, %p4342_p1 }
 0x1a6   :  { %4352 = shalt.err (!%p4349_p5)
}
 0x1a7   :  { %238 = dma.hbm_to_vmem [thread:$0]  %s5636_s16, 16, %s236_s10, [#allocation28]  }
 0x1a8   :  { %s4537_s23 = smov [#allocation32]   ;;  %s4538_s21 = smov [#allocation35]  }
 0x1a9   :  { %s256_s2 = sshll.u32 %s4537_s23, 4  ;;  %s278_s26 = sshll.u32 %s4538_s21, 4  ;;  %s257_s2 = int_to_ptr.vmem [resolvable:$true] %s256_s2  ;;  %s4999_s26 = int_to_ptr.vmem [resolvable:$true] %s278_s26 }
 0x1aa   :  { %s4353_s6 = scalar_lea.hbm %s5638_s18, 512 }
 0x1ab   :  { %p4354_p6 = scmp.ne.s32.totalorder %s5638_s18, %s4353_s6  ;;  %p4357_p7 = scmp.lt.u32.totalorder %s4353_s6, %s5638_s18 }
 0x1ad   :  { %p4359_p8 = pnand %p4357_p7, %p4354_p6 }
 0x1af   :  { %4362 = shalt.err (!%p4359_p8)
}
 0x1b0   :  { %s4363_s16 = scalar_lea.vmem %s257_s2, 512  ;;  %p4368_p10 = scmp.lt.s32.totalorder %s257_s2, %s257_s2 }
 0x1b1   :  { %p4364_p9 = scmp.ne.s32.totalorder %s257_s2, %s4363_s16  ;;  %p4369_p11 = scmp.lt.s32.totalorder %s4363_s16, %s4363_s16 }
 0x1b3   :  { %p4370_p12 = por %p4369_p11, %p4368_p10 }
 0x1b5   :  { %p4371_p13 = pnand %p4370_p12, %p4364_p9 }
 0x1b7   :  { %4374 = shalt.err (!%p4371_p13)
}
 0x1b8   :  { %262 = dma.hbm_to_vmem [thread:$0]  %s5638_s18, 512, %s257_s2, [#allocation31], %s4517_s1, %s4517_s1, %s4518_s27  }
 0x1b9   :  { %s4375_s19 = scalar_lea.hbm %s5640_s20, 512 }
 0x1ba   :  { %p4376_p0 = scmp.ne.s32.totalorder %s5640_s20, %s4375_s19  ;;  %p4379_p1 = scmp.lt.u32.totalorder %s4375_s19, %s5640_s20 }
 0x1bc   :  { %p4381_p2 = pnand %p4379_p1, %p4376_p0 }
 0x1be   :  { %4384 = shalt.err (!%p4381_p2)
}
 0x1bf   :  { %s4385_s17 = scalar_lea.vmem %s4999_s26, 512  ;;  %p4390_p4 = scmp.lt.s32.totalorder %s4999_s26, %s4999_s26 }
 0x1c0   :  { %p4386_p3 = scmp.ne.s32.totalorder %s4999_s26, %s4385_s17  ;;  %p4391_p5 = scmp.lt.s32.totalorder %s4385_s17, %s4385_s17 }
 0x1c2   :  { %p4392_p6 = por %p4391_p5, %p4390_p4 }
 0x1c4   :  { %p4393_p7 = pnand %p4392_p6, %p4386_p3 }
 0x1c6   :  { %4396 = shalt.err (!%p4393_p7)
}
 0x1c7   :  { %284 = dma.hbm_to_vmem [thread:$0]  %s5640_s20, 512, %s4999_s26, [#allocation34], %s4517_s1, %s4517_s1, %s4518_s27  }
 0x1c8   :  { %s4539_s14 = smov [#allocation38]   ;;  %s4540_s23 = smov [#allocation39]  }
 0x1c9   :  { %s300_s29 = sshll.u32 %s4539_s14, 4  ;;  %s314_s2 = sshll.u32 %s4540_s23, 4  ;;  %s301_s29 = int_to_ptr.vmem [resolvable:$true] %s300_s29  ;;  %s5036_s2 = int_to_ptr.vmem [resolvable:$true] %s314_s2 }
 0x1ca   :  { %s4397_s15 = scalar_lea.hbm %s5642_s22, 512 }
 0x1cb   :  { %p4398_p8 = scmp.ne.s32.totalorder %s5642_s22, %s4397_s15  ;;  %p4401_p9 = scmp.lt.u32.totalorder %s4397_s15, %s5642_s22 }
 0x1cd   :  { %p4403_p10 = pnand %p4401_p9, %p4398_p8 }
 0x1cf   :  { %4406 = shalt.err (!%p4403_p10)
}
 0x1d0   :  { %s4407_s20 = scalar_lea.vmem %s301_s29, 512  ;;  %p4412_p12 = scmp.lt.s32.totalorder %s301_s29, %s301_s29 }
 0x1d1   :  { %p4408_p11 = scmp.ne.s32.totalorder %s301_s29, %s4407_s20  ;;  %p4413_p13 = scmp.lt.s32.totalorder %s4407_s20, %s4407_s20 }
 0x1d3   :  { %p4414_p0 = por %p4413_p13, %p4412_p12 }
 0x1d5   :  { %p4415_p1 = pnand %p4414_p0, %p4408_p11 }
 0x1d7   :  { %4418 = shalt.err (!%p4415_p1)
}
 0x1d8   :  { %306 = dma.hbm_to_vmem [thread:$0]  %s5642_s22, 512, %s301_s29, [#allocation37], %s4517_s1, %s4517_s1, %s4518_s27  }
 0x1d9   :  { %s4419_s3 = scalar_lea.hbm %s5644_s24, 512 }
 0x1da   :  { %p4420_p2 = scmp.ne.s32.totalorder %s5644_s24, %s4419_s3  ;;  %p4423_p3 = scmp.lt.u32.totalorder %s4419_s3, %s5644_s24 }
 0x1dc   :  { %p4425_p4 = pnand %p4423_p3, %p4420_p2 }
 0x1de   :  { %4428 = shalt.err (!%p4425_p4)
}
 0x1df   :  { %s4429_s11 = scalar_lea.vmem %s5036_s2, 512  ;;  %p4434_p6 = scmp.lt.s32.totalorder %s5036_s2, %s5036_s2 }
 0x1e0   :  { %p4430_p5 = scmp.ne.s32.totalorder %s5036_s2, %s4429_s11  ;;  %p4435_p7 = scmp.lt.s32.totalorder %s4429_s11, %s4429_s11 }
 0x1e2   :  { %p4436_p8 = por %p4435_p7, %p4434_p6 }
 0x1e4   :  { %p4437_p9 = pnand %p4436_p8, %p4430_p5 }
 0x1e6   :  { %4440 = shalt.err (!%p4437_p9)
}
 0x1e7   :  { %320 = dma.hbm_to_vmem [thread:$0]  %s5644_s24, 512, %s5036_s2, [#allocation40], %s4517_s1, %s4517_s1, %s4518_s27  }
 0x1e8   :  { %4485 = dma.done.wait [#allocation4], 1024  }
 0x1e9   :  { %4486 = vsyncadd [#allocation4], 4294966272 }
 0x1ea   :  { %4487 = dma.done.wait [#allocation7], 2048  }
 0x1eb   :  { %4488 = vsyncadd [#allocation7], 4294965248 }
 0x1ec   :  { %4489 = dma.done.wait [#allocation10], 1536  }
 0x1ed   :  { %4490 = vsyncadd [#allocation10], 4294965760 }
 0x1ee   :  { %4491 = dma.done.wait [#allocation13], 528  }
 0x1ef   :  { %4492 = vsyncadd [#allocation13], 4294966768 }
 0x1f0   :  { %4493 = dma.done.wait [#allocation16], 2048  }
 0x1f1   :  { %4494 = vsyncadd [#allocation16], 4294965248 }
 0x1f2   :  { %4495 = dma.done.wait [#allocation19], 1040  }
 0x1f3   :  { %4496 = vsyncadd [#allocation19], 4294966256 }
 0x1f4   :  { %4497 = dma.done.wait [#allocation22], 1040  }
 0x1f5   :  { %4498 = vsyncadd [#allocation22], 4294966256 }
 0x1f6   :  { %4499 = dma.done.wait [#allocation25], 32  }
 0x1f7   :  { %4500 = vsyncadd [#allocation25], 4294967264 }
 0x1f8   :  { %4501 = dma.done.wait [#allocation28], 32  }
 0x1f9   :  { %4502 = vsyncadd [#allocation28], 4294967264 }
 0x1fa   :  { %4503 = dma.done.wait [#allocation31], 1024  }
 0x1fb   :  { %4504 = vsyncadd [#allocation31], 4294966272 }
 0x1fc   :  { %4505 = dma.done.wait [#allocation34], 528  }
 0x1fd   :  { %4506 = vsyncadd [#allocation34], 4294966768 }
 0x1fe   :  { %4507 = dma.done.wait [#allocation37], 528  }
 0x1ff   :  { %4508 = vsyncadd [#allocation37], 4294966768 }
 0x200   :  { %4509 = dma.done.wait [#allocation40], 512  }
 0x201   :  { %4510 = vsyncadd [#allocation40], 4294966784  ;;  %v5073_v1 = vld [vmem:[#allocation9] sm:$0xff]  ;;  %v5075_v2 = vld [vmem:[#allocation9 + $0x8] sm:$0xff]  ;;  %vm409_vm0 = vcmask 523264   ;;  %vm547_vm1 = vcmask 261120  }
 0x202   :  { %v5077_v3 = vld [vmem:[#allocation9 + $0x10] sm:$0xff]  ;;  %v3596_v4 = vpack.c.bf16 %v5075_v2, %v5073_v1  ;;  %v5081_v5 = vld [vmem:[#allocation9 + $0x18] sm:$0xff]  ;;  %v5085_v7 = vld [vmem:[#allocation9 + $0x20] sm:$0xff]  ;;  %s4543_s24 = smov 96   ;;  %vm2332_vm6 = vcmask 7168   ;;  %s4544_s18 = smov [#allocation42]  }
 0x203   :  { %v3600_v6 = vpack.c.bf16 %v5081_v5, %v5077_v3  ;;  %v5087_v8 = vld [vmem:[#allocation9 + $0x28] sm:$0xff]  ;;  %v401_v9 = vld [vmem:[#allocation3] sm:$0xff]  ;;  %v5092_v11 = vld [vmem:[#allocation9 + $0x30] sm:$0xff]  ;;  %s2937_s9 = sshll.u32 %s4544_s18, 4  ;;  %s2938_s9 = int_to_ptr.vmem [resolvable:$true] %s2937_s9 }
 0x204   :  { %3597 = vmatprep.subr.bf16.mxu0 %v3596_v4  ;;  %3281 = vmatprep.mubr.msk.f32.mxu0 %vm409_vm0, %v401_v9  ;;  %v3604_v10 = vpack.c.bf16 %v5087_v8, %v5085_v7  ;;  %v543_v12 = vld [vmem:[#allocation12] sm:$0xff]  ;;  %v544_v13 = vld [vmem:[#allocation12 + $0x8] sm:$0xff]  ;;  %v5094_v14 = vld [vmem:[#allocation9 + $0x38] sm:$0xff]  ;;  %s4441_s14 = scalar_lea.vmem %s2938_s9, 16  ;;  %s4445_s29 = scalar_lea.vmem %s2938_s9, 32 }
 0x205   :  { %3599 = vmatpush3.bf16.msra.mxu0 %v3596_v4  ;;  %v3612_v15 = vpack.c.bf16 %v544_v13, %v543_v12  ;;  %v545_v16 = vld [vmem:[#allocation12 + $0x10] sm:$0xff]  ;;  %v546_v17 = vld [vmem:[#allocation12 + $0x18] sm:$0xff]  ;;  %v3608_v19 = vpack.c.bf16 %v5094_v14, %v5092_v11  ;;  %v402_v20 = vld [vmem:[#allocation3 + $0x8] sm:$0xff]  ;;  %p4442_p10 = scmp.ne.s32.totalorder %s2938_s9, %s4441_s14  ;;  %p4446_p11 = scmp.lt.s32.totalorder %s2938_s9, %s2938_s9 }
 0x206   :  { %3601 = vmatprep.subr.bf16.mxu0 %v3600_v6  ;;  %v3616_v18 = vpack.c.bf16 %v546_v17, %v545_v16  ;;  %v403_v21 = vld [vmem:[#allocation3 + $0x10] sm:$0xff]  ;;  %v404_v22 = vld [vmem:[#allocation3 + $0x18] sm:$0xff]  ;;  %v405_v23 = vld [vmem:[#allocation3 + $0x20] sm:$0xff]  ;;  %p4447_p12 = scmp.lt.s32.totalorder %s4445_s29, %s4441_s14 }
 0x207   :  { %3613 = vmatprep.subr.bf16.mxu1 %v3612_v15  ;;  %v406_v24 = vld [vmem:[#allocation3 + $0x28] sm:$0xff]  ;;  %v407_v25 = vld [vmem:[#allocation3 + $0x30] sm:$0xff]  ;;  %v408_v26 = vld [vmem:[#allocation3 + $0x38] sm:$0xff] }
 0x208   :  { %3615 = vmatpush3.bf16.msra.mxu1 %v3612_v15  ;;  %v539_v27 = vld [vmem:[#allocation11] sm:$0xff]  ;;  %v540_v28 = vld [vmem:[#allocation11 + $0x8] sm:$0xff]  ;;  %v541_v30 = vld [vmem:[#allocation11 + $0x10] sm:$0xff]  ;;  %p4448_p13 = por %p4447_p12, %p4446_p11 }
 0x209   :  { %3603 = vmatpush3.bf16.msra.mxu0 %v3600_v6  ;;  %3617 = vmatprep.subr.bf16.mxu1 %v3616_v18  ;;  %v3620_v29 = vpack.c.bf16 %v540_v28, %v539_v27  ;;  %v542_v31 = vld [vmem:[#allocation11 + $0x18] sm:$0xff]  ;;  %v930_v41 = vld [vmem:[#allocation6] sm:$0xff]  ;;  %v1076_v43 = vld [vmem:[#allocation17 + $0x8] sm:$0xff] }
 0x20a   :  { %3605 = vmatprep.subr.bf16.mxu0 %v3604_v10  ;;  %v3624_v34 = vpack.c.bf16 %v542_v31, %v541_v30  ;;  %v1075_v42 = vld [vmem:[#allocation17] sm:$0xff]  ;;  %v1077_v44 = vld [vmem:[#allocation17 + $0x10] sm:$0xff]  ;;  %v1078_v46 = vld [vmem:[#allocation17 + $0x18] sm:$0xff]  ;;  %p4449_p0 = pnand %p4448_p13, %p4442_p10 }
 0x20b   :  { %v3644_v45 = vpack.c.bf16 %v1076_v43, %v1075_v42  ;;  %v3648_v47 = vpack.c.bf16 %v1078_v46, %v1077_v44  ;;  %v1079_v48 = vld [vmem:[#allocation17 + $0x20] sm:$0xff]  ;;  %v1080_v49 = vld [vmem:[#allocation17 + $0x28] sm:$0xff]  ;;  %v1081_v51 = vld [vmem:[#allocation17 + $0x30] sm:$0xff] }
 0x20c   :  { %3619 = vmatpush3.bf16.msra.mxu1 %v3616_v18  ;;  %v3652_v50 = vpack.c.bf16 %v1080_v49, %v1079_v48  ;;  %v1082_v52 = vld [vmem:[#allocation17 + $0x38] sm:$0xff] }
 0x20d   :  { %3607 = vmatpush3.bf16.msra.mxu0 %v3604_v10  ;;  %3621 = vmatprep.subr.bf16.mxu1 %v3620_v29  ;;  %v2986_v53 = vld [vmem:[#allocation14] ss:$0 sm:$0xff]  ;;  %v3656_v55 = vpack.c.bf16 %v1082_v52, %v1081_v51 }
 0x20e   :  { %3609 = vmatprep.subr.bf16.mxu0 %v3608_v19 }
 0x211   :  { %3611 = vmatpush3.bf16.msra.mxu0 %v3608_v19 }
 0x214   :  { %3282 = vmatmul.mubr.msk.f32.vlgmr.msra.gmra.mrb[0].mxu0 %vm409_vm0, %v402_v20 }
 0x215   :  { %3284 = vmatprep.mubr.msk.f32.mxu0 %vm409_vm0, %v403_v21 }
 0x218   :  { %3285 = vmatmul.mubr.msk.f32.gmra.mrb[2].mxu0 %vm409_vm0, %v404_v22 }
 0x219   :  { %3287 = vmatprep.mubr.msk.f32.mxu0 %vm409_vm0, %v405_v23 }
 0x21c   :  { %3288 = vmatmul.mubr.msk.f32.gmra.mrb[4].mxu0 %vm409_vm0, %v406_v24 }
 0x21d   :  { %3290 = vmatprep.mubr.msk.f32.mxu0 %vm409_vm0, %v407_v25 }
 0x220   :  { %3291 = vmatmul.mubr.msk.f32.gmra.mrb[6].mxu0 %vm409_vm0, %v408_v26 }
 0x221   :  { %3349 = vmatprep.mubr.msk.f32.mxu0 %vm409_vm0, %v930_v41 }
 0x2e7   :  { %v3283_v32 = vpop.f32.mrb[0].mxu0 }
 0x2e8   :  { %v500_v33 = vpop.f32.mrb[1].mxu0 }
 0x2e9   :  { %3301 = vmatprep.mubr.msk.f32.mxu1 %vm547_vm1, %v500_v33 }
 0x2ea   :  { %3302 = vmatmul.mubr.msk.f32.vlgmr.msra.gmra.mrb[0].mxu1 %vm547_vm1, %v3283_v32 }
 0x2eb   :  { %v3286_v35 = vpop.f32.mrb[2].mxu0  ;;  %3623 = vmatpush3.bf16.msra.mxu1 %v3620_v29 }
 0x2ec   :  { %v510_v36 = vpop.f32.mrb[3].mxu0  ;;  %3625 = vmatprep.subr.bf16.mxu1 %v3624_v34 }
 0x2ed   :  { %3304 = vmatprep.mubr.msk.f32.mxu1 %vm547_vm1, %v510_v36 }
 0x2ee   :  { %3305 = vmatmul.mubr.msk.f32.gmra.mrb[2].mxu1 %vm547_vm1, %v3286_v35 }
 0x2ef   :  { %v3289_v37 = vpop.f32.mrb[4].mxu0  ;;  %3627 = vmatpush3.bf16.msra.mxu1 %v3624_v34 }
 0x2f0   :  { %v520_v38 = vpop.f32.mrb[5].mxu0  ;;  %3645 = vmatprep.subr.bf16.mxu1 %v3644_v45 }
 0x2f1   :  { %3307 = vmatprep.mubr.msk.f32.mxu1 %vm547_vm1, %v520_v38 }
 0x2f2   :  { %3308 = vmatmul.mubr.msk.f32.gmra.mrb[4].mxu1 %vm547_vm1, %v3289_v37 }
 0x2f3   :  { %v3292_v39 = vpop.f32.mrb[6].mxu0 }
 0x2f4   :  { %v530_v40 = vpop.f32.mrb[7].mxu0 }
 0x2f5   :  { %3310 = vmatprep.mubr.msk.f32.mxu1 %vm547_vm1, %v530_v40 }
 0x2f6   :  { %3311 = vmatmul.mubr.msk.f32.gmra.mrb[6].mxu1 %vm547_vm1, %v3292_v39 }
 0x2f7   :  { %3321 = vmatprep.mubr.msk.f32.mxu1 %vm547_vm1, %v5073_v1 }
 0x2fa   :  { %3322 = vmatmul.mubr.msk.f32.vlgmr.msra.gmra.mrb[0].mxu1 %vm547_vm1, %v5075_v2 }
 0x2fb   :  { %3324 = vmatprep.mubr.msk.f32.mxu1 %vm547_vm1, %v5077_v3  ;;  %3647 = vmatpush3.bf16.msra.mxu1 %v3644_v45 }
 0x2fc   :  { %3649 = vmatprep.subr.bf16.mxu1 %v3648_v47 }
 0x2fe   :  { %3325 = vmatmul.mubr.msk.f32.gmra.mrb[2].mxu1 %vm547_vm1, %v5081_v5 }
 0x2ff   :  { %3327 = vmatprep.mubr.msk.f32.mxu1 %vm547_vm1, %v5085_v7  ;;  %3651 = vmatpush3.bf16.msra.mxu1 %v3648_v47 }
 0x300   :  { %3653 = vmatprep.subr.bf16.mxu1 %v3652_v50 }
 0x302   :  { %3328 = vmatmul.mubr.msk.f32.gmra.mrb[4].mxu1 %vm547_vm1, %v5087_v8 }
 0x303   :  { %3330 = vmatprep.mubr.msk.f32.mxu1 %vm547_vm1, %v5092_v11  ;;  %3655 = vmatpush3.bf16.msra.mxu1 %v3652_v50 }
 0x304   :  { %3657 = vmatprep.subr.bf16.mxu1 %v3656_v55 }
 0x306   :  { %3331 = vmatmul.mubr.msk.f32.gmra.mrb[6].mxu1 %vm547_vm1, %v5094_v14 }
 0x307   :  { %3659 = vmatpush3.bf16.msra.mxu1 %v3656_v55 }
 0x3cd   :  { %v3323_v54 = vpop.f32.mrb[0].mxu1 }
 0x3ce   :  { %v814_v56 = vadd.f32 %v3323_v54, %v2986_v53  ;;  %v767_v57 = vpop.f32.mrb[1].mxu1 }
 0x3cf   :  { %v813_v58 = vadd.f32 %v2986_v53, %v767_v57 }
 0x3d0   :  { %v822_v59 = vsel %vm409_vm0, %v814_v56, 0.0 }
 0x3d1   :  { %v821_v60 = vsel %vm409_vm0, %v813_v58, 0.0  ;;  %v3326_v61 = vpop.f32.mrb[2].mxu1 }
 0x3d2   :  { %v823_v62 = vadd.f32 %v822_v59, %v821_v60  ;;  %v777_v63 = vpop.f32.mrb[3].mxu1  ;;  %v816_v0 = vadd.f32 %v3326_v61, %v2986_v53 }
 0x3d3   :  { %v815_v1 = vadd.f32 %v2986_v53, %v777_v63 }
 0x3d4   :  { %v826_v6 = vsel %vm409_vm0, %v816_v0, 0.0 }
 0x3d5   :  { %v824_v2 = vsel %vm409_vm0, %v815_v1, 0.0  ;;  %v3329_v3 = vpop.f32.mrb[4].mxu1 }
 0x3d6   :  { %v825_v4 = vadd.f32 %v824_v2, %v823_v62  ;;  %v787_v5 = vpop.f32.mrb[5].mxu1  ;;  %v818_v7 = vadd.f32 %v3329_v3, %v2986_v53 }
 0x3d7   :  { %v817_v8 = vadd.f32 %v2986_v53, %v787_v5  ;;  %v2987_v5 = vld [vmem:[#allocation24] ss:$0 sm:$0xff] }
 0x3d8   :  { %v827_v9 = vadd.f32 %v826_v6, %v825_v4  ;;  %v830_v14 = vsel %vm409_vm0, %v818_v7, 0.0 }
 0x3d9   :  { %v828_v10 = vsel %vm409_vm0, %v817_v8, 0.0  ;;  %v3332_v11 = vpop.f32.mrb[6].mxu1 }
 0x3da   :  { %v829_v12 = vadd.f32 %v828_v10, %v827_v9  ;;  %v797_v13 = vpop.f32.mrb[7].mxu1  ;;  %v820_v15 = vadd.f32 %v3332_v11, %v2986_v53  ;;  %v2988_v10 = vld [vmem:[#allocation26] ss:$0 sm:$0xff] }
 0x3db   :  { %v819_v16 = vadd.f32 %v2986_v53, %v797_v13 }
 0x3dc   :  { %v831_v17 = vadd.f32 %v830_v14, %v829_v12  ;;  %v834_v20 = vsel %vm409_vm0, %v820_v15, 0.0 }
 0x3dd   :  { %v832_v18 = vsel %vm409_vm0, %v819_v16, 0.0 }
 0x3de   :  { %v833_v19 = vadd.f32 %v832_v18, %v831_v17 }
 0x3e0   :  { %v835_v21 = vadd.f32 %v834_v20, %v833_v19 }
 0x3e2   :  { %v836_v22 = vrot.slane %v835_v21, 4 }
 0x3e4   :  { %v837_v23 = vadd.f32 %v836_v22, %v835_v21 }
 0x3e6   :  { %v838_v24 = vrot.slane %v837_v23, 2 }
 0x3e8   :  { %v839_v25 = vadd.f32 %v838_v24, %v837_v23 }
 0x3ea   :  { %v840_v26 = vrot.slane %v839_v25, 1 }
 0x3ec   :  { %v841_v27 = vadd.f32 %v840_v26, %v839_v25 }
 0x3ee   :  { %v843_v28 = vmul.f32 0.015625, %v841_v27 }
 0x3f0   :  { %v844_v29 = vsub.f32 %v813_v58, %v843_v28  ;;  %v845_v30 = vsub.f32 %v814_v56, %v843_v28  ;;  %v846_v31 = vsub.f32 %v815_v1, %v843_v28  ;;  %v847_v32 = vsub.f32 %v816_v0, %v843_v28 }
 0x3f1   :  { %v848_v33 = vsub.f32 %v817_v8, %v843_v28  ;;  %v849_v34 = vsub.f32 %v818_v7, %v843_v28  ;;  %v850_v35 = vsub.f32 %v819_v16, %v843_v28  ;;  %v851_v36 = vsub.f32 %v820_v15, %v843_v28 }
 0x3f2   :  { %v852_v37 = vmul.f32 %v844_v29, %v844_v29  ;;  %v853_v38 = vmul.f32 %v845_v30, %v845_v30  ;;  %v854_v39 = vmul.f32 %v846_v31, %v846_v31  ;;  %v855_v40 = vmul.f32 %v847_v32, %v847_v32 }
 0x3f3   :  { %v856_v44 = vmul.f32 %v848_v33, %v848_v33  ;;  %v857_v47 = vmul.f32 %v849_v34, %v849_v34  ;;  %v858_v50 = vmul.f32 %v850_v35, %v850_v35  ;;  %v859_v53 = vmul.f32 %v851_v36, %v851_v36 }
 0x3f4   :  { %v860_v41 = vsel %vm409_vm0, %v852_v37, 0.0  ;;  %v861_v42 = vsel %vm409_vm0, %v853_v38, 0.0  ;;  %v863_v45 = vsel %vm409_vm0, %v854_v39, 0.0  ;;  %v865_v48 = vsel %vm409_vm0, %v855_v40, 0.0 }
 0x3f5   :  { %v862_v43 = vadd.f32 %v861_v42, %v860_v41  ;;  %v867_v51 = vsel %vm409_vm0, %v856_v44, 0.0  ;;  %v869_v54 = vsel %vm409_vm0, %v857_v47, 0.0  ;;  %v871_v56 = vsel %vm409_vm0, %v858_v50, 0.0  ;;  %v932_v44 = vld [vmem:[#allocation6 + $0x10] sm:$0xff]  ;;  %v935_v47 = vld [vmem:[#allocation6 + $0x28] sm:$0xff] }
 0x3f6   :  { %v873_v58 = vsel %vm409_vm0, %v859_v53, 0.0  ;;  %v1067_v50 = vld [vmem:[#allocation15] sm:$0xff]  ;;  %v1069_v53 = vld [vmem:[#allocation15 + $0x10] sm:$0xff] }
 0x3f7   :  { %v864_v46 = vadd.f32 %v863_v45, %v862_v43  ;;  %v931_v43 = vld [vmem:[#allocation6 + $0x8] sm:$0xff]  ;;  %v933_v45 = vld [vmem:[#allocation6 + $0x18] sm:$0xff] }
 0x3f9   :  { %v866_v49 = vadd.f32 %v865_v48, %v864_v46  ;;  %v934_v46 = vld [vmem:[#allocation6 + $0x20] sm:$0xff]  ;;  %v936_v48 = vld [vmem:[#allocation6 + $0x30] sm:$0xff] }
 0x3fb   :  { %v868_v52 = vadd.f32 %v867_v51, %v866_v49  ;;  %v937_v49 = vld [vmem:[#allocation6 + $0x38] sm:$0xff]  ;;  %v1068_v51 = vld [vmem:[#allocation15 + $0x8] sm:$0xff] }
 0x3fd   :  { %v870_v55 = vadd.f32 %v869_v54, %v868_v52  ;;  %v3660_v52 = vpack.c.bf16 %v1068_v51, %v1067_v50  ;;  %v1070_v54 = vld [vmem:[#allocation15 + $0x18] sm:$0xff] }
 0x3ff   :  { %v872_v57 = vadd.f32 %v871_v56, %v870_v55  ;;  %3661 = vmatprep.subr.bf16.mxu1 %v3660_v52 }
 0x401   :  { %v874_v59 = vadd.f32 %v873_v58, %v872_v57  ;;  %v3664_v57 = vpack.c.bf16 %v1070_v54, %v1069_v53  ;;  %v1071_v58 = vld [vmem:[#allocation15 + $0x20] sm:$0xff] }
 0x403   :  { %v875_v60 = vrot.slane %v874_v59, 4 }
 0x405   :  { %v876_v61 = vadd.f32 %v875_v60, %v874_v59  ;;  %v1072_v59 = vld [vmem:[#allocation15 + $0x28] sm:$0xff] }
 0x407   :  { %v877_v62 = vrot.slane %v876_v61, 2 }
 0x409   :  { %v878_v63 = vadd.f32 %v877_v62, %v876_v61  ;;  %v3668_v62 = vpack.c.bf16 %v1072_v59, %v1071_v58 }
 0x40b   :  { %v879_v0 = vrot.slane %v878_v63, 1 }
 0x40d   :  { %v880_v1 = vadd.f32 %v879_v0, %v878_v63  ;;  %v1073_v63 = vld [vmem:[#allocation15 + $0x30] sm:$0xff]  ;;  %v1074_v0 = vld [vmem:[#allocation15 + $0x38] sm:$0xff] }
 0x40f   :  { %v881_v2 = vmul.f32 0.015625, %v880_v1 }
 0x411   :  { %v882_v3 = vadd.f32 1e-05, %v881_v2 }
 0x413   :  { %3841 = vrsqrt.f32 %v882_v3  ;;  %v3672_v3 = vpack.c.bf16 %v1074_v0, %v1073_v63 }
 0x41d   :  { %v3842_v4 = vpop.eup %3841 }
 0x41e   :  { %v890_v6 = vmul.f32 %v3842_v4, %v850_v35  ;;  %v884_v7 = vmul.f32 %v3842_v4, %v844_v29  ;;  %v885_v8 = vmul.f32 %v3842_v4, %v845_v30  ;;  %v886_v9 = vmul.f32 %v3842_v4, %v846_v31 }
 0x41f   :  { %v887_v11 = vmul.f32 %v3842_v4, %v847_v32  ;;  %v888_v12 = vmul.f32 %v3842_v4, %v848_v33  ;;  %v889_v13 = vmul.f32 %v3842_v4, %v849_v34  ;;  %v891_v14 = vmul.f32 %v3842_v4, %v851_v36 }
 0x420   :  { %v899_v15 = vmul.f32 %v2987_v5, %v884_v7  ;;  %v900_v16 = vmul.f32 %v2987_v5, %v885_v8  ;;  %v901_v17 = vmul.f32 %v2987_v5, %v886_v9  ;;  %v905_v24 = vmul.f32 %v2987_v5, %v890_v6  ;;  %v1464_v6 = vld [vmem:[#allocation8] sm:$0xff] }
 0x421   :  { %v902_v18 = vmul.f32 %v2987_v5, %v887_v11  ;;  %v903_v19 = vmul.f32 %v2987_v5, %v888_v12  ;;  %v904_v20 = vmul.f32 %v2987_v5, %v889_v13  ;;  %v906_v27 = vmul.f32 %v2987_v5, %v891_v14  ;;  %v3013_v7 = vld [vmem:[#allocation18] ss:$0 sm:$0xff] }
 0x422   :  { %v5146_v21 = vadd.f32 %v2988_v10, %v899_v15  ;;  %v5148_v22 = vadd.f32 %v2988_v10, %v900_v16  ;;  %v5150_v23 = vadd.f32 %v2988_v10, %v901_v17  ;;  %v5166_v34 = vadd.f32 %v2988_v10, %v905_v24 }
 0x423   :  { %v5152_v25 = vadd.f32 %v2988_v10, %v902_v18  ;;  %v5154_v26 = vadd.f32 %v2988_v10, %v903_v19  ;;  %v5159_v31 = vadd.f32 %v2988_v10, %v904_v20  ;;  %v5174_v38 = vadd.f32 %v2988_v10, %v906_v27 }
 0x424   :  { %v922_v28 = vmax.f32 %v5146_v21, 0.0  ;;  %v923_v29 = vmax.f32 %v5148_v22, 0.0  ;;  %v924_v30 = vmax.f32 %v5150_v23, 0.0  ;;  %v928_v40 = vmax.f32 %v5166_v34, 0.0 }
 0x425   :  { %v925_v32 = vmax.f32 %v5152_v25, 0.0  ;;  %v926_v36 = vmax.f32 %v5154_v26, 0.0  ;;  %v927_v37 = vmax.f32 %v5159_v31, 0.0  ;;  %v929_v41 = vmax.f32 %v5174_v38, 0.0 }
 0x426   :  { %v3628_v33 = vpack.c.bf16 %v923_v29, %v922_v28 }
 0x427   :  { %v3632_v35 = vpack.c.bf16 %v925_v32, %v924_v30  ;;  %v3636_v39 = vpack.c.bf16 %v927_v37, %v926_v36  ;;  %v3640_v42 = vpack.c.bf16 %v929_v41, %v928_v40 }
 0x428   :  { %3629 = vmatprep.subr.bf16.mxu0 %v3628_v33 }
 0x429   :  { %3631 = vmatpush3.bf16.msra.mxu0 %v3628_v33 }
 0x42a   :  { %3633 = vmatprep.subr.bf16.mxu0 %v3632_v35 }
 0x42d   :  { %3635 = vmatpush3.bf16.msra.mxu0 %v3632_v35 }
 0x42e   :  { %3637 = vmatprep.subr.bf16.mxu0 %v3636_v39 }
 0x431   :  { %3639 = vmatpush3.bf16.msra.mxu0 %v3636_v39 }
 0x432   :  { %3641 = vmatprep.subr.bf16.mxu0 %v3640_v42 }
 0x435   :  { %3643 = vmatpush3.bf16.msra.mxu0 %v3640_v42 }
 0x438   :  { %3350 = vmatmul.mubr.msk.f32.vlgmr.msra.gmra.mrb[8].mxu0 %vm409_vm0, %v931_v43 }
 0x439   :  { %3352 = vmatprep.mubr.msk.f32.mxu0 %vm409_vm0, %v932_v44 }
 0x43c   :  { %3353 = vmatmul.mubr.msk.f32.gmra.mrb[10].mxu0 %vm409_vm0, %v933_v45 }
 0x43d   :  { %3355 = vmatprep.mubr.msk.f32.mxu0 %vm409_vm0, %v934_v46 }
 0x440   :  { %3356 = vmatmul.mubr.msk.f32.gmra.mrb[12].mxu0 %vm409_vm0, %v935_v47 }
 0x441   :  { %3358 = vmatprep.mubr.msk.f32.mxu0 %vm409_vm0, %v936_v48 }
 0x444   :  { %3359 = vmatmul.mubr.msk.f32.gmra.mrb[14].mxu0 %vm409_vm0, %v937_v49 }
 0x445   :  { %3433 = vmatprep.mubr.msk.f32.mxu0 %vm409_vm0, %v1464_v6 }
 0x50b   :  { %v3351_v55 = vpop.f32.mrb[8].mxu0 }
 0x50c   :  { %v1028_v56 = vpop.f32.mrb[9].mxu0 }
 0x50d   :  { %3377 = vmatprep.mubr.msk.f32.mxu1 %vm409_vm0, %v1028_v56 }
 0x50e   :  { %3378 = vmatmul.mubr.msk.f32.vlgmr.msra.gmra.mrb[8].mxu1 %vm409_vm0, %v3351_v55 }
 0x50f   :  { %v3354_v60 = vpop.f32.mrb[10].mxu0  ;;  %3663 = vmatpush3.bf16.msra.mxu1 %v3660_v52 }
 0x510   :  { %v1038_v61 = vpop.f32.mrb[11].mxu0  ;;  %3665 = vmatprep.subr.bf16.mxu1 %v3664_v57 }
 0x511   :  { %3380 = vmatprep.mubr.msk.f32.mxu1 %vm409_vm0, %v1038_v61 }
 0x512   :  { %3381 = vmatmul.mubr.msk.f32.gmra.mrb[10].mxu1 %vm409_vm0, %v3354_v60 }
 0x513   :  { %v3357_v1 = vpop.f32.mrb[12].mxu0  ;;  %3667 = vmatpush3.bf16.msra.mxu1 %v3664_v57 }
 0x514   :  { %v1048_v2 = vpop.f32.mrb[13].mxu0  ;;  %3669 = vmatprep.subr.bf16.mxu1 %v3668_v62 }
 0x515   :  { %3383 = vmatprep.mubr.msk.f32.mxu1 %vm409_vm0, %v1048_v2 }
 0x516   :  { %3384 = vmatmul.mubr.msk.f32.gmra.mrb[12].mxu1 %vm409_vm0, %v3357_v1 }
 0x517   :  { %v3360_v4 = vpop.f32.mrb[14].mxu0  ;;  %3671 = vmatpush3.bf16.msra.mxu1 %v3668_v62 }
 0x518   :  { %v1058_v5 = vpop.f32.mrb[15].mxu0  ;;  %3673 = vmatprep.subr.bf16.mxu1 %v3672_v3 }
 0x519   :  { %3386 = vmatprep.mubr.msk.f32.mxu1 %vm409_vm0, %v1058_v5 }
 0x51a   :  { %3387 = vmatmul.mubr.msk.f32.gmra.mrb[14].mxu1 %vm409_vm0, %v3360_v4 }
 0x51b   :  { %3675 = vmatpush3.bf16.msra.mxu1 %v3672_v3  ;;  %3405 = vmatprep.mubr.msk.f32.mxu1 %vm409_vm0, %v922_v28 }
 0x51e   :  { %3406 = vmatmul.mubr.msk.f32.vlgmr.msra.gmra.mrb[8].mxu1 %vm409_vm0, %v923_v29 }
 0x51f   :  { %3408 = vmatprep.mubr.msk.f32.mxu1 %vm409_vm0, %v924_v30 }
 0x522   :  { %3409 = vmatmul.mubr.msk.f32.gmra.mrb[10].mxu1 %vm409_vm0, %v925_v32 }
 0x523   :  { %3411 = vmatprep.mubr.msk.f32.mxu1 %vm409_vm0, %v926_v36 }
 0x526   :  { %3412 = vmatmul.mubr.msk.f32.gmra.mrb[12].mxu1 %vm409_vm0, %v927_v37 }
 0x527   :  { %3414 = vmatprep.mubr.msk.f32.mxu1 %vm409_vm0, %v928_v40 }
 0x52a   :  { %3415 = vmatmul.mubr.msk.f32.gmra.mrb[14].mxu1 %vm409_vm0, %v929_v41 }
 0x5f1   :  { %v3407_v8 = vpop.f32.mrb[8].mxu1 }
 0x5f2   :  { %v1349_v9 = vadd.f32 %v3407_v8, %v3013_v7  ;;  %v1302_v10 = vpop.f32.mrb[9].mxu1 }
 0x5f3   :  { %v1348_v11 = vadd.f32 %v3013_v7, %v1302_v10 }
 0x5f4   :  { %v1357_v12 = vsel %vm409_vm0, %v1349_v9, 0.0 }
 0x5f5   :  { %v1356_v13 = vsel %vm409_vm0, %v1348_v11, 0.0  ;;  %v3410_v14 = vpop.f32.mrb[10].mxu1 }
 0x5f6   :  { %v1358_v15 = vadd.f32 %v1357_v12, %v1356_v13  ;;  %v1312_v16 = vpop.f32.mrb[11].mxu1  ;;  %v1351_v17 = vadd.f32 %v3410_v14, %v3013_v7 }
 0x5f7   :  { %v1350_v18 = vadd.f32 %v3013_v7, %v1312_v16 }
 0x5f8   :  { %v1361_v23 = vsel %vm409_vm0, %v1351_v17, 0.0 }
 0x5f9   :  { %v1359_v19 = vsel %vm409_vm0, %v1350_v18, 0.0  ;;  %v3413_v20 = vpop.f32.mrb[12].mxu1 }
 0x5fa   :  { %v1360_v21 = vadd.f32 %v1359_v19, %v1358_v15  ;;  %v1322_v22 = vpop.f32.mrb[13].mxu1  ;;  %v1353_v24 = vadd.f32 %v3413_v20, %v3013_v7 }
 0x5fb   :  { %v1352_v25 = vadd.f32 %v3013_v7, %v1322_v22  ;;  %v3014_v22 = vld [vmem:[#allocation27] ss:$0 sm:$0xff] }
 0x5fc   :  { %v1362_v26 = vadd.f32 %v1361_v23, %v1360_v21  ;;  %v1365_v31 = vsel %vm409_vm0, %v1353_v24, 0.0 }
 0x5fd   :  { %v1363_v27 = vsel %vm409_vm0, %v1352_v25, 0.0  ;;  %v3416_v28 = vpop.f32.mrb[14].mxu1 }
 0x5fe   :  { %v1364_v29 = vadd.f32 %v1363_v27, %v1362_v26  ;;  %v1332_v30 = vpop.f32.mrb[15].mxu1  ;;  %v1355_v32 = vadd.f32 %v3416_v28, %v3013_v7  ;;  %v3015_v27 = vld [vmem:[#allocation29] ss:$0 sm:$0xff] }
 0x5ff   :  { %v1354_v33 = vadd.f32 %v3013_v7, %v1332_v30 }
 0x600   :  { %v1366_v34 = vadd.f32 %v1365_v31, %v1364_v29  ;;  %v1369_v37 = vsel %vm409_vm0, %v1355_v32, 0.0 }
 0x601   :  { %v1367_v35 = vsel %vm409_vm0, %v1354_v33, 0.0 }
 0x602   :  { %v1368_v36 = vadd.f32 %v1367_v35, %v1366_v34 }
 0x604   :  { %v1370_v38 = vadd.f32 %v1369_v37, %v1368_v36 }
 0x606   :  { %v1371_v39 = vrot.slane %v1370_v38, 4 }
 0x608   :  { %v1372_v40 = vadd.f32 %v1371_v39, %v1370_v38 }
 0x60a   :  { %v1373_v41 = vrot.slane %v1372_v40, 2 }
 0x60c   :  { %v1374_v42 = vadd.f32 %v1373_v41, %v1372_v40 }
 0x60e   :  { %v1375_v43 = vrot.slane %v1374_v42, 1 }
 0x610   :  { %v1376_v44 = vadd.f32 %v1375_v43, %v1374_v42 }
 0x612   :  { %v1377_v45 = vmul.f32 0.015625, %v1376_v44 }
 0x614   :  { %v1378_v46 = vsub.f32 %v1348_v11, %v1377_v45  ;;  %v1379_v47 = vsub.f32 %v1349_v9, %v1377_v45  ;;  %v1380_v48 = vsub.f32 %v1350_v18, %v1377_v45  ;;  %v1381_v49 = vsub.f32 %v1351_v17, %v1377_v45 }
 0x615   :  { %v1382_v50 = vsub.f32 %v1352_v25, %v1377_v45  ;;  %v1383_v51 = vsub.f32 %v1353_v24, %v1377_v45  ;;  %v1384_v52 = vsub.f32 %v1354_v33, %v1377_v45  ;;  %v1385_v53 = vsub.f32 %v1355_v32, %v1377_v45 }
 0x616   :  { %v1386_v54 = vmul.f32 %v1378_v46, %v1378_v46  ;;  %v1387_v55 = vmul.f32 %v1379_v47, %v1379_v47  ;;  %v1388_v56 = vmul.f32 %v1380_v48, %v1380_v48  ;;  %v1389_v57 = vmul.f32 %v1381_v49, %v1381_v49 }
 0x617   :  { %v1390_v61 = vmul.f32 %v1382_v50, %v1382_v50  ;;  %v1391_v0 = vmul.f32 %v1383_v51, %v1383_v51  ;;  %v1392_v3 = vmul.f32 %v1384_v52, %v1384_v52  ;;  %v1393_v6 = vmul.f32 %v1385_v53, %v1385_v53 }
 0x618   :  { %v1394_v58 = vsel %vm409_vm0, %v1386_v54, 0.0  ;;  %v1395_v59 = vsel %vm409_vm0, %v1387_v55, 0.0  ;;  %v1397_v62 = vsel %vm409_vm0, %v1388_v56, 0.0  ;;  %v1399_v1 = vsel %vm409_vm0, %v1389_v57, 0.0 }
 0x619   :  { %v1396_v60 = vadd.f32 %v1395_v59, %v1394_v58  ;;  %v1401_v4 = vsel %vm409_vm0, %v1390_v61, 0.0  ;;  %v1403_v7 = vsel %vm409_vm0, %v1391_v0, 0.0  ;;  %v1405_v9 = vsel %vm409_vm0, %v1392_v3, 0.0  ;;  %v1609_v59 = vld [vmem:[#allocation21] sm:$0xff]  ;;  %v1612_v0 = vld [vmem:[#allocation21 + $0x18] sm:$0xff] }
 0x61a   :  { %v1407_v11 = vsel %vm409_vm0, %v1393_v6, 0.0  ;;  %v1467_v6 = vld [vmem:[#allocation8 + $0x18] sm:$0xff] }
 0x61b   :  { %v1398_v63 = vadd.f32 %v1397_v62, %v1396_v60  ;;  %v1610_v60 = vld [vmem:[#allocation21 + $0x8] sm:$0xff] }
 0x61c   :  { %v3692_v62 = vpack.c.bf16 %v1610_v60, %v1609_v59 }
 0x61d   :  { %v1400_v2 = vadd.f32 %v1399_v1, %v1398_v63  ;;  %v1611_v63 = vld [vmem:[#allocation21 + $0x10] sm:$0xff]  ;;  %v1465_v1 = vld [vmem:[#allocation8 + $0x8] sm:$0xff] }
 0x61e   :  { %v3696_v3 = vpack.c.bf16 %v1612_v0, %v1611_v63 }
 0x61f   :  { %v1402_v5 = vadd.f32 %v1401_v4, %v1400_v2  ;;  %v1466_v2 = vld [vmem:[#allocation8 + $0x10] sm:$0xff]  ;;  %v1613_v4 = vld [vmem:[#allocation21 + $0x20] sm:$0xff] }
 0x621   :  { %v1404_v8 = vadd.f32 %v1403_v7, %v1402_v5  ;;  %v1614_v5 = vld [vmem:[#allocation21 + $0x28] sm:$0xff]  ;;  %v1468_v7 = vld [vmem:[#allocation8 + $0x20] sm:$0xff] }
 0x623   :  { %v1406_v10 = vadd.f32 %v1405_v9, %v1404_v8  ;;  %v3700_v8 = vpack.c.bf16 %v1614_v5, %v1613_v4  ;;  %v1615_v9 = vld [vmem:[#allocation21 + $0x30] sm:$0xff] }
 0x625   :  { %v1408_v12 = vadd.f32 %v1407_v11, %v1406_v10  ;;  %v1616_v10 = vld [vmem:[#allocation21 + $0x38] sm:$0xff]  ;;  %v1469_v11 = vld [vmem:[#allocation8 + $0x28] sm:$0xff] }
 0x627   :  { %v1409_v13 = vrot.slane %v1408_v12, 4 }
 0x629   :  { %v1410_v14 = vadd.f32 %v1409_v13, %v1408_v12  ;;  %v1470_v12 = vld [vmem:[#allocation8 + $0x30] sm:$0xff]  ;;  %v3704_v13 = vpack.c.bf16 %v1616_v10, %v1615_v9 }
 0x62b   :  { %v1411_v15 = vrot.slane %v1410_v14, 2 }
 0x62d   :  { %v1412_v16 = vadd.f32 %v1411_v15, %v1410_v14  ;;  %v1471_v14 = vld [vmem:[#allocation8 + $0x38] sm:$0xff]  ;;  %v1601_v15 = vld [vmem:[#allocation20] sm:$0xff] }
 0x62f   :  { %v1413_v17 = vrot.slane %v1412_v16, 1 }
 0x631   :  { %v1414_v18 = vadd.f32 %v1413_v17, %v1412_v16  ;;  %v1602_v16 = vld [vmem:[#allocation20 + $0x8] sm:$0xff] }
 0x632   :  { %v3708_v17 = vpack.c.bf16 %v1602_v16, %v1601_v15 }
 0x633   :  { %v1415_v19 = vmul.f32 0.015625, %v1414_v18  ;;  %v2510_v18 = vld [vmem:[#allocation39] sm:$0xff] }
 0x635   :  { %v1416_v20 = vadd.f32 1e-05, %v1415_v19  ;;  %v2512_v19 = vld [vmem:[#allocation39 + $0x10] sm:$0xff] }
 0x637   :  { %3843 = vrsqrt.f32 %v1416_v20  ;;  %v4541_v20 = vmov 0  }
 0x638   :  { %3839 = vset.pattern.permute.xlu0 %v4541_v20  ;;  %3840 = vset.pattern.permute.xlu1 %v4541_v20 }
 0x639   :  { %2515 = vperm.xlu0 %3839, %v2510_v18   ;;  %2521 = vperm.xlu1 %3840, %v2512_v19  }
 0x641   :  { %v3844_v21 = vpop.eup %3843 }
 0x642   :  { %v1424_v23 = vmul.f32 %v3844_v21, %v1384_v52  ;;  %v1418_v24 = vmul.f32 %v3844_v21, %v1378_v46  ;;  %v1419_v25 = vmul.f32 %v3844_v21, %v1379_v47  ;;  %v1420_v26 = vmul.f32 %v3844_v21, %v1380_v48 }
 0x643   :  { %v1421_v28 = vmul.f32 %v3844_v21, %v1381_v49  ;;  %v1422_v29 = vmul.f32 %v3844_v21, %v1382_v50  ;;  %v1423_v30 = vmul.f32 %v3844_v21, %v1383_v51  ;;  %v1425_v31 = vmul.f32 %v3844_v21, %v1385_v53  ;;  %v2511_v21 = vld [vmem:[#allocation39 + $0x8] sm:$0xff] }
 0x644   :  { %v1433_v32 = vmul.f32 %v3014_v22, %v1418_v24  ;;  %v1434_v33 = vmul.f32 %v3014_v22, %v1419_v25  ;;  %v1435_v34 = vmul.f32 %v3014_v22, %v1420_v26  ;;  %v1439_v41 = vmul.f32 %v3014_v22, %v1424_v23  ;;  %2518 = vperm.xlu0 %3839, %v2511_v21   ;;  %v1603_v23 = vld [vmem:[#allocation20 + $0x10] sm:$0xff]  ;;  %v1604_v24 = vld [vmem:[#allocation20 + $0x18] sm:$0xff] }
 0x645   :  { %v1436_v35 = vmul.f32 %v3014_v22, %v1421_v28  ;;  %v1437_v36 = vmul.f32 %v3014_v22, %v1422_v29  ;;  %v1438_v37 = vmul.f32 %v3014_v22, %v1423_v30  ;;  %v1440_v44 = vmul.f32 %v3014_v22, %v1425_v31  ;;  %v2513_v22 = vld [vmem:[#allocation39 + $0x18] sm:$0xff] }
 0x646   :  { %v5242_v38 = vadd.f32 %v3015_v27, %v1433_v32  ;;  %v5244_v39 = vadd.f32 %v3015_v27, %v1434_v33  ;;  %v5246_v40 = vadd.f32 %v3015_v27, %v1435_v34  ;;  %v5262_v51 = vadd.f32 %v3015_v27, %v1439_v41  ;;  %2524 = vperm.xlu1 %3840, %v2513_v22   ;;  %v1605_v28 = vld [vmem:[#allocation20 + $0x20] sm:$0xff]  ;;  %v1606_v29 = vld [vmem:[#allocation20 + $0x28] sm:$0xff]  ;;  %v1607_v33 = vld [vmem:[#allocation20 + $0x30] sm:$0xff] }
 0x647   :  { %v5248_v42 = vadd.f32 %v3015_v27, %v1436_v35  ;;  %v5250_v43 = vadd.f32 %v3015_v27, %v1437_v36  ;;  %v5255_v48 = vadd.f32 %v3015_v27, %v1438_v37  ;;  %v5270_v55 = vadd.f32 %v3015_v27, %v1440_v44  ;;  %v1608_v34 = vld [vmem:[#allocation20 + $0x38] sm:$0xff] }
 0x648   :  { %v1456_v45 = vmax.f32 %v5242_v38, 0.0  ;;  %v1457_v46 = vmax.f32 %v5244_v39, 0.0  ;;  %v1458_v47 = vmax.f32 %v5246_v40, 0.0  ;;  %v1462_v57 = vmax.f32 %v5262_v51, 0.0  ;;  %v3040_v51 = vld [vmem:[#allocation23] ss:$0 sm:$0xff] }
 0x649   :  { %v1459_v49 = vmax.f32 %v5248_v42, 0.0  ;;  %v1460_v53 = vmax.f32 %v5250_v43, 0.0  ;;  %v1461_v54 = vmax.f32 %v5255_v48, 0.0  ;;  %v1463_v58 = vmax.f32 %v5270_v55, 0.0 }
 0x64a   :  { %v3676_v50 = vpack.c.bf16 %v1457_v46, %v1456_v45  ;;  %v3712_v27 = vpack.c.bf16 %v1604_v24, %v1603_v23  ;;  %v3716_v32 = vpack.c.bf16 %v1606_v29, %v1605_v28  ;;  %v3720_v37 = vpack.c.bf16 %v1608_v34, %v1607_v33  ;;  %v1919_v33 = vld [vmem:[#allocation30 + $0x8] sm:$0xff]  ;;  %v1918_v34 = vld [vmem:[#allocation30] sm:$0xff] }
 0x64b   :  { %v3680_v52 = vpack.c.bf16 %v1459_v49, %v1458_v47  ;;  %v3684_v56 = vpack.c.bf16 %v1461_v54, %v1460_v53  ;;  %v3688_v61 = vpack.c.bf16 %v1463_v58, %v1462_v57  ;;  %v2508_v38 = vlaneseq }
 0x64c   :  { %3677 = vmatprep.subr.bf16.mxu0 %v3676_v50 }
 0x64d   :  { %3679 = vmatpush3.bf16.msra.mxu0 %v3676_v50  ;;  %v2509_v40 = vand.u32 127, %v2508_v38 }
 0x64e   :  { %3681 = vmatprep.subr.bf16.mxu0 %v3680_v52 }
 0x651   :  { %3683 = vmatpush3.bf16.msra.mxu0 %v3680_v52 }
 0x652   :  { %3685 = vmatprep.subr.bf16.mxu0 %v3684_v56 }
 0x655   :  { %3687 = vmatpush3.bf16.msra.mxu0 %v3684_v56 }
 0x656   :  { %3689 = vmatprep.subr.bf16.mxu0 %v3688_v61 }
 0x659   :  { %3691 = vmatpush3.bf16.msra.mxu0 %v3688_v61 }
 0x65a   :  { %3693 = vmatprep.subr.bf16.mxu0 %v3692_v62 }
 0x65c   :  { %3434 = vmatmul.mubr.msk.f32.vlgmr.msra.gmra.mrb[16].mxu0 %vm409_vm0, %v1465_v1 }
 0x65d   :  { %3436 = vmatprep.mubr.msk.f32.mxu0 %vm409_vm0, %v1466_v2  ;;  %3695 = vmatpush3.bf16.msra.mxu0 %v3692_v62 }
 0x65e   :  { %3697 = vmatprep.subr.bf16.mxu0 %v3696_v3 }
 0x660   :  { %3437 = vmatmul.mubr.msk.f32.gmra.mrb[18].mxu0 %vm409_vm0, %v1467_v6 }
 0x661   :  { %3439 = vmatprep.mubr.msk.f32.mxu0 %vm409_vm0, %v1468_v7  ;;  %3699 = vmatpush3.bf16.msra.mxu0 %v3696_v3 }
 0x662   :  { %3701 = vmatprep.subr.bf16.mxu0 %v3700_v8 }
 0x664   :  { %3440 = vmatmul.mubr.msk.f32.gmra.mrb[20].mxu0 %vm409_vm0, %v1469_v11 }
 0x665   :  { %3442 = vmatprep.mubr.msk.f32.mxu0 %vm409_vm0, %v1470_v12  ;;  %3703 = vmatpush3.bf16.msra.mxu0 %v3700_v8 }
 0x666   :  { %3705 = vmatprep.subr.bf16.mxu0 %v3704_v13 }
 0x668   :  { %3443 = vmatmul.mubr.msk.f32.gmra.mrb[22].mxu0 %vm409_vm0, %v1471_v14 }
 0x669   :  { %3707 = vmatpush3.bf16.msra.mxu0 %v3704_v13 }
 0x66a   :  { %3709 = vmatprep.subr.bf16.mxu0 %v3708_v17 }
 0x6b8   :  { %v2516_v39 = vpop.permute.xlu0 %2515  ;;  %v2522_v42 = vpop.permute.xlu1 %2521 }
 0x6b9   :  { %vm2526_vm2 = vcmp.eq.s32.totalorder %v2509_v40, %v2516_v39  ;;  %vm2528_vm4 = vcmp.eq.s32.totalorder %v2509_v40, %v2522_v42 }
 0x6c3   :  { %v2519_v43 = vpop.permute.xlu0 %2518 }
 0x6c4   :  { %vm2527_vm3 = vcmp.eq.s32.totalorder %v2509_v40, %v2519_v43 }
 0x6c5   :  { %v2525_v48 = vpop.permute.xlu1 %2524 }
 0x6c6   :  { %vm2529_vm5 = vcmp.eq.s32.totalorder %v2509_v40, %v2525_v48  ;;  %v1921_v40 = vld [vmem:[#allocation30 + $0x18] sm:$0xff] }
 0x72f   :  { %v3435_v25 = vpop.f32.mrb[16].mxu0 }
 0x730   :  { %v1562_v26 = vpop.f32.mrb[17].mxu0 }
 0x731   :  { %3461 = vmatprep.mubr.msk.f32.mxu0 %vm409_vm0, %v1562_v26 }
 0x732   :  { %3462 = vmatmul.mubr.msk.f32.vlgmr.msra.gmra.mrb[24].mxu0 %vm409_vm0, %v3435_v25 }
 0x733   :  { %v3438_v30 = vpop.f32.mrb[18].mxu0  ;;  %3711 = vmatpush3.bf16.msra.mxu0 %v3708_v17 }
 0x734   :  { %v1572_v31 = vpop.f32.mrb[19].mxu0  ;;  %3713 = vmatprep.subr.bf16.mxu0 %v3712_v27 }
 0x735   :  { %3464 = vmatprep.mubr.msk.f32.mxu0 %vm409_vm0, %v1572_v31 }
 0x736   :  { %3465 = vmatmul.mubr.msk.f32.gmra.mrb[26].mxu0 %vm409_vm0, %v3438_v30 }
 0x737   :  { %v3441_v35 = vpop.f32.mrb[20].mxu0  ;;  %3715 = vmatpush3.bf16.msra.mxu0 %v3712_v27 }
 0x738   :  { %v1582_v36 = vpop.f32.mrb[21].mxu0  ;;  %3717 = vmatprep.subr.bf16.mxu0 %v3716_v32 }
 0x739   :  { %3467 = vmatprep.mubr.msk.f32.mxu0 %vm409_vm0, %v1582_v36  ;;  %v1920_v36 = vld [vmem:[#allocation30 + $0x10] sm:$0xff] }
 0x73a   :  { %3468 = vmatmul.mubr.msk.f32.gmra.mrb[28].mxu0 %vm409_vm0, %v3441_v35 }
 0x73b   :  { %v3444_v41 = vpop.f32.mrb[22].mxu0  ;;  %3719 = vmatpush3.bf16.msra.mxu0 %v3716_v32 }
 0x73c   :  { %v1592_v44 = vpop.f32.mrb[23].mxu0  ;;  %3721 = vmatprep.subr.bf16.mxu0 %v3720_v37 }
 0x73d   :  { %3470 = vmatprep.mubr.msk.f32.mxu0 %vm409_vm0, %v1592_v44 }
 0x73e   :  { %3471 = vmatmul.mubr.msk.f32.gmra.mrb[30].mxu0 %vm409_vm0, %v3444_v41 }
 0x73f   :  { %3723 = vmatpush3.bf16.msra.mxu0 %v3720_v37  ;;  %3489 = vmatprep.mubr.msk.f32.mxu0 %vm409_vm0, %v1456_v45  ;;  %v4542_v45 = vmov 0.0  }
 0x740   :  { %v3061_v50 = vsel %vm2529_vm5, 1.0, %v4542_v45 }
 0x742   :  { %3490 = vmatmul.mubr.msk.f32.vlgmr.msra.gmra.mrb[24].mxu0 %vm409_vm0, %v1457_v46  ;;  %v3058_v46 = vsel %vm2526_vm2, 1.0, %v4542_v45 }
 0x743   :  { %3492 = vmatprep.mubr.msk.f32.mxu0 %vm409_vm0, %v1458_v47  ;;  %v3059_v47 = vsel %vm2527_vm3, 1.0, %v4542_v45 }
 0x746   :  { %3493 = vmatmul.mubr.msk.f32.gmra.mrb[26].mxu0 %vm409_vm0, %v1459_v49  ;;  %v3060_v49 = vsel %vm2528_vm4, 1.0, %v4542_v45 }
 0x747   :  { %3495 = vmatprep.mubr.msk.f32.mxu0 %vm409_vm0, %v1460_v53 }
 0x74a   :  { %3496 = vmatmul.mubr.msk.f32.gmra.mrb[28].mxu0 %vm409_vm0, %v1461_v54 }
 0x74b   :  { %3498 = vmatprep.mubr.msk.f32.mxu0 %vm409_vm0, %v1462_v57 }
 0x74e   :  { %3499 = vmatmul.mubr.msk.f32.gmra.mrb[30].mxu0 %vm409_vm0, %v1463_v58 }
 0x74f   :  { %3557 = vmatprep.mubr.msk.f32.mxu0 %vm409_vm0, %v3058_v46  ;;  %v2637_v46 = vld [vmem:[#allocation32] sm:$0xff] }
 0x815   :  { %v3491_v52 = vpop.f32.mrb[24].mxu0 }
 0x816   :  { %v5322_v53 = vadd.f32 %v3491_v52, %v3040_v51  ;;  %v1836_v54 = vpop.f32.mrb[25].mxu0 }
 0x817   :  { %v5324_v55 = vadd.f32 %v3040_v51, %v1836_v54 }
 0x818   :  { %v1891_v56 = vsel %vm547_vm1, %v5322_v53, 0.0 }
 0x819   :  { %v1890_v57 = vsel %vm547_vm1, %v5324_v55, 0.0  ;;  %v3494_v58 = vpop.f32.mrb[26].mxu0  ;;  %3509 = vmatprep.mubr.msk.f32.mxu1 %vm547_vm1, %v5324_v55  ;;  %v3740_v59 = vpack.c.bf16 %v5322_v53, %v5324_v55 }
 0x81a   :  { %v5334_v60 = vadd.f32 %v3494_v58, %v3040_v51  ;;  %v1846_v61 = vpop.f32.mrb[27].mxu0  ;;  %v1892_v63 = vadd.f32 %v1891_v56, %v1890_v57 }
 0x81b   :  { %v5336_v62 = vadd.f32 %v3040_v51, %v1846_v61  ;;  %3741 = vmatprep.subr.bf16.mxu0 %v3740_v59 }
 0x81c   :  { %3743 = vmatpush3.bf16.msra.mxu0 %v3740_v59  ;;  %v1895_v6 = vsel %vm547_vm1, %v5334_v60, 0.0 }
 0x81d   :  { %v1893_v0 = vsel %vm547_vm1, %v5336_v62, 0.0  ;;  %v3497_v1 = vpop.f32.mrb[28].mxu0  ;;  %v3744_v2 = vpack.c.bf16 %v5334_v60, %v5336_v62 }
 0x81e   :  { %v1894_v3 = vadd.f32 %v1893_v0, %v1892_v63  ;;  %v5342_v4 = vadd.f32 %v3497_v1, %v3040_v51  ;;  %v1856_v5 = vpop.f32.mrb[29].mxu0 }
 0x81f   :  { %v5346_v7 = vadd.f32 %v3040_v51, %v1856_v5  ;;  %3745 = vmatprep.subr.bf16.mxu0 %v3744_v2 }
 0x820   :  { %v1896_v8 = vadd.f32 %v1895_v6, %v1894_v3  ;;  %3747 = vmatpush3.bf16.msra.mxu0 %v3744_v2  ;;  %v1899_v15 = vsel %vm547_vm1, %v5342_v4, 0.0 }
 0x821   :  { %v1897_v9 = vsel %vm547_vm1, %v5346_v7, 0.0  ;;  %v3500_v10 = vpop.f32.mrb[30].mxu0  ;;  %v3748_v11 = vpack.c.bf16 %v5342_v4, %v5346_v7 }
 0x822   :  { %v1898_v12 = vadd.f32 %v1897_v9, %v1896_v8  ;;  %v5352_v13 = vadd.f32 %v3500_v10, %v3040_v51  ;;  %v1866_v14 = vpop.f32.mrb[31].mxu0  ;;  %v2731_v8 = vld [vmem:[#allocation35] sm:$0xff]  ;;  %v2732_v9 = vld [vmem:[#allocation35 + $0x8] sm:$0xff] }
 0x823   :  { %v5356_v16 = vadd.f32 %v3040_v51, %v1866_v14  ;;  %3749 = vmatprep.subr.bf16.mxu0 %v3748_v11  ;;  %v3764_v10 = vpack.c.bf16 %v2732_v9, %v2731_v8 }
 0x824   :  { %v1900_v17 = vadd.f32 %v1899_v15, %v1898_v12  ;;  %3751 = vmatpush3.bf16.msra.mxu0 %v3748_v11  ;;  %v1903_v21 = vsel %vm547_vm1, %v5352_v13, 0.0  ;;  %v2733_v11 = vld [vmem:[#allocation35 + $0x10] sm:$0xff]  ;;  %v2734_v12 = vld [vmem:[#allocation35 + $0x18] sm:$0xff] }
 0x825   :  { %v1901_v18 = vsel %vm547_vm1, %v5356_v16, 0.0  ;;  %v3752_v19 = vpack.c.bf16 %v5352_v13, %v5356_v16 }
 0x826   :  { %v1902_v20 = vadd.f32 %v1901_v18, %v1900_v17 }
 0x827   :  { %3753 = vmatprep.subr.bf16.mxu0 %v3752_v19 }
 0x828   :  { %v1904_v22 = vadd.f32 %v1903_v21, %v1902_v20  ;;  %3755 = vmatpush3.bf16.msra.mxu0 %v3752_v19 }
 0x82a   :  { %v1905_v23 = vrot.slane %v1904_v22, 4 }
 0x82b   :  { %3558 = vmatmul.mubr.msk.f32.vlgmr.msra.gmra.mrb[32].mxu0 %vm409_vm0, %v3059_v47  ;;  %v2638_v47 = vld [vmem:[#allocation32 + $0x8] sm:$0xff] }
 0x82c   :  { %v1906_v24 = vadd.f32 %v1905_v23, %v1904_v22  ;;  %3560 = vmatprep.mubr.msk.f32.mxu0 %vm409_vm0, %v3060_v49  ;;  %v3756_v48 = vpack.c.bf16 %v2638_v47, %v2637_v46  ;;  %v2639_v49 = vld [vmem:[#allocation32 + $0x10] sm:$0xff] }
 0x82e   :  { %v1907_v25 = vrot.slane %v1906_v24, 2  ;;  %3757 = vmatprep.subr.bf16.mxu0 %v3756_v48 }
 0x82f   :  { %3561 = vmatmul.mubr.msk.f32.gmra.mrb[34].mxu0 %vm409_vm0, %v3061_v50  ;;  %v2640_v50 = vld [vmem:[#allocation32 + $0x18] sm:$0xff] }
 0x830   :  { %v1908_v26 = vadd.f32 %v1907_v25, %v1906_v24  ;;  %3759 = vmatpush3.bf16.msra.mxu0 %v3756_v48  ;;  %v3760_v51 = vpack.c.bf16 %v2640_v50, %v2639_v49 }
 0x832   :  { %v1909_v27 = vrot.slane %v1908_v26, 1  ;;  %3761 = vmatprep.subr.bf16.mxu0 %v3760_v51 }
 0x834   :  { %v1910_v28 = vadd.f32 %v1909_v27, %v1908_v26  ;;  %3763 = vmatpush3.bf16.msra.mxu0 %v3760_v51 }
 0x836   :  { %v3041_v29 = vmul.f32 -0.015625, %v1910_v28 }
 0x838   :  { %v1913_v30 = vmul.f32 1.442695, %v3041_v29 }
 0x83a   :  { %3845 = vpow2.f32 %v1913_v30 }
 0x844   :  { %v3846_v31 = vpop.eup %3845 }
 0x845   :  { %v1915_v32 = vadd.f32 1.0, %v3846_v31 }
 0x847   :  { %3847 = vrcp.f32 %v1915_v32 }
 0x851   :  { %v3848_v35 = vpop.eup %3847 }
 0x852   :  { %v1923_v37 = vmul.f32 %v3848_v35, %v1919_v33  ;;  %v1922_v41 = vmul.f32 %v3848_v35, %v1918_v34  ;;  %v1924_v39 = vmul.f32 %v3848_v35, %v1920_v36  ;;  %v1925_v43 = vmul.f32 %v3848_v35, %v1921_v40 }
 0x854   :  { %v1929_v44 = vsel %vm547_vm1, %v1923_v37, 0.0  ;;  %v1926_v38 = vsel %vm547_vm1, %v1922_v41, 0.0  ;;  %v1932_v42 = vsel %vm547_vm1, %v1924_v39, 0.0  ;;  %v1935_v45 = vsel %vm547_vm1, %v1925_v43, 0.0 }
 0x855   :  { %1930 = vadd.xlane.f32.xlu1 %v1929_v44  ;;  %1927 = vadd.xlane.f32.xlu0 %v1926_v38 }
 0x859   :  { %1933 = vadd.xlane.f32.xlu0 %v1932_v42 }
 0x85d   :  { %1936 = vadd.xlane.f32.xlu0 %v1935_v45 }
 0x866   :  { %2067 = vrot.lane.b32.xlu1 %v5324_v55, %s4543_s24 }
 0x86a   :  { %2071 = vrot.lane.b32.xlu1 %v5336_v62, %s4543_s24 }
 0x86e   :  { %2073 = vrot.lane.b32.xlu1 %v5334_v60, %s4543_s24 }
 0x872   :  { %2077 = vrot.lane.b32.xlu1 %v5342_v4, %s4543_s24 }
 0x873   :  { %2069 = vrot.lane.b32.xlu0 %v5322_v53, %s4543_s24 }
 0x876   :  { %2081 = vrot.lane.b32.xlu1 %v5352_v13, %s4543_s24 }
 0x877   :  { %2075 = vrot.lane.b32.xlu0 %v5346_v7, %s4543_s24 }
 0x87b   :  { %2079 = vrot.lane.b32.xlu0 %v5356_v16, %s4543_s24 }
 0x8e2   :  { %v1931_v52 = vpop.xlane.xlu1 %1930  ;;  %v1928_v54 = vpop.xlane.xlu0 %1927 }
 0x8e3   :  { %v3724_v55 = vpack.c.bf16 %v1931_v52, %v1928_v54 }
 0x8e5   :  { %3725 = vmatprep.subr.bf16.mxu1 %v3724_v55 }
 0x8e6   :  { %3727 = vmatpush3.bf16.msra.mxu1 %v3724_v55  ;;  %v1934_v56 = vpop.xlane.xlu0 %1933  ;;  %v2068_v59 = vpop.permute.xlu1 %2067 }
 0x8ea   :  { %v1937_v57 = vpop.xlane.xlu0 %1936  ;;  %v2072_v61 = vpop.permute.xlu1 %2071 }
 0x8eb   :  { %v3728_v58 = vpack.c.bf16 %v1937_v57, %v1934_v56 }
 0x8ed   :  { %3729 = vmatprep.subr.bf16.mxu1 %v3728_v58 }
 0x8ee   :  { %3731 = vmatpush3.bf16.msra.mxu1 %v3728_v58 }
 0x8ef   :  { %3733 = vmatprep.subr.bf16.mxu1 %v3724_v55 }
 0x8f1   :  { %3510 = vmatmul.mubr.msk.f32.vlgmr.msra.gmra.mrb[16].mxu1 %vm547_vm1, %v5322_v53  ;;  %v2070_v53 = vpop.permute.xlu0 %2069 }
 0x8f2   :  { %3512 = vmatprep.mubr.msk.f32.mxu1 %vm547_vm1, %v5336_v62  ;;  %3735 = vmatpush3.bf16.msra.mxu1 %v3724_v55 }
 0x8f3   :  { %3737 = vmatprep.subr.bf16.mxu1 %v3728_v58 }
 0x8f5   :  { %3513 = vmatmul.mubr.msk.f32.gmra.mrb[18].mxu1 %vm547_vm1, %v5334_v60  ;;  %v2074_v60 = vpop.permute.xlu1 %2073  ;;  %v2076_v1 = vpop.permute.xlu0 %2075 }
 0x8f6   :  { %3515 = vmatprep.mubr.msk.f32.mxu1 %vm547_vm1, %v5346_v7  ;;  %3739 = vmatpush3.bf16.msra.mxu1 %v3728_v58 }
 0x8f7   :  { %3765 = vmatprep.subr.bf16.mxu1 %v3764_v10 }
 0x8f9   :  { %3516 = vmatmul.mubr.msk.f32.gmra.mrb[20].mxu1 %vm547_vm1, %v5342_v4  ;;  %v2078_v5 = vpop.permute.xlu1 %2077  ;;  %v2080_v6 = vpop.permute.xlu0 %2079 }
 0x8fa   :  { %3518 = vmatprep.mubr.msk.f32.mxu1 %vm547_vm1, %v5356_v16 }
 0x8fd   :  { %3519 = vmatmul.mubr.msk.f32.gmra.mrb[22].mxu1 %vm547_vm1, %v5352_v13  ;;  %v2082_v7 = vpop.permute.xlu1 %2081  ;;  %v3768_v13 = vpack.c.bf16 %v2734_v12, %v2733_v11 }
 0x8fe   :  { %3529 = vmatprep.mubr.msk.f32.mxu1 %vm547_vm1, %v2068_v59  ;;  %v3559_v62 = vpop.f32.mrb[32].mxu0 }
 0x8ff   :  { %v2616_v63 = vpop.f32.mrb[33].mxu0 }
 0x901   :  { %3530 = vmatmul.mubr.msk.f32.vlgmr.msra.gmra.mrb[24].mxu1 %vm547_vm1, %v2070_v53 }
 0x902   :  { %3532 = vmatprep.mubr.msk.f32.mxu1 %vm547_vm1, %v2072_v61  ;;  %v3562_v0 = vpop.f32.mrb[34].mxu0  ;;  %3767 = vmatpush3.bf16.msra.mxu1 %v3764_v10 }
 0x903   :  { %v2636_v2 = vmul.f32 %v3562_v0, %v3559_v62  ;;  %v2626_v3 = vpop.f32.mrb[35].mxu0  ;;  %3769 = vmatprep.subr.bf16.mxu1 %v3768_v13 }
 0x904   :  { %v2635_v4 = vmul.f32 %v2626_v3, %v2616_v63 }
 0x905   :  { %3533 = vmatmul.mubr.msk.f32.gmra.mrb[26].mxu1 %vm547_vm1, %v2074_v60 }
 0x906   :  { %3535 = vmatprep.mubr.msk.f32.mxu1 %vm547_vm1, %v2076_v1  ;;  %3571 = vmatprep.mubr.msk.f32.mxu0 %vm547_vm1, %v2635_v4 }
 0x907   :  { %3572 = vmatmul.mubr.msk.f32.vlgmr.msra.gmra.mrb[36].mxu0 %vm547_vm1, %v2636_v2  ;;  %3771 = vmatpush3.bf16.msra.mxu1 %v3768_v13 }
 0x909   :  { %3536 = vmatmul.mubr.msk.f32.gmra.mrb[28].mxu1 %vm547_vm1, %v2078_v5 }
 0x90a   :  { %3538 = vmatprep.mubr.msk.f32.mxu1 %vm547_vm1, %v2080_v6 }
 0x90d   :  { %3539 = vmatmul.mubr.msk.f32.gmra.mrb[30].mxu1 %vm547_vm1, %v2082_v7 }
 0x9c4   :  { %v3511_v14 = vpop.f32.mrb[16].mxu1 }
 0x9c5   :  { %v2205_v15 = vsub.f32 0.0, %v3511_v14  ;;  %v2028_v16 = vpop.f32.mrb[17].mxu1 }
 0x9c6   :  { %v2204_v17 = vsub.f32 0.0, %v2028_v16 }
 0x9c7   :  { %v2221_v18 = vand.u32 2147483647, %v2205_v15  ;;  %v5412_v52 = vmax.f32 %v2205_v15, 0.0 }
 0x9c8   :  { %v2220_v19 = vand.u32 2147483647, %v2204_v17  ;;  %v3514_v20 = vpop.f32.mrb[18].mxu1  ;;  %v5414_v57 = vmax.f32 %v2204_v17, 0.0 }
 0x9c9   :  { %v2229_v21 = vsub.f32 0.0, %v2221_v18  ;;  %v2207_v22 = vsub.f32 0.0, %v3514_v20  ;;  %v2038_v23 = vpop.f32.mrb[19].mxu1 }
 0x9ca   :  { %v2228_v24 = vsub.f32 0.0, %v2220_v19  ;;  %v2206_v25 = vsub.f32 0.0, %v2038_v23 }
 0x9cb   :  { %v2238_v26 = vmul.f32 1.442695, %v2229_v21  ;;  %v2223_v27 = vand.u32 2147483647, %v2207_v22  ;;  %v5416_v58 = vmax.f32 %v2207_v22, 0.0 }
 0x9cc   :  { %v2236_v28 = vmul.f32 1.442695, %v2228_v24  ;;  %v2222_v29 = vand.u32 2147483647, %v2206_v25  ;;  %v3517_v30 = vpop.f32.mrb[20].mxu1  ;;  %v5419_v62 = vmax.f32 %v2206_v25, 0.0 }
 0x9cd   :  { %3849 = vpow2.f32 %v2238_v26  ;;  %v2231_v31 = vsub.f32 0.0, %v2223_v27  ;;  %v2209_v32 = vsub.f32 0.0, %v3517_v30  ;;  %v2048_v33 = vpop.f32.mrb[21].mxu1 }
 0x9ce   :  { %3851 = vpow2.f32 %v2236_v28  ;;  %v2230_v34 = vsub.f32 0.0, %v2222_v29  ;;  %v2208_v35 = vsub.f32 0.0, %v2048_v33 }
 0x9cf   :  { %v2242_v36 = vmul.f32 1.442695, %v2231_v31  ;;  %v2225_v37 = vand.u32 2147483647, %v2209_v32  ;;  %v5421_v63 = vmax.f32 %v2209_v32, 0.0 }
 0x9d0   :  { %v2240_v41 = vmul.f32 1.442695, %v2230_v34  ;;  %v2224_v44 = vand.u32 2147483647, %v2208_v35  ;;  %v5403_v38 = vpop.f32.mrb[22].mxu1  ;;  %v5430_v5 = vmax.f32 %v2208_v35, 0.0 }
 0x9d1   :  { %3853 = vpow2.f32 %v2242_v36  ;;  %v2233_v39 = vsub.f32 0.0, %v2225_v37  ;;  %v2058_v40 = vpop.f32.mrb[23].mxu1  ;;  %v2211_v43 = vsub.f32 0.0, %v5403_v38 }
 0x9d2   :  { %3855 = vpow2.f32 %v2240_v41  ;;  %v2232_v42 = vsub.f32 0.0, %v2224_v44  ;;  %v2210_v46 = vsub.f32 0.0, %v2058_v40 }
 0x9d3   :  { %v2246_v45 = vmul.f32 1.442695, %v2233_v39  ;;  %v2227_v50 = vand.u32 2147483647, %v2211_v43  ;;  %v3066_v39 = vld [vmem:[#allocation33] ss:$0 sm:$0xff] }
 0x9d4   :  { %v2244_v47 = vmul.f32 1.442695, %v2232_v42  ;;  %v5406_v48 = vpop.f32.mrb[24].mxu1  ;;  %v2226_v54 = vand.u32 2147483647, %v2210_v46  ;;  %v5432_v6 = vmax.f32 %v2210_v46, 0.0 }
 0x9d5   :  { %3857 = vpow2.f32 %v2246_v45  ;;  %v5408_v49 = vpop.f32.mrb[25].mxu1  ;;  %v2368_v59 = vand.u32 2147483647, %v5406_v48  ;;  %v2235_v1 = vsub.f32 0.0, %v2227_v50  ;;  %v2360_v18 = vmax.f32 %v5406_v48, 0.0 }
 0x9d6   :  { %3859 = vpow2.f32 %v2244_v47  ;;  %v2367_v2 = vand.u32 2147483647, %v5408_v49  ;;  %v2234_v7 = vsub.f32 0.0, %v2226_v54 }
 0x9d7   :  { %v3850_v51 = vpop.eup %3849  ;;  %v2376_v12 = vsub.f32 0.0, %v2368_v59  ;;  %v2250_v21 = vmul.f32 1.442695, %v2235_v1 }
 0x9d8   :  { %v3852_v55 = vpop.eup %3851  ;;  %v2261_v56 = vadd.f32 1.0, %v3850_v51  ;;  %v2264_v61 = vmul.f32 -0.5, %v3850_v51  ;;  %v5423_v60 = vpop.f32.mrb[26].mxu1  ;;  %v2267_v10 = vand.u32 2147483647, %v3850_v51  ;;  %v2375_v22 = vsub.f32 0.0, %v2367_v2 }
 0x9d9   :  { %v2252_v53 = vadd.f32 1.0, %v3852_v55  ;;  %v2255_v0 = vmul.f32 -0.5, %v3852_v55  ;;  %v5426_v3 = vpop.f32.mrb[27].mxu1  ;;  %v2258_v16 = vand.u32 2147483647, %v3852_v55 }
 0x9da   :  { %3861 = vlog2.f32 %v2261_v56  ;;  %v3573_v8 = vpop.f32.mrb[36].mxu0  ;;  %v2265_v15 = vadd.f32 1.0, %v2264_v61  ;;  %v2248_v26 = vmul.f32 1.442695, %v2234_v7  ;;  %vm5449_vm7 = vcmp.lt.f32.partialorder %v2267_v10, 0.0004427343 }
 0x9db   :  { %v5428_v4 = vpop.eup %3853  ;;  %3863 = vlog2.f32 %v2252_v53  ;;  %v2720_v13 = vpop.f32.mrb[37].mxu0  ;;  %v2256_v20 = vadd.f32 1.0, %v2255_v0  ;;  %v2385_v30 = vmul.f32 1.442695, %v2376_v12  ;;  %vm5456_vm8 = vcmp.lt.f32.partialorder %v2258_v16, 0.0004427343 }
 0x9dc   :  { %v5434_v9 = vpop.eup %3855  ;;  %v2279_v11 = vadd.f32 1.0, %v5428_v4  ;;  %v5437_v14 = vpop.f32.mrb[28].mxu1  ;;  %v2282_v24 = vmul.f32 -0.5, %v5428_v4  ;;  %v2266_v32 = vmul.f32 %v3850_v51, %v2265_v15  ;;  %v2285_v34 = vand.u32 2147483647, %v5428_v4 }
 0x9dd   :  { %v2270_v17 = vadd.f32 1.0, %v5434_v9  ;;  %v5441_v19 = vpop.f32.mrb[29].mxu1  ;;  %v2273_v25 = vmul.f32 -0.5, %v5434_v9  ;;  %v2257_v37 = vmul.f32 %v3852_v55, %v2256_v20  ;;  %v2383_v41 = vmul.f32 1.442695, %v2375_v22 }
 0x9de   :  { %3865 = vlog2.f32 %v2279_v11  ;;  %v2370_v44 = vand.u32 2147483647, %v5423_v60  ;;  %v2283_v40 = vadd.f32 1.0, %v2282_v24  ;;  %v2276_v45 = vand.u32 2147483647, %v5434_v9 }
 0x9df   :  { %v5443_v23 = vpop.eup %3857  ;;  %3867 = vlog2.f32 %v2270_v17  ;;  %v2274_v42 = vadd.f32 1.0, %v2273_v25  ;;  %v2369_v51 = vand.u32 2147483647, %v5426_v3  ;;  %v2726_v59 = vadd.f32 %v3573_v8, %v3066_v39 }
 0x9e0   :  { %v5447_v27 = vpop.eup %3859  ;;  %v2297_v29 = vadd.f32 1.0, %v5443_v23  ;;  %v5454_v31 = vpop.f32.mrb[30].mxu1  ;;  %v2300_v47 = vmul.f32 -0.5, %v5443_v23  ;;  %v2378_v50 = vsub.f32 0.0, %v2370_v44  ;;  %v2303_v7 = vand.u32 2147483647, %v5443_v23 }
 0x9e1   :  { %v2288_v35 = vadd.f32 1.0, %v5447_v27  ;;  %v5462_v36 = vpop.f32.mrb[31].mxu1  ;;  %v2291_v55 = vmul.f32 -0.5, %v5447_v27  ;;  %v2377_v0 = vsub.f32 0.0, %v2369_v51  ;;  %v2275_v2 = vmul.f32 %v5434_v9, %v2274_v42 }
 0x9e2   :  { %3869 = vlog2.f32 %v2297_v29  ;;  %v2389_v53 = vmul.f32 1.442695, %v2378_v50  ;;  %v2721_v10 = vadd.f32 %v3066_v39, %v2720_v13  ;;  %v2730_v22 = vmax.f32 %v2726_v59, 0.0 }
 0x9e3   :  { %3871 = vlog2.f32 %v2288_v35  ;;  %v2387_v8 = vmul.f32 1.442695, %v2377_v0  ;;  %v2292_v20 = vadd.f32 1.0, %v2291_v55  ;;  %vm2277_vm9 = vcmp.lt.f32.partialorder %v2276_v45, 0.0004427343 }
 0x9e4   :  { %v3862_v46 = vpop.eup %3861  ;;  %3873 = vpow2.f32 %v2248_v26  ;;  %v2729_v24 = vmax.f32 %v2721_v10, 0.0  ;;  %vm5483_vm10 = vcmp.lt.f32.partialorder %v2285_v34, 0.0004427343  ;;  %vm5488_vm11 = vcmp.lt.f32.partialorder %v2303_v7, 0.0004427343 }
 0x9e5   :  { %v3864_v54 = vpop.eup %3863  ;;  %v2263_v56 = vmul.f32 0.6931472, %v3862_v46  ;;  %3875 = vpow2.f32 %v2385_v30  ;;  %v2293_v42 = vmul.f32 %v5447_v27, %v2292_v20  ;;  %v2371_v55 = vand.u32 2147483647, %v5441_v19 }
 0x9e6   :  { %v2254_v61 = vmul.f32 0.6931472, %v3864_v54  ;;  %3877 = vpow2.f32 %v2383_v41  ;;  %3582 = vmatprep.mubr.msk.f32.mxu1 %vm547_vm1, %v2729_v24 }
 0x9e7   :  { %v2269_v1 = vsel %vm5449_vm7, %v2266_v32, %v2263_v56  ;;  %3879 = vpow2.f32 %v2389_v53  ;;  %v2301_v32 = vadd.f32 1.0, %v2300_v47  ;;  %3583 = vmatmul.mubr.msk.f32.vlgmr.msra.gmra.mrb[32].mxu1 %vm547_vm1, %v2730_v22 }
 0x9e8   :  { %v3866_v11 = vpop.eup %3865  ;;  %v2325_v12 = vadd.f32 %v2269_v1, %v5412_v52  ;;  %v2260_v15 = vsel %vm5456_vm8, %v2257_v37, %v2254_v61  ;;  %3881 = vpow2.f32 %v2387_v8  ;;  %v2294_v52 = vand.u32 2147483647, %v5447_v27 }
 0x9e9   :  { %v3868_v16 = vpop.eup %3867  ;;  %v2324_v17 = vadd.f32 %v2260_v15, %v5414_v57  ;;  %v2281_v9 = vmul.f32 0.6931472, %v3866_v11  ;;  %3883 = vpow2.f32 %v2250_v21  ;;  %v2284_v57 = vmul.f32 %v5428_v4, %v2283_v40 }
 0x9ea   :  { %v2334_v25 = vsel %vm2332_vm6, %v2325_v12, 0.0  ;;  %v2272_v26 = vmul.f32 0.6931472, %v3868_v16  ;;  %v2372_v21 = vand.u32 2147483647, %v5437_v14  ;;  %v2302_v54 = vmul.f32 %v5443_v23, %v2301_v32 }
 0x9eb   :  { %v2333_v13 = vsel %vm2332_vm6, %v2324_v17, 0.0  ;;  %v2287_v4 = vsel %vm5483_vm10, %v2284_v57, %v2281_v9  ;;  %vm5497_vm12 = vcmp.lt.f32.partialorder %v2294_v52, 0.0004427343  ;;  %v2362_v15 = vmax.f32 %v5423_v60, 0.0 }
 0x9ec   :  { %v3870_v28 = vpop.eup %3869  ;;  %v2335_v29 = vadd.f32 %v2334_v25, %v2333_v13  ;;  %v2278_v30 = vsel %vm2277_vm9, %v2275_v2, %v2272_v26  ;;  %v2327_v27 = vadd.f32 %v2287_v4, %v5416_v58  ;;  %v2380_v61 = vsub.f32 0.0, %v2372_v21 }
 0x9ed   :  { %v3872_v33 = vpop.eup %3871  ;;  %v2326_v37 = vadd.f32 %v2278_v30, %v5419_v62  ;;  %v2299_v39 = vmul.f32 0.6931472, %v3870_v28  ;;  %v2359_v2 = vmax.f32 %v5408_v49, 0.0  ;;  %v2379_v8 = vsub.f32 0.0, %v2371_v55 }
 0x9ee   :  { %v3874_v44 = vpop.eup %3873  ;;  %v2290_v40 = vmul.f32 0.6931472, %v3872_v33  ;;  %v2338_v17 = vsel %vm2332_vm6, %v2327_v27, 0.0  ;;  %v2393_v22 = vmul.f32 1.442695, %v2380_v61  ;;  %vm2506_vm9 = vcmask 0  }
 0x9ef   :  { %v3876_v34 = vpop.eup %3875  ;;  %v2336_v45 = vsel %vm2332_vm6, %v2326_v37, 0.0  ;;  %v2306_v62 = vadd.f32 1.0, %v3874_v44  ;;  %v2309_v47 = vmul.f32 -0.5, %v3874_v44  ;;  %v2305_v0 = vsel %vm5488_vm11, %v2302_v54, %v2299_v39 }
 0x9f0   :  { %v5501_v50 = vpop.eup %3877  ;;  %v2337_v51 = vadd.f32 %v2336_v45, %v2335_v29  ;;  %v2296_v56 = vsel %vm5497_vm12, %v2293_v42, %v2290_v40  ;;  %v2408_v59 = vadd.f32 1.0, %v3876_v34  ;;  %v2312_v1 = vand.u32 2147483647, %v3874_v44 }
 0x9f1   :  { %3885 = vlog2.f32 %v2306_v62  ;;  %v5508_v53 = vpop.eup %3879  ;;  %v2399_v23 = vadd.f32 1.0, %v5501_v50  ;;  %v2328_v7 = vadd.f32 %v2296_v56, %v5430_v5  ;;  %v2310_v10 = vadd.f32 1.0, %v2309_v47 }
 0x9f2   :  { %3887 = vlog2.f32 %v2408_v59  ;;  %v2411_v11 = vmul.f32 -0.5, %v3876_v34  ;;  %v5515_v12 = vpop.eup %3881  ;;  %v2402_v58 = vmul.f32 -0.5, %v5501_v50  ;;  %v2426_v20 = vadd.f32 1.0, %v5508_v53 }
 0x9f3   :  { %3889 = vlog2.f32 %v2399_v23  ;;  %v5519_v16 = vpop.eup %3883  ;;  %v2374_v5 = vand.u32 2147483647, %v5454_v31  ;;  %v2329_v24 = vadd.f32 %v2305_v0, %v5421_v63  ;;  %vm5525_vm13 = vcmp.lt.f32.partialorder %v2312_v1, 0.0004427343 }
 0x9f4   :  { %v2414_v9 = vand.u32 2147483647, %v3876_v34  ;;  %v2417_v26 = vadd.f32 1.0, %v5515_v12  ;;  %v2340_v13 = vsel %vm2332_vm6, %v2328_v7, 0.0  ;;  %v2311_v52 = vmul.f32 %v3874_v44, %v2310_v10 }
 0x9f5   :  { %v2412_v28 = vadd.f32 1.0, %v2411_v11  ;;  %3891 = vlog2.f32 %v2426_v20  ;;  %v2403_v29 = vadd.f32 1.0, %v2402_v58  ;;  %v2429_v57 = vmul.f32 -0.5, %v5508_v53 }
 0x9f6   :  { %3893 = vlog2.f32 %v2417_v26  ;;  %v2391_v30 = vmul.f32 1.442695, %v2379_v8  ;;  %v2420_v32 = vmul.f32 -0.5, %v5515_v12  ;;  %v2382_v63 = vsub.f32 0.0, %v2374_v5 }
 0x9f7   :  { %3895 = vpow2.f32 %v2393_v22  ;;  %v2373_v33 = vand.u32 2147483647, %v5462_v36  ;;  %vm5534_vm14 = vcmp.lt.f32.partialorder %v2414_v9, 0.0004427343  ;;  %v2405_v37 = vand.u32 2147483647, %v5501_v50 }
 0x9f8   :  { %3897 = vpow2.f32 %v2391_v30  ;;  %v2315_v41 = vadd.f32 1.0, %v5519_v16  ;;  %v2413_v44 = vmul.f32 %v3876_v34, %v2412_v28  ;;  %v2432_v4 = vand.u32 2147483647, %v5508_v53 }
 0x9f9   :  { %v2397_v39 = vmul.f32 1.442695, %v2382_v63  ;;  %v2381_v40 = vsub.f32 0.0, %v2373_v33  ;;  %v2404_v45 = vmul.f32 %v5501_v50, %v2403_v29  ;;  %v2430_v46 = vadd.f32 1.0, %v2429_v57 }
 0x9fa   :  { %v2339_v62 = vadd.f32 %v2338_v17, %v2337_v51  ;;  %v2421_v54 = vadd.f32 1.0, %v2420_v32  ;;  %v2423_v56 = vand.u32 2147483647, %v5515_v12  ;;  %v2342_v50 = vsel %vm2332_vm6, %v2329_v24, 0.0 }
 0x9fb   :  { %v3886_v21 = vpop.eup %3885  ;;  %3899 = vpow2.f32 %v2397_v39  ;;  %v2395_v55 = vmul.f32 1.442695, %v2381_v40  ;;  %vm2406_vm15 = vcmp.lt.f32.partialorder %v2405_v37, 0.0004427343  ;;  %v2361_v23 = vmax.f32 %v5426_v3, 0.0 }
 0x9fc   :  { %v2308_v42 = vmul.f32 0.6931472, %v3886_v21  ;;  %v3888_v47 = vpop.eup %3887  ;;  %3901 = vlog2.f32 %v2315_v41  ;;  %v2341_v61 = vadd.f32 %v2340_v13, %v2339_v62  ;;  %vm5552_vm0 = vcmp.lt.f32.partialorder %v2432_v4, 0.0004427343 }
 0x9fd   :  { %v3890_v27 = vpop.eup %3889  ;;  %v2410_v34 = vmul.f32 0.6931472, %v3888_v47  ;;  %3903 = vpow2.f32 %v2395_v55  ;;  %v2431_v5 = vmul.f32 %v5508_v53, %v2430_v46  ;;  %vm2424_vm2 = vcmp.lt.f32.partialorder %v2423_v56, 0.0004427343 }
 0x9fe   :  { %v2314_v59 = vsel %vm5525_vm13, %v2311_v52, %v2308_v42  ;;  %v2401_v1 = vmul.f32 0.6931472, %v3890_v27  ;;  %v2343_v7 = vadd.f32 %v2342_v50, %v2341_v61  ;;  %v2318_v49 = vmul.f32 -0.5, %v5519_v16 }
 0x9ff   :  { %v2330_v0 = vadd.f32 %v2314_v59, %v5432_v6  ;;  %v2416_v51 = vsel %vm5534_vm14, %v2413_v44, %v2410_v34  ;;  %v3892_v10 = vpop.eup %3891  ;;  %v2321_v21 = vand.u32 2147483647, %v5519_v16  ;;  %v2219_v42 = vmax.f32 %v2211_v43, 0.0 }
 0xa00   :  { %v2472_v11 = vadd.f32 %v2416_v51, %v2360_v18  ;;  %v2407_v58 = vsel %vm2406_vm15, %v2404_v45, %v2401_v1  ;;  %v3894_v17 = vpop.eup %3893  ;;  %v2428_v22 = vmul.f32 0.6931472, %v3892_v10  ;;  %v2422_v18 = vmul.f32 %v5515_v12, %v2421_v54 }
 0xa01   :  { %v2344_v6 = vsel %vm2332_vm6, %v2330_v0, 0.0  ;;  %v2471_v20 = vadd.f32 %v2407_v58, %v2359_v2  ;;  %v3896_v24 = vpop.eup %3895  ;;  %v2419_v48 = vmul.f32 0.6931472, %v3894_v17  ;;  %v2319_v33 = vadd.f32 1.0, %v2318_v49 }
 0xa02   :  { %v2345_v3 = vadd.f32 %v2344_v6, %v2343_v7  ;;  %v2480_v25 = vsel %vm2332_vm6, %v2472_v11, 0.0  ;;  %v3898_v9 = vpop.eup %3897  ;;  %v2434_v13 = vsel %vm5552_vm0, %v2431_v5, %v2428_v22  ;;  %v2444_v52 = vadd.f32 1.0, %v3896_v24 }
 0xa03   :  { %v2479_v26 = vsel %vm2332_vm6, %v2471_v20, 0.0  ;;  %v2425_v28 = vsel %vm2424_vm2, %v2422_v18, %v2419_v48  ;;  %v2474_v53 = vadd.f32 %v2434_v13, %v2362_v15  ;;  %v2435_v57 = vadd.f32 1.0, %v3898_v9 }
 0xa04   :  { %v2481_v2 = vadd.f32 %v2480_v25, %v2479_v26  ;;  %v2473_v29 = vadd.f32 %v2425_v28, %v2361_v23  ;;  %3905 = vlog2.f32 %v2444_v52  ;;  %v2447_v41 = vmul.f32 -0.5, %v3896_v24 }
 0xa05   :  { %v3900_v30 = vpop.eup %3899  ;;  %3907 = vlog2.f32 %v2435_v57  ;;  %v2484_v44 = vsel %vm2332_vm6, %v2474_v53, 0.0  ;;  %v2438_v15 = vmul.f32 -0.5, %v3898_v9  ;;  %v2320_v40 = vmul.f32 %v5519_v16, %v2319_v33 }
 0xa06   :  { %v3902_v12 = vpop.eup %3901  ;;  %v2482_v32 = vsel %vm2332_vm6, %v2473_v29, 0.0  ;;  %v2462_v63 = vadd.f32 1.0, %v3900_v30  ;;  %v2448_v45 = vadd.f32 1.0, %v2447_v41  ;;  %v2465_v46 = vmul.f32 -0.5, %v3900_v30 }
 0xa07   :  { %v3904_v35 = vpop.eup %3903  ;;  %v2483_v37 = vadd.f32 %v2482_v32, %v2481_v2  ;;  %v2317_v39 = vmul.f32 0.6931472, %v3902_v12  ;;  %vm2322_vm3 = vcmp.lt.f32.partialorder %v2321_v21, 0.0004427343  ;;  %v2450_v62 = vand.u32 2147483647, %v3896_v24 }
 0xa08   :  { %3909 = vlog2.f32 %v2462_v63  ;;  %v2453_v60 = vadd.f32 1.0, %v3904_v35  ;;  %v2439_v54 = vadd.f32 1.0, %v2438_v15  ;;  %v2456_v56 = vmul.f32 -0.5, %v3904_v35  ;;  %v2825_v12 = vld [vmem:[#allocation38] sm:$0xff]  ;;  %v2826_v32 = vld [vmem:[#allocation38 + $0x8] sm:$0xff]  ;;  %v2828_v63 = vld [vmem:[#allocation38 + $0x18] sm:$0xff] }
 0xa09   :  { %v2485_v4 = vadd.f32 %v2484_v44, %v2483_v37  ;;  %v2323_v47 = vsel %vm2322_vm3, %v2320_v40, %v2317_v39  ;;  %v2441_v59 = vand.u32 2147483647, %v3898_v9  ;;  %v2449_v61 = vmul.f32 %v3896_v24, %v2448_v45 }
 0xa0a   :  { %3911 = vlog2.f32 %v2453_v60  ;;  %v2331_v55 = vadd.f32 %v2323_v47, %v2219_v42  ;;  %v2466_v0 = vadd.f32 1.0, %v2465_v46  ;;  %vm5575_vm4 = vcmp.lt.f32.partialorder %v2450_v62, 0.0004427343  ;;  %v3069_v47 = vld [vmem:[#allocation36] ss:$0 sm:$0xff] }
 0xa0b   :  { %v2468_v38 = vand.u32 2147483647, %v3900_v30  ;;  %v2440_v7 = vmul.f32 %v3898_v9, %v2439_v54  ;;  %v2457_v10 = vadd.f32 1.0, %v2456_v56  ;;  %v2364_v58 = vmax.f32 %v5437_v14, 0.0 }
 0xa0c   :  { %v2346_v1 = vsel %vm2332_vm6, %v2331_v55, 0.0  ;;  %v2363_v8 = vmax.f32 %v5441_v19, 0.0  ;;  %vm2442_vm5 = vcmp.lt.f32.partialorder %v2441_v59, 0.0004427343  ;;  %v2459_v6 = vand.u32 2147483647, %v3904_v35 }
 0xa0d   :  { %v2347_v43 = vadd.f32 %v2346_v1, %v2345_v3  ;;  %v2467_v22 = vmul.f32 %v3900_v30, %v2466_v0  ;;  %vm2469_vm7 = vcmp.lt.f32.partialorder %v2468_v38, 0.0004427343  ;;  %v2458_v18 = vmul.f32 %v3904_v35, %v2457_v10 }
 0xa0e   :  { %v3906_v27 = vpop.eup %3905  ;;  %v2366_v26 = vmax.f32 %v5454_v31, 0.0  ;;  %v2365_v14 = vmax.f32 %v5462_v36, 0.0  ;;  %vm2460_vm8 = vcmp.lt.f32.partialorder %v2459_v6, 0.0004427343  ;;  %v3772_v31 = vpack.c.bf16 %v2826_v32, %v2825_v12  ;;  %v2827_v36 = vld [vmem:[#allocation38 + $0x10] sm:$0xff] }
 0xa0f   :  { %v2446_v34 = vmul.f32 0.6931472, %v3906_v27  ;;  %v3908_v50 = vpop.eup %3907  ;;  %2348 = vadd.xlane.f32.xlu0 %v2347_v43  ;;  %v3776_v33 = vpack.c.bf16 %v2828_v63, %v2827_v36 }
 0xa10   :  { %v2437_v23 = vmul.f32 0.6931472, %v3908_v50  ;;  %3773 = vmatprep.subr.bf16.mxu0 %v3772_v31 }
 0xa11   :  { %v2452_v51 = vsel %vm5575_vm4, %v2449_v61, %v2446_v34  ;;  %3775 = vmatpush3.bf16.msra.mxu0 %v3772_v31 }
 0xa12   :  { %v3910_v11 = vpop.eup %3909  ;;  %v2443_v17 = vsel %vm2442_vm5, %v2440_v7, %v2437_v23  ;;  %v2476_v24 = vadd.f32 %v2452_v51, %v2364_v58  ;;  %3777 = vmatprep.subr.bf16.mxu0 %v3776_v33 }
 0xa13   :  { %v2464_v20 = vmul.f32 0.6931472, %v3910_v11  ;;  %v2475_v3 = vadd.f32 %v2443_v17, %v2363_v8 }
 0xa14   :  { %v3912_v5 = vpop.eup %3911  ;;  %v2488_v52 = vsel %vm2332_vm6, %v2476_v24, 0.0 }
 0xa15   :  { %v2470_v25 = vsel %vm2469_vm7, %v2467_v22, %v2464_v20  ;;  %v2455_v48 = vmul.f32 0.6931472, %v3912_v5  ;;  %v2486_v9 = vsel %vm2332_vm6, %v2475_v3, 0.0  ;;  %3779 = vmatpush3.bf16.msra.mxu0 %v3776_v33 }
 0xa16   :  { %v2487_v19 = vadd.f32 %v2486_v9, %v2485_v4  ;;  %v2478_v49 = vadd.f32 %v2470_v25, %v2366_v26 }
 0xa17   :  { %v2461_v13 = vsel %vm2460_vm8, %v2458_v18, %v2455_v48 }
 0xa18   :  { %v2477_v2 = vadd.f32 %v2461_v13, %v2365_v14  ;;  %v2489_v28 = vadd.f32 %v2488_v52, %v2487_v19  ;;  %v2492_v57 = vsel %vm2332_vm6, %v2478_v49, 0.0 }
 0xa1a   :  { %v2490_v53 = vsel %vm2332_vm6, %v2477_v2, 0.0 }
 0xa1b   :  { %v2491_v29 = vadd.f32 %v2490_v53, %v2489_v28 }
 0xa1d   :  { %v2493_v30 = vadd.f32 %v2492_v57, %v2491_v29 }
 0xa1f   :  { %2494 = vadd.xlane.f32.xlu1 %v2493_v30 }
 0xa9c   :  { %v2349_v35 = vpop.xlane.xlu0 %2348 }
 0xa9d   :  { %v2350_v37 = vrot.slane %v2349_v35, 4 }
 0xa9f   :  { %v2351_v41 = vadd.f32 %v2350_v37, %v2349_v35 }
 0xaa1   :  { %v2352_v21 = vrot.slane %v2351_v41, 2 }
 0xaa3   :  { %v2353_v44 = vadd.f32 %v2352_v21, %v2351_v41 }
 0xaa5   :  { %v2354_v60 = vrot.slane %v2353_v44, 1 }
 0xaa7   :  { %v2355_v15 = vadd.f32 %v2354_v60, %v2353_v44 }
 0xaa9   :  { %3804 = vpush %v2355_v15 }
 0xaac   :  { %v2495_v4 = vpop.xlane.xlu1 %2494 }
 0xaad   :  { %v2496_v39 = vrot.slane %v2495_v4, 4 }
 0xaaf   :  { %v2497_v40 = vadd.f32 %v2496_v39, %v2495_v4 }
 0xab1   :  { %v2498_v42 = vrot.slane %v2497_v40, 2 }
 0xab3   :  { %v2499_v45 = vadd.f32 %v2498_v42, %v2497_v40 }
 0xab5   :  { %v2500_v46 = vrot.slane %v2499_v45, 1 }
 0xab7   :  { %v2501_v62 = vadd.f32 %v2500_v46, %v2499_v45 }
 0xab9   :  { %3806 = vpush %v2501_v62 }
 0xaba   :  { %v3584_v54 = vpop.f32.mrb[32].mxu1 }
 0xabb   :  { %v2820_v56 = vadd.f32 %v3584_v54, %v3069_v47  ;;  %v2814_v55 = vpop.f32.mrb[33].mxu1 }
 0xabc   :  { %v2815_v27 = vadd.f32 %v3069_v47, %v2814_v55 }
 0xabd   :  { %v2824_v34 = vmax.f32 %v2820_v56, 0.0 }
 0xabe   :  { %v2823_v59 = vmax.f32 %v2815_v27, 0.0 }
 0xac0   :  { %3593 = vmatprep.mubr.msk.f32.mxu0 %vm547_vm1, %v2823_v59 }
 0xac1   :  { %3594 = vmatmul.mubr.msk.f32.vlgmr.msra.gmra.mrb[38].mxu0 %vm547_vm1, %v2824_v34 }
 0xada   :  { %s3805_s25 = spop %3804 }
 0xadb   :  { %v2357_v61 = vstv %s3805_s25 }
 0xadc   :  { %v2358_v1 = vmul.f32 0.015625, %v2357_v61 }
 0xaea   :  { %s3807_s17 = spop %3806 }
 0xaeb   :  { %v2503_v0 = vstv %s3807_s17 }
 0xaec   :  { %v2504_v50 = vmul.f32 0.015625, %v2503_v0 }
 0xaee   :  { %v2505_v16 = vadd.f32 %v2504_v50, %v2358_v1 }
 0xaf0   :  { %2507 = vst.msk [vmem:[#allocation42] sm:$0x1] %vm2506_vm9, %v2505_v16 }
 0xaf1   :  { %4452 = shalt.err (!%p4449_p0)
}
 0xaf2   :  { %s5702_s21 = sld [smem:[#allocation71_spill]] }
 0xaf8   :  { %s4453_s13 = scalar_lea.hbm %s5702_s21, 16 }
 0xaf9   :  { %p4454_p1 = scmp.ne.s32.totalorder %s5702_s21, %s4453_s13  ;;  %p4457_p2 = scmp.lt.u32.totalorder %s4453_s13, %s5702_s21 }
 0xafb   :  { %p4459_p3 = pnand %p4457_p2, %p4454_p1 }
 0xafd   :  { %4462 = shalt.err (!%p4459_p3)
}
 0xafe   :  { %2940 = dma.vmem_to_hbm [thread:$0]  %s2938_s9, 16, %s5702_s21, [#allocation43]   ;;  %v3072_v38 = vld [vmem:[#allocation2] ss:$0 sm:$0xff] }
 0xaff   :  { %s4545_s26 = smov [#allocation41]  }
 0xb00   :  { %s2924_s0 = sshll.u32 %s4545_s26, 4  ;;  %s2925_s0 = int_to_ptr.vmem [resolvable:$true] %s2924_s0 }
 0xb01   :  { %s4463_s16 = scalar_lea.vmem %s2925_s0, 256  ;;  %p4468_p5 = scmp.lt.s32.totalorder %s2925_s0, %s2925_s0 }
 0xb02   :  { %p4464_p4 = scmp.ne.s32.totalorder %s2925_s0, %s4463_s16  ;;  %p4469_p6 = scmp.lt.s32.totalorder %s4463_s16, %s4463_s16 }
 0xb04   :  { %p4470_p7 = por %p4469_p6, %p4468_p5 }
 0xb06   :  { %p4471_p8 = pnand %p4470_p7, %p4464_p4 }
 0xb94   :  { %v3595_v43 = vpop.f32.mrb[38].mxu0 }
 0xb95   :  { %v2914_v51 = vadd.f32 %v3595_v43, %v3072_v38  ;;  %v2908_v23 = vpop.f32.mrb[39].mxu0 }
 0xb96   :  { %v2909_v7 = vadd.f32 %v3072_v38, %v2908_v23 }
 0xb97   :  { %2918 = vst.msk [vmem:[#allocation41 + $0x8] sm:$0xff] %vm2332_vm6, %v2914_v51 }
 0xb98   :  { %2917 = vst.msk [vmem:[#allocation41] sm:$0xff] %vm2332_vm6, %v2909_v7 }
 0xb99   :  { %4474 = shalt.err (!%p4471_p8)
}
 0xb9a   :  { %s5703_s28 = sld [smem:[#allocation70_spill]] }
 0xba0   :  { %s4475_s4 = scalar_lea.hbm %s5703_s28, 256 }
 0xba1   :  { %p4476_p9 = scmp.ne.s32.totalorder %s5703_s28, %s4475_s4  ;;  %p4479_p10 = scmp.lt.u32.totalorder %s4475_s4, %s5703_s28 }
 0xba3   :  { %p4481_p11 = pnand %p4479_p10, %p4476_p9 }
 0xba5   :  { %4484 = shalt.err (!%p4481_p11)
}
 0xba6   :  { %2930 = dma.vmem_to_hbm [thread:$0]  %s2925_s0, 256, %s5703_s28, [#allocation5], %s4517_s1, %s4517_s1, %s4518_s27  }
 0xba7   :  { %4511 = dma.done.wait [#allocation5], 256  }
 0xba8   :  { %4512 = vsyncadd [#allocation5], 4294967040 }
 0xba9   :  { %4513 = dma.done.wait [#allocation43], 16  }
 0xbaa   :  { %4514 = vsyncadd [#allocation43], 4294967280 }
 0xbab   :  { %2947 = vsyncpa [#allocation4], 1 }
 0xbac   :  { %2948 = vsyncpa [#allocation7], 1 }
 0xbad   :  { %2949 = vsyncpa [#allocation10], 1 }
 0xbae   :  { %2950 = vsyncpa [#allocation13], 1 }
 0xbaf   :  { %2951 = vsyncpa [#allocation16], 1 }
 0xbb0   :  { %2952 = vsyncpa [#allocation19], 1 }
 0xbb1   :  { %2953 = vsyncpa [#allocation22], 1 }
 0xbb2   :  { %2954 = vsyncpa [#allocation25], 1 }
 0xbb3   :  { %2955 = vsyncpa [#allocation28], 1 }
 0xbb4   :  { %2956 = vsyncpa [#allocation31], 1 }
 0xbb5   :  { %2957 = vsyncpa [#allocation34], 1 }
 0xbb6   :  { %2958 = vsyncpa [#allocation37], 1 }
 0xbb7   :  { %2959 = vsyncpa [#allocation40], 1 }
 0xbb8   :  { %2960 = vsyncpa [#allocation5], 1 }
 0xbb9   :  { %2961 = vsyncpa [#allocation43], 1 }

</bundles_post_ra>
